<compile_context>
chip_gen: v7x
topology: tpu7x:2x2x1
jax: 0.10.0
libtpu: 0.0.40
codegen_flags: <defaults>
</compile_context>

<pallas_src>
import functools

import jax
import jax.numpy as jnp
from jax.experimental import pallas as pl
from jax.experimental.pallas import tpu as pltpu

EMBED_DIM = 128     # module default is 200; lane-aligned choice for the demo
C1 = 128            # Conv1d(embed_dim -> 128)
C2 = 64             # Conv1d(128 -> 64)
H_FC = 32           # Linear(64 -> 32)
BN_EPS = 1e-5
LN_EPS = 1e-5


def _gelu(x):
    # tanh-form GELU: single EUP transcendental (free bundle slot) instead of
    # the exact-erf rational polynomial on the VALU. ~1e-3 vs torch exact erf.
    return jax.nn.gelu(x, approximate=True)


def _round_up(x, m):
    return ((x + m - 1) // m) * m


def _pick_tile_b(batch):
    """Adaptive batch tile: <=1024 rows per tile to amortize grid-step overhead,
    with an even tile count whenever the batch allows (v7x megacore)."""
    b_pad = _round_up(max(batch, 1), 128)
    num = -(-b_pad // 1024)                 # minimum #tiles with tile <= 1024
    if num % 2 == 1 and b_pad >= 256:
        num += 1                            # even tile count -> both TCs busy
    return max(_round_up(-(-b_pad // num), 128), 128)


def _banded_conv_weight(w):
    """(3, Cin, Cout) per-tap weights -> (3*Cin, 3*Cout) block-banded matrix.

    concat(y0, y1, y2) = concat(x0, x1, x2) @ W_banded reproduces
    Conv1d(kernel_size=3, padding=1) on a length-3 sequence: output position p
    sees input position q through tap k = q - p + 1; out-of-range taps are the
    zero blocks (i.e. the zero padding at positions -1 and 3).
    """
    _, cin, cout = w.shape
    zero = jnp.zeros((cin, cout), w.dtype)
    rows = []
    for q in range(3):              # input position
        blocks = []
        for p in range(3):          # output position
            k = q - p + 1
            blocks.append(w[k] if 0 <= k <= 2 else zero)
        rows.append(jnp.concatenate(blocks, axis=1))
    return jnp.concatenate(rows, axis=0)        # (3*Cin, 3*Cout)


def cnn_kernel(x_ref, w1b_ref, v1_ref, w2b_ref, v2_ref,
               fc1w_ref, v3_ref, fc2w_ref, out_ref):
    dot = lambda a, b: jnp.dot(a, b, preferred_element_type=jnp.float32)

    x = x_ref[...]                                   # (TB, 3*D) bf16, positions on lanes

    # ---- Conv1d(D, 128, k=3, pad=1): one banded matmul, K=3*D, N=3*C1 (f32 acc)
    y = dot(x, w1b_ref[...]) + v1_ref[0:1, :]        # + b1 (tiled per position)
    # GELU -> BatchNorm1d(128) (eval mode, folded) -> Dropout (identity)
    y = _gelu(y) * v1_ref[1:2, :] + v1_ref[2:3, :]

    # ---- Conv1d(128, 64, k=3, pad=1): one banded matmul, K=3*C1, N=3*C2
    z = dot(y.astype(w2b_ref.dtype), w2b_ref[...]) + v2_ref[0:1, :]
    z = _gelu(z) * v2_ref[1:2, :] + v2_ref[2:3, :]

    # ---- AdaptiveMaxPool1d(1): max over the 3 positions (lane slices of width C2)
    pooled = jnp.maximum(jnp.maximum(z[:, 0:C2], z[:, C2:2 * C2]),
                         z[:, 2 * C2:3 * C2])        # (TB, C2)

    # ---- fc: Linear(64,32) -> LayerNorm(32) -> GELU -> Dropout (id) -> Linear(32,1)
    h = dot(pooled.astype(fc1w_ref.dtype), fc1w_ref[...]) + v3_ref[0:1, :]   # (TB, 32)
    mu = jnp.mean(h, axis=-1, keepdims=True)
    var = jnp.mean((h - mu) ** 2, axis=-1, keepdims=True)        # biased, like torch LN
    h = (h - mu) * jax.lax.rsqrt(var + LN_EPS)
    h = _gelu(h * v3_ref[1:2, :] + v3_ref[2:3, :])

    # Linear(32, 1) as a VPU multiply + lane reduction.  fc2 bias was folded in
    # the wrapper as fc2b / H_FC per lane (exact: H_FC is a power of two), so
    # the reduction yields h @ fc2w + fc2b.  Store is lane-dense: (1, TB).
    score = jnp.sum(h * fc2w_ref[...] + v3_ref[3:4, :], axis=-1)
    out_ref[...] = score.reshape(1, -1)


def init_params(key, num_entities, num_relations, embed_dim=EMBED_DIM):
    ks = jax.random.split(key, 8)
    xav = lambda k, shape: jax.random.normal(k, shape, jnp.float32) * jnp.sqrt(
        2.0 / (shape[0] + shape[1]))
    params = {
        # embeddings: xavier_normal_ as in _init_weights
        "entity_embed": xav(ks[0], (num_entities, embed_dim)),
        "rel_embed": xav(ks[1], (num_relations, embed_dim)),
        # conv weights stored as (tap, Cin, Cout) == torch (Cout, Cin, 3).transpose(2,1,0)
        "w1": jax.random.normal(ks[2], (3, embed_dim, C1), jnp.float32) * 0.05,
        "b1": jax.random.normal(ks[3], (1, C1), jnp.float32) * 0.01,
        "w2": jax.random.normal(ks[4], (3, C1, C2), jnp.float32) * 0.05,
        "b2": jax.random.normal(ks[5], (1, C2), jnp.float32) * 0.01,
        # BatchNorm default buffers/affine params (eval mode)
        "bn1_gamma": jnp.ones((1, C1), jnp.float32),
        "bn1_beta": jnp.zeros((1, C1), jnp.float32),
        "bn1_mean": jnp.zeros((1, C1), jnp.float32),
        "bn1_var": jnp.ones((1, C1), jnp.float32),
        "bn2_gamma": jnp.ones((1, C2), jnp.float32),
        "bn2_beta": jnp.zeros((1, C2), jnp.float32),
        "bn2_mean": jnp.zeros((1, C2), jnp.float32),
        "bn2_var": jnp.ones((1, C2), jnp.float32),
        # fc weights stored (in, out) == torch weight.T
        "fc1w": jax.random.normal(ks[6], (C2, H_FC), jnp.float32) * 0.1,
        "fc1b": jnp.zeros((1, H_FC), jnp.float32),
        "ln_gamma": jnp.ones((1, H_FC), jnp.float32),
        "ln_beta": jnp.zeros((1, H_FC), jnp.float32),
        "fc2w": jax.random.normal(ks[7], (H_FC, 1), jnp.float32) * 0.1,
        "fc2b": jnp.zeros((1, 1), jnp.float32),
    }
    return params


def prepare_params(params):
    """One-time (outside jit) preparation of kernel-ready tensors.

    * embedding tables pre-cast to bf16 so the per-call gather/concat glue is
      bf16 end-to-end (half the HBM traffic of the dominant per-row pass);
    * banded conv weights, folded BatchNorm scale/shift and the packed
      per-channel slabs are built once instead of per forward call.
    """
    w1b = _banded_conv_weight(params["w1"]).astype(jnp.bfloat16)     # (3D, 3*C1)
    w2b = _banded_conv_weight(params["w2"]).astype(jnp.bfloat16)     # (3*C1, 3*C2)

    bn1s = params["bn1_gamma"] * jax.lax.rsqrt(params["bn1_var"] + BN_EPS)
    bn1b = params["bn1_beta"] - params["bn1_mean"] * bn1s
    bn2s = params["bn2_gamma"] * jax.lax.rsqrt(params["bn2_var"] + BN_EPS)
    bn2b = params["bn2_beta"] - params["bn2_mean"] * bn2s

    v1 = jnp.concatenate([jnp.tile(params["b1"], (1, 3)),
                          jnp.tile(bn1s, (1, 3)),
                          jnp.tile(bn1b, (1, 3))], axis=0)           # (3, 3*C1)
    v2 = jnp.concatenate([jnp.tile(params["b2"], (1, 3)),
                          jnp.tile(bn2s, (1, 3)),
                          jnp.tile(bn2b, (1, 3))], axis=0)           # (3, 3*C2)
    # fc2 bias pre-spread as fc2b / H_FC per lane (exact: H_FC power of two)
    v3 = jnp.concatenate([params["fc1b"], params["ln_gamma"], params["ln_beta"],
                          jnp.full((1, H_FC), params["fc2b"][0, 0] / H_FC,
                                   jnp.float32)], axis=0)            # (4, H_FC)

    return {
        "ent_bf16": params["entity_embed"].astype(jnp.bfloat16),
        "rel_bf16": params["rel_embed"].astype(jnp.bfloat16),
        "w1b": w1b, "v1": v1,
        "w2b": w2b, "v2": v2,
        "fc1w": params["fc1w"].astype(jnp.bfloat16),                 # (C2, H_FC)
        "v3": v3,
        "fc2w": params["fc2w"].T.astype(jnp.float32),                # (1, H_FC) VPU row
    }


@functools.partial(jax.jit, static_argnames=("tile_b",))
def simplified_cnn_forward(triples, prepared, tile_b=None):
    ent, rel = prepared["ent_bf16"], prepared["rel_bf16"]
    D = ent.shape[1]
    B = triples.shape[0]
    if tile_b is None:
        tile_b = _pick_tile_b(B)

    # --- glue: bf16 embedding gather + channels-last concat -> (B, 3*D)
    h = ent[triples[:, 0]]
    r = rel[triples[:, 1]]
    t = ent[triples[:, 2]]
    x = jnp.concatenate([h, r, t], axis=-1)          # (B, 3*D) bf16, positions on lanes

    # pad the batch so the grid tiles evenly; padded rows are sliced off at the end
    num_tiles = pl.cdiv(B, tile_b)
    B_pad = num_tiles * tile_b
    if B_pad != B:
        x = jnp.pad(x, ((0, B_pad - B), (0, 0)))

    w1b, v1 = prepared["w1b"], prepared["v1"]
    w2b, v2 = prepared["w2b"], prepared["v2"]
    fc1w, v3, fc2w = prepared["fc1w"], prepared["v3"], prepared["fc2w"]

    LD, LC1, LC2 = 3 * D, 3 * C1, 3 * C2
    full = lambda shape: pl.BlockSpec(shape, lambda i: (0,) * len(shape))

    cost = pl.CostEstimate(
        flops=2 * B_pad * (LD * LC1 + LC1 * LC2 + C2 * H_FC + H_FC),
        transcendentals=B_pad * (LC1 + LC2 + H_FC),
        bytes_accessed=(B_pad * LD * 2 + B_pad * 4
                        + (LD * LC1 + LC1 * LC2 + C2 * H_FC) * 2
                        + (3 * LC1 + 3 * LC2 + 5 * H_FC) * 4),
    )

    out = pl.pallas_call(
        cnn_kernel,
        out_shape=jax.ShapeDtypeStruct((num_tiles, tile_b), jnp.float32),
        grid=(num_tiles,),
        in_specs=[
            pl.BlockSpec((tile_b, LD), lambda i: (i, 0)),  # x tile (batch on sublanes)
            full((LD, LC1)), full((3, LC1)),               # banded conv1 W, [b1; bn1s; bn1b]
            full((LC1, LC2)), full((3, LC2)),              # banded conv2 W, [b2; bn2s; bn2b]
            full((C2, H_FC)), full((4, H_FC)),             # fc1 W, [fc1b; ln_g; ln_b; fc2b/H]
            full((1, H_FC)),                               # fc2 W row
        ],
        out_specs=pl.BlockSpec((1, tile_b), lambda i: (i, 0)),   # lane-dense scores
        compiler_params=pltpu.CompilerParams(
            # independent batch tiles -> megacore-shardable on v7x; the tile
            # picker keeps num_tiles even whenever the batch allows.
            dimension_semantics=("parallel",)),
        cost_estimate=cost,
    )(x, w1b, v1, w2b, v2, fc1w, v3, fc2w)

    return out.reshape(-1)[:B]                           # .squeeze() -> (B,)


def _reference_forward(triples, params):
    """Pure-JAX f32 reference mirroring the PyTorch eval-mode forward (exact erf GELU)."""
    gelu_exact = lambda v: jax.nn.gelu(v, approximate=False)
    ent, rel = params["entity_embed"], params["rel_embed"]
    x = jnp.stack([ent[triples[:, 0]], rel[triples[:, 1]], ent[triples[:, 2]]], axis=1)
    xp = jnp.pad(x, ((0, 0), (1, 1), (0, 0)))

    def conv(xin_pad, w, b):  # w: (3, Cin, Cout)
        return jnp.stack(
            [sum(xin_pad[:, p + k, :] @ w[k] for k in range(3)) + b[0]
             for p in range(3)], axis=1)

    bn1s = params["bn1_gamma"] * jax.lax.rsqrt(params["bn1_var"] + BN_EPS)
    bn1b = params["bn1_beta"] - params["bn1_mean"] * bn1s
    bn2s = params["bn2_gamma"] * jax.lax.rsqrt(params["bn2_var"] + BN_EPS)
    bn2b = params["bn2_beta"] - params["bn2_mean"] * bn2s

    y = gelu_exact(conv(xp, params["w1"], params["b1"])) * bn1s[None] + bn1b[None]
    yp = jnp.pad(y, ((0, 0), (1, 1), (0, 0)))
    z = gelu_exact(conv(yp, params["w2"], params["b2"])) * bn2s[None] + bn2b[None]
    pooled = jnp.max(z, axis=1)
    h = pooled @ params["fc1w"] + params["fc1b"][0]
    mu = jnp.mean(h, -1, keepdims=True)
    var = jnp.mean((h - mu) ** 2, -1, keepdims=True)
    h = (h - mu) * jax.lax.rsqrt(var + LN_EPS) * params["ln_gamma"][0] + params["ln_beta"][0]
    h = gelu_exact(h)
    return (h @ params["fc2w"] + params["fc2b"][0])[:, 0]


if __name__ == "__main__":
    num_entities, num_relations, batch = 10, 5, 16
    key = jax.random.PRNGKey(0)
    k_params, k_h, k_r, k_t = jax.random.split(key, 4)

    params = init_params(k_params, num_entities, num_relations)
    prepared = prepare_params(params)

    triples = jnp.stack(
        [jax.random.randint(k_h, (batch,), 0, num_entities),
         jax.random.randint(k_r, (batch,), 0, num_relations),
         jax.random.randint(k_t, (batch,), 0, num_entities)], axis=1).astype(jnp.int32)

    scores = simplified_cnn_forward(triples, prepared)
    scores = jax.block_until_ready(scores)

    ref = _reference_forward(triples, params)
    assert scores.shape == (batch,)
    # bf16 inputs/weights (f32 acc) + tanh-form GELU vs torch exact erf -> relaxed tol
    assert jnp.allclose(scores, ref, rtol=2e-2, atol=2e-2), (scores, ref)
    print("KERNEL_OK")
</pallas_src>

<mosaic_0001>
module attributes {stable_mosaic.version = 11 : i64} {
  func.func @cnn_kernel(%arg0: i32, %arg1: memref<128x384xbf16, #tpu.memory_space<vmem>>, %arg2: memref<384x384xbf16, #tpu.memory_space<vmem>>, %arg3: memref<3x384xf32, #tpu.memory_space<vmem>>, %arg4: memref<384x192xbf16, #tpu.memory_space<vmem>>, %arg5: memref<3x192xf32, #tpu.memory_space<vmem>>, %arg6: memref<64x32xbf16, #tpu.memory_space<vmem>>, %arg7: memref<4x32xf32, #tpu.memory_space<vmem>>, %arg8: memref<1x32xf32, #tpu.memory_space<vmem>>, %arg9: memref<1x128xf32, #tpu.memory_space<vmem>>) attributes {dimension_semantics = [#tpu.dimension_semantics<parallel>], iteration_bounds = array<i64: 1>, scalar_prefetch = 0 : i64, scratch_operands = 0 : i64, tpu.core_type = #tpu.core_type<tc>, window_params = [{transform_indices = @transform_0, window_bounds = array<i64: 128, 384>}, {pipeline_mode = #tpu.pipeline_mode<synchronous>, transform_indices = @transform_1, window_bounds = array<i64: 384, 384>}, {pipeline_mode = #tpu.pipeline_mode<synchronous>, transform_indices = @transform_2, window_bounds = array<i64: 3, 384>}, {pipeline_mode = #tpu.pipeline_mode<synchronous>, transform_indices = @transform_3, window_bounds = array<i64: 384, 192>}, {pipeline_mode = #tpu.pipeline_mode<synchronous>, transform_indices = @transform_4, window_bounds = array<i64: 3, 192>}, {pipeline_mode = #tpu.pipeline_mode<synchronous>, transform_indices = @transform_5, window_bounds = array<i64: 64, 32>}, {pipeline_mode = #tpu.pipeline_mode<synchronous>, transform_indices = @transform_6, window_bounds = array<i64: 4, 32>}, {pipeline_mode = #tpu.pipeline_mode<synchronous>, transform_indices = @transform_7, window_bounds = array<i64: 1, 32>}, {transform_indices = @transform_8, window_bounds = array<i64: 1, 128>}]} {
    %c0 = arith.constant 0 : index
    %c0_0 = arith.constant 0 : index
    %0 = vector.load %arg1[%c0, %c0_0] : memref<128x384xbf16, #tpu.memory_space<vmem>>, vector<128x384xbf16>
    %c0_1 = arith.constant 0 : index
    %c0_2 = arith.constant 0 : index
    %1 = vector.load %arg2[%c0_1, %c0_2] : memref<384x384xbf16, #tpu.memory_space<vmem>>, vector<384x384xbf16>
    %cst = arith.constant dense<0.000000e+00> : vector<128x384xf32>
    %2 = tpu.matmul %0, %1, %cst {dimension_numbers = #tpu.dot_dimension_numbers<[1], [0], [0], [1], [0, 0, 1, 1], [], []>} : vector<128x384xbf16>, vector<384x384xbf16>, vector<128x384xf32> -> vector<128x384xf32>
    %c0_3 = arith.constant 0 : index
    %c0_4 = arith.constant 0 : index
    %3 = vector.load %arg3[%c0_3, %c0_4] : memref<3x384xf32, #tpu.memory_space<vmem>>, vector<1x384xf32>
    %4 = vector.broadcast %3 : vector<1x384xf32> to vector<128x384xf32>
    %5 = arith.addf %2, %4 : vector<128x384xf32>
    %6 = arith.mulf %5, %5 : vector<128x384xf32>
    %7 = arith.mulf %5, %6 : vector<128x384xf32>
    %cst_5 = arith.constant 4.471500e-02 : f32
    %8 = vector.broadcast %cst_5 : f32 to vector<128x384xf32>
    %9 = arith.mulf %8, %7 : vector<128x384xf32>
    %10 = arith.addf %5, %9 : vector<128x384xf32>
    %cst_6 = arith.constant 0.797884583 : f32
    %11 = vector.broadcast %cst_6 : f32 to vector<128x384xf32>
    %12 = arith.mulf %11, %10 : vector<128x384xf32>
    %13 = math.tanh %12 : vector<128x384xf32>
    %cst_7 = arith.constant 1.000000e+00 : f32
    %14 = vector.broadcast %cst_7 : f32 to vector<128x384xf32>
    %15 = arith.addf %14, %13 : vector<128x384xf32>
    %cst_8 = arith.constant 5.000000e-01 : f32
    %16 = vector.broadcast %cst_8 : f32 to vector<128x384xf32>
    %17 = arith.mulf %16, %15 : vector<128x384xf32>
    %18 = arith.mulf %5, %17 : vector<128x384xf32>
    %c1 = arith.constant 1 : index
    %c0_9 = arith.constant 0 : index
    %19 = vector.load %arg3[%c1, %c0_9] : memref<3x384xf32, #tpu.memory_space<vmem>>, vector<1x384xf32>
    %20 = vector.broadcast %19 : vector<1x384xf32> to vector<128x384xf32>
    %21 = arith.mulf %18, %20 : vector<128x384xf32>
    %c2 = arith.constant 2 : index
    %c0_10 = arith.constant 0 : index
    %22 = vector.load %arg3[%c2, %c0_10] : memref<3x384xf32, #tpu.memory_space<vmem>>, vector<1x384xf32>
    %23 = vector.broadcast %22 : vector<1x384xf32> to vector<128x384xf32>
    %24 = arith.addf %21, %23 : vector<128x384xf32>
    %25 = arith.truncf %24 : vector<128x384xf32> to vector<128x384xbf16>
    %c0_11 = arith.constant 0 : index
    %c0_12 = arith.constant 0 : index
    %26 = vector.load %arg4[%c0_11, %c0_12] : memref<384x192xbf16, #tpu.memory_space<vmem>>, vector<384x192xbf16>
    %cst_13 = arith.constant dense<0.000000e+00> : vector<128x192xf32>
    %27 = tpu.matmul %25, %26, %cst_13 {dimension_numbers = #tpu.dot_dimension_numbers<[1], [0], [0], [1], [0, 0, 1, 1], [], []>} : vector<128x384xbf16>, vector<384x192xbf16>, vector<128x192xf32> -> vector<128x192xf32>
    %c0_14 = arith.constant 0 : index
    %c0_15 = arith.constant 0 : index
    %28 = vector.load %arg5[%c0_14, %c0_15] : memref<3x192xf32, #tpu.memory_space<vmem>>, vector<1x192xf32>
    %29 = vector.broadcast %28 : vector<1x192xf32> to vector<128x192xf32>
    %30 = arith.addf %27, %29 : vector<128x192xf32>
    %31 = arith.mulf %30, %30 : vector<128x192xf32>
    %32 = arith.mulf %30, %31 : vector<128x192xf32>
    %cst_16 = arith.constant 4.471500e-02 : f32
    %33 = vector.broadcast %cst_16 : f32 to vector<128x192xf32>
    %34 = arith.mulf %33, %32 : vector<128x192xf32>
    %35 = arith.addf %30, %34 : vector<128x192xf32>
    %cst_17 = arith.constant 0.797884583 : f32
    %36 = vector.broadcast %cst_17 : f32 to vector<128x192xf32>
    %37 = arith.mulf %36, %35 : vector<128x192xf32>
    %38 = math.tanh %37 : vector<128x192xf32>
    %cst_18 = arith.constant 1.000000e+00 : f32
    %39 = vector.broadcast %cst_18 : f32 to vector<128x192xf32>
    %40 = arith.addf %39, %38 : vector<128x192xf32>
    %cst_19 = arith.constant 5.000000e-01 : f32
    %41 = vector.broadcast %cst_19 : f32 to vector<128x192xf32>
    %42 = arith.mulf %41, %40 : vector<128x192xf32>
    %43 = arith.mulf %30, %42 : vector<128x192xf32>
    %c1_20 = arith.constant 1 : index
    %c0_21 = arith.constant 0 : index
    %44 = vector.load %arg5[%c1_20, %c0_21] : memref<3x192xf32, #tpu.memory_space<vmem>>, vector<1x192xf32>
    %45 = vector.broadcast %44 : vector<1x192xf32> to vector<128x192xf32>
    %46 = arith.mulf %43, %45 : vector<128x192xf32>
    %c2_22 = arith.constant 2 : index
    %c0_23 = arith.constant 0 : index
    %47 = vector.load %arg5[%c2_22, %c0_23] : memref<3x192xf32, #tpu.memory_space<vmem>>, vector<1x192xf32>
    %48 = vector.broadcast %47 : vector<1x192xf32> to vector<128x192xf32>
    %49 = arith.addf %46, %48 : vector<128x192xf32>
    %50 = vector.extract_strided_slice %49 {offsets = [0, 0], sizes = [128, 64], strides = [1, 1]} : vector<128x192xf32> to vector<128x64xf32>
    %51 = vector.extract_strided_slice %49 {offsets = [0, 64], sizes = [128, 64], strides = [1, 1]} : vector<128x192xf32> to vector<128x64xf32>
    %52 = arith.maximumf %50, %51 : vector<128x64xf32>
    %53 = vector.extract_strided_slice %49 {offsets = [0, 128], sizes = [128, 64], strides = [1, 1]} : vector<128x192xf32> to vector<128x64xf32>
    %54 = arith.maximumf %52, %53 : vector<128x64xf32>
    %55 = arith.truncf %54 : vector<128x64xf32> to vector<128x64xbf16>
    %c0_24 = arith.constant 0 : index
    %c0_25 = arith.constant 0 : index
    %56 = vector.load %arg6[%c0_24, %c0_25] : memref<64x32xbf16, #tpu.memory_space<vmem>>, vector<64x32xbf16>
    %cst_26 = arith.constant dense<0.000000e+00> : vector<128x32xf32>
    %57 = tpu.matmul %55, %56, %cst_26 {dimension_numbers = #tpu.dot_dimension_numbers<[1], [0], [0], [1], [0, 0, 1, 1], [], []>} : vector<128x64xbf16>, vector<64x32xbf16>, vector<128x32xf32> -> vector<128x32xf32>
    %c0_27 = arith.constant 0 : index
    %c0_28 = arith.constant 0 : index
    %58 = vector.load %arg7[%c0_27, %c0_28] : memref<4x32xf32, #tpu.memory_space<vmem>>, vector<1x32xf32>
    %59 = vector.broadcast %58 : vector<1x32xf32> to vector<128x32xf32>
    %60 = arith.addf %57, %59 : vector<128x32xf32>
    %cst_29 = arith.constant dense<0.000000e+00> : vector<128xf32>
    %61 = vector.multi_reduction <add>, %60, %cst_29 [1] : vector<128x32xf32> to vector<128xf32>
    %62 = vector.shape_cast %61 : vector<128xf32> to vector<128x1xf32>
    %cst_30 = arith.constant 3.200000e+01 : f32
    %63 = vector.broadcast %cst_30 : f32 to vector<128x1xf32>
    %64 = arith.divf %62, %63 : vector<128x1xf32>
    %65 = vector.broadcast %64 : vector<128x1xf32> to vector<128x32xf32>
    %66 = arith.subf %60, %65 : vector<128x32xf32>
    %67 = arith.mulf %66, %66 : vector<128x32xf32>
    %cst_31 = arith.constant dense<0.000000e+00> : vector<128xf32>
    %68 = vector.multi_reduction <add>, %67, %cst_31 [1] : vector<128x32xf32> to vector<128xf32>
    %69 = vector.shape_cast %68 : vector<128xf32> to vector<128x1xf32>
    %cst_32 = arith.constant 3.200000e+01 : f32
    %70 = vector.broadcast %cst_32 : f32 to vector<128x1xf32>
    %71 = arith.divf %69, %70 : vector<128x1xf32>
    %72 = vector.broadcast %64 : vector<128x1xf32> to vector<128x32xf32>
    %73 = arith.subf %60, %72 : vector<128x32xf32>
    %cst_33 = arith.constant 9.99999974E-6 : f32
    %74 = vector.broadcast %cst_33 : f32 to vector<128x1xf32>
    %75 = arith.addf %71, %74 : vector<128x1xf32>
    %76 = math.rsqrt %75 : vector<128x1xf32>
    %77 = vector.broadcast %76 : vector<128x1xf32> to vector<128x32xf32>
    %78 = arith.mulf %73, %77 : vector<128x32xf32>
    %c1_34 = arith.constant 1 : index
    %c0_35 = arith.constant 0 : index
    %79 = vector.load %arg7[%c1_34, %c0_35] : memref<4x32xf32, #tpu.memory_space<vmem>>, vector<1x32xf32>
    %80 = vector.broadcast %79 : vector<1x32xf32> to vector<128x32xf32>
    %81 = arith.mulf %78, %80 : vector<128x32xf32>
    %c2_36 = arith.constant 2 : index
    %c0_37 = arith.constant 0 : index
    %82 = vector.load %arg7[%c2_36, %c0_37] : memref<4x32xf32, #tpu.memory_space<vmem>>, vector<1x32xf32>
    %83 = vector.broadcast %82 : vector<1x32xf32> to vector<128x32xf32>
    %84 = arith.addf %81, %83 : vector<128x32xf32>
    %85 = arith.mulf %84, %84 : vector<128x32xf32>
    %86 = arith.mulf %84, %85 : vector<128x32xf32>
    %cst_38 = arith.constant 4.471500e-02 : f32
    %87 = vector.broadcast %cst_38 : f32 to vector<128x32xf32>
    %88 = arith.mulf %87, %86 : vector<128x32xf32>
    %89 = arith.addf %84, %88 : vector<128x32xf32>
    %cst_39 = arith.constant 0.797884583 : f32
    %90 = vector.broadcast %cst_39 : f32 to vector<128x32xf32>
    %91 = arith.mulf %90, %89 : vector<128x32xf32>
    %92 = math.tanh %91 : vector<128x32xf32>
    %cst_40 = arith.constant 1.000000e+00 : f32
    %93 = vector.broadcast %cst_40 : f32 to vector<128x32xf32>
    %94 = arith.addf %93, %92 : vector<128x32xf32>
    %cst_41 = arith.constant 5.000000e-01 : f32
    %95 = vector.broadcast %cst_41 : f32 to vector<128x32xf32>
    %96 = arith.mulf %95, %94 : vector<128x32xf32>
    %97 = arith.mulf %84, %96 : vector<128x32xf32>
    %c0_42 = arith.constant 0 : index
    %c0_43 = arith.constant 0 : index
    %98 = vector.load %arg8[%c0_42, %c0_43] : memref<1x32xf32, #tpu.memory_space<vmem>>, vector<1x32xf32>
    %99 = vector.broadcast %98 : vector<1x32xf32> to vector<128x32xf32>
    %100 = arith.mulf %97, %99 : vector<128x32xf32>
    %c3 = arith.constant 3 : index
    %c0_44 = arith.constant 0 : index
    %101 = vector.load %arg7[%c3, %c0_44] : memref<4x32xf32, #tpu.memory_space<vmem>>, vector<1x32xf32>
    %102 = vector.broadcast %101 : vector<1x32xf32> to vector<128x32xf32>
    %103 = arith.addf %100, %102 : vector<128x32xf32>
    %cst_45 = arith.constant dense<0.000000e+00> : vector<128xf32>
    %104 = vector.multi_reduction <add>, %103, %cst_45 [1] : vector<128x32xf32> to vector<128xf32>
    %105 = vector.shape_cast %104 : vector<128xf32> to vector<1x128xf32>
    %c0_46 = arith.constant 0 : index
    %c0_47 = arith.constant 0 : index
    %106 = vector.load %arg9[%c0_46, %c0_47] : memref<1x128xf32, #tpu.memory_space<vmem>>, vector<1x128xf32>
    tpu.vector_store %arg9[%c0_46, %c0_47], %105 {strides = array<i32>} : memref<1x128xf32, #tpu.memory_space<vmem>>, vector<1x128xf32>,
    return
  }
  func.func @transform_0(%arg0: i32) -> (i32, i32) {
    %c0_i32 = arith.constant 0 : i32
    %c0_i32_0 = arith.constant 0 : i32
    return %arg0, %c0_i32 : i32, i32
  }
  func.func @transform_1(%arg0: i32) -> (i32, i32) {
    %c0_i32 = arith.constant 0 : i32
    %c0_i32_0 = arith.constant 0 : i32
    %c0_i32_1 = arith.constant 0 : i32
    return %c0_i32, %c0_i32_0 : i32, i32
  }
  func.func @transform_2(%arg0: i32) -> (i32, i32) {
    %c0_i32 = arith.constant 0 : i32
    %c0_i32_0 = arith.constant 0 : i32
    %c0_i32_1 = arith.constant 0 : i32
    return %c0_i32, %c0_i32_0 : i32, i32
  }
  func.func @transform_3(%arg0: i32) -> (i32, i32) {
    %c0_i32 = arith.constant 0 : i32
    %c0_i32_0 = arith.constant 0 : i32
    %c0_i32_1 = arith.constant 0 : i32
    return %c0_i32, %c0_i32_0 : i32, i32
  }
  func.func @transform_4(%arg0: i32) -> (i32, i32) {
    %c0_i32 = arith.constant 0 : i32
    %c0_i32_0 = arith.constant 0 : i32
    %c0_i32_1 = arith.constant 0 : i32
    return %c0_i32, %c0_i32_0 : i32, i32
  }
  func.func @transform_5(%arg0: i32) -> (i32, i32) {
    %c0_i32 = arith.constant 0 : i32
    %c0_i32_0 = arith.constant 0 : i32
    %c0_i32_1 = arith.constant 0 : i32
    return %c0_i32, %c0_i32_0 : i32, i32
  }
  func.func @transform_6(%arg0: i32) -> (i32, i32) {
    %c0_i32 = arith.constant 0 : i32
    %c0_i32_0 = arith.constant 0 : i32
    %c0_i32_1 = arith.constant 0 : i32
    return %c0_i32, %c0_i32_0 : i32, i32
  }
  func.func @transform_7(%arg0: i32) -> (i32, i32) {
    %c0_i32 = arith.constant 0 : i32
    %c0_i32_0 = arith.constant 0 : i32
    %c0_i32_1 = arith.constant 0 : i32
    return %c0_i32, %c0_i32_0 : i32, i32
  }
  func.func @transform_8(%arg0: i32) -> (i32, i32) {
    %c0_i32 = arith.constant 0 : i32
    %c0_i32_0 = arith.constant 0 : i32
    return %arg0, %c0_i32 : i32, i32
  }
}

</mosaic_0001>

<bundles_post_ra>
// kernel: simplified_cnn_forward.1
= control target key start
LH: loop header
LB: loop body
LE: loop exit
PB: predicated region body
PF: predicated region fallthrough
CT: control target
= control target key end

     0   :  { %s4411_s10 = smov 64   ;;  %vm2740_vm0 = vcmask 523264   ;;  %vm2862_vm1 = vcmask 261120   ;;  %vm3377_vm2 = vcmask 130112   ;;  %vm3384_vm3 = vcmask 195712   ;;  %s6795_s1 = inlined_call_operand.vmem [shape: bf16[384,384], index: 1, kind: input, shape index: {}]   ;;  %s6796_s0 = inlined_call_operand.vmem [shape: bf16[128,384], index: 0, kind: input, shape index: {}]   ;;  %s6797_s3 = inlined_call_operand.vmem [shape: bf16[384,192], index: 3, kind: input, shape index: {}]   ;;  %s6798_s2 = inlined_call_operand.vmem [shape: f32[3,384], index: 2, kind: input, shape index: {}]   ;;  %s6799_s4 = inlined_call_operand.vmem [shape: f32[3,192], index: 4, kind: input, shape index: {}]   ;;  %s6800_s5 = inlined_call_operand.vmem [shape: bf16[64,32], index: 5, kind: input, shape index: {}]   ;;  %s6801_s6 = inlined_call_operand.vmem [shape: f32[4,32], index: 6, kind: input, shape index: {}]   ;;  %s6802_s7 = inlined_call_operand.vmem [shape: f32[1,32], index: 7, kind: input, shape index: {}]   ;;  %s6803_s8 = inlined_call_operand.vmem [shape: f32[1,128], index: 8, kind: output, shape index: {}]  }
   0x1   :  { %v3982_v0 = vld [vmem:[%s6795_s1 + $0x4] ss:$12 sps:$4 sm:$0xff]   ;;  %v3984_v1 = vld [vmem:[%s6795_s1] ss:$12 sps:$4 sm:$0xff]   ;;  %v3985_v2 = vld [vmem:[%s6795_s1 + $0x1c] ss:$12 sps:$4 sm:$0xff]  }
   0x2   :  { %687 = vmatprep.subr.bf16.mxu0 %v3982_v0  ;;  %v3987_v3 = vld [vmem:[%s6795_s1 + $0x18] ss:$12 sps:$4 sm:$0xff]   ;;  %v3988_v4 = vld [vmem:[%s6795_s1 + $0x34] ss:$12 sps:$4 sm:$0xff]   ;;  %v3990_v5 = vld [vmem:[%s6795_s1 + $0x30] ss:$12 sps:$4 sm:$0xff]  }
   0x3   :  { %688 = vmatpush1.bf16.msra.mxu0 %v3984_v1  ;;  %v3991_v6 = vld [vmem:[%s6795_s1 + $0x4c] ss:$12 sps:$4 sm:$0xff]   ;;  %v3993_v7 = vld [vmem:[%s6795_s1 + $0x48] ss:$12 sps:$4 sm:$0xff]   ;;  %v3994_v8 = vld [vmem:[%s6795_s1 + $0x64] ss:$12 sps:$4 sm:$0xff]  }
   0x4   :  { %689 = vmatprep.subr.bf16.mxu0 %v3985_v2  ;;  %v3996_v9 = vld [vmem:[%s6795_s1 + $0x60] ss:$12 sps:$4 sm:$0xff]   ;;  %v3997_v10 = vld [vmem:[%s6795_s1 + $0x7c] ss:$12 sps:$4 sm:$0xff]   ;;  %v3999_v11 = vld [vmem:[%s6795_s1 + $0x78] ss:$12 sps:$4 sm:$0xff]  }
   0x5   :  { %v4000_v12 = vld [vmem:[%s6795_s1 + $0x94] ss:$12 sps:$4 sm:$0xff]   ;;  %v4002_v13 = vld [vmem:[%s6795_s1 + $0x90] ss:$12 sps:$4 sm:$0xff]   ;;  %v4003_v16 = vld [vmem:[%s6795_s1 + $0xac] ss:$12 sps:$4 sm:$0xff]  }
   0x6   :  { %v4502_v14 = vld [vmem:[%s6795_s1 + $0xc8] ss:$12 sps:$4 sm:$0xff]   ;;  %v4516_v17 = vld [vmem:[%s6796_s0 + $0x4] ss:$12 sps:$4 sm:$0xff]   ;;  %v4529_v20 = vld [vmem:[%s6795_s1 + $0xe0] ss:$12 sps:$4 sm:$0xff]  }
   0x7   :  { %690 = vmatpush1.bf16.msra.mxu0 %v3987_v3  ;;  %v4507_v15 = vld [vmem:[%s6795_s1 + $0x8] ss:$12 sps:$4 sm:$0xff]   ;;  %3796 = vmatprep.subr.bf16.mxu1 %v4502_v14  ;;  %v4006_v19 = vld [vmem:[%s6795_s1 + $0xc4] ss:$12 sps:$4 sm:$0xff]   ;;  %v4534_v21 = vld [vmem:[%s6795_s1 + $0x20] ss:$12 sps:$4 sm:$0xff]  }
   0x8   :  { %691 = vmatprep.subr.bf16.mxu0 %v3988_v4  ;;  %v4005_v18 = vld [vmem:[%s6795_s1 + $0xa8] ss:$12 sps:$4 sm:$0xff]   ;;  %3804 = vmatpush3.bf16.msra.mxu1 %v4507_v15  ;;  %v4540_v22 = vld [vmem:[%s6795_s1 + $0xf8] ss:$12 sps:$4 sm:$0xff]   ;;  %v4008_v24 = vld [vmem:[%s6795_s1 + $0xc0] ss:$12 sps:$4 sm:$0xff]  }
   0x9   :  { %719 = vmatprep.mubr.bf16.mxu0 %v4516_v17  ;;  %3797 = vmatprep.subr.bf16.mxu1 %v4529_v20  ;;  %v4546_v23 = vld [vmem:[%s6795_s1 + $0x38] ss:$12 sps:$4 sm:$0xff]   ;;  %v4009_v25 = vld [vmem:[%s6795_s1 + $0xdc] ss:$12 sps:$4 sm:$0xff]   ;;  %v4012_v30 = vld [vmem:[%s6795_s1 + $0xf4] ss:$12 sps:$4 sm:$0xff]  }
   0xa   :  { %v4011_v26 = vld [vmem:[%s6795_s1 + $0xd8] ss:$12 sps:$4 sm:$0xff]   ;;  %v4562_v27 = vld [vmem:[%s6795_s1 + $0x110] ss:$12 sps:$4 sm:$0xff]   ;;  %v4573_v29 = vld [vmem:[%s6795_s1 + $0x128] ss:$12 sps:$4 sm:$0xff]  }
   0xb   :  { %692 = vmatpush1.bf16.msra.mxu0 %v3990_v5  ;;  %v4567_v28 = vld [vmem:[%s6795_s1 + $0x50] ss:$12 sps:$4 sm:$0xff]   ;;  %v4582_v31 = vld [vmem:[%s6795_s1 + $0x68] ss:$12 sps:$4 sm:$0xff]   ;;  %v4015_v33 = vld [vmem:[%s6795_s1 + $0x10c] ss:$12 sps:$4 sm:$0xff]  }
   0xc   :  { %693 = vmatprep.subr.bf16.mxu0 %v3991_v6  ;;  %3805 = vmatpush3.bf16.msra.mxu1 %v4534_v21  ;;  %v4014_v32 = vld [vmem:[%s6795_s1 + $0xf0] ss:$12 sps:$4 sm:$0xff]   ;;  %v4594_v34 = vld [vmem:[%s6795_s1 + $0x140] ss:$12 sps:$4 sm:$0xff]   ;;  %v4606_v36 = vld [vmem:[%s6795_s1 + $0x158] ss:$12 sps:$4 sm:$0xff]  }
   0xd   :  { %3798 = vmatprep.subr.bf16.mxu1 %v4540_v22  ;;  %v4600_v35 = vld [vmem:[%s6795_s1 + $0x80] ss:$12 sps:$4 sm:$0xff]   ;;  %v4017_v37 = vld [vmem:[%s6795_s1 + $0x108] ss:$12 sps:$4 sm:$0xff]   ;;  %v4018_v38 = vld [vmem:[%s6795_s1 + $0x124] ss:$12 sps:$4 sm:$0xff]  }
   0xe   :  { %v4020_v39 = vld [vmem:[%s6795_s1 + $0x120] ss:$12 sps:$4 sm:$0xff]   ;;  %v4621_v40 = vld [vmem:[%s6795_s1 + $0x98] ss:$12 sps:$4 sm:$0xff]   ;;  %v4627_v41 = vld [vmem:[%s6795_s1 + $0x170] ss:$12 sps:$4 sm:$0xff]  }
   0xf   :  { %694 = vmatpush1.bf16.msra.mxu0 %v3993_v7  ;;  %v4021_v42 = vld [vmem:[%s6795_s1 + $0x13c] ss:$12 sps:$4 sm:$0xff]   ;;  %v4641_v44 = vld [vmem:[%s6796_s0 + $0x64] ss:$12 sps:$4 sm:$0xff]   ;;  %v4024_v47 = vld [vmem:[%s6795_s1 + $0x154] ss:$12 sps:$4 sm:$0xff]  }
  0x10   :  { %695 = vmatprep.subr.bf16.mxu0 %v3994_v8  ;;  %3806 = vmatpush3.bf16.msra.mxu1 %v4546_v23  ;;  %v4635_v43 = vld [vmem:[%s6795_s1 + $0xb0] ss:$12 sps:$4 sm:$0xff]   ;;  %v4073_v45 = vld [vmem:[%s6795_s1 + $0x188] ss:$12 sps:$4 sm:$0xff]   ;;  %v4023_v46 = vld [vmem:[%s6795_s1 + $0x138] ss:$12 sps:$4 sm:$0xff]  }
  0x11   :  { %3799 = vmatprep.subr.bf16.mxu1 %v4562_v27  ;;  %977 = vmatprep.mubr.bf16.mxu1 %v4641_v44  ;;  %v4657_v48 = vld [vmem:[%s6796_s0 + $0x60] ss:$12 sps:$4 sm:$0xff]   ;;  %v4663_v49 = vld [vmem:[%s6796_s0 + $0x7c] ss:$12 sps:$4 sm:$0xff]   ;;  %v4081_v53 = vld [vmem:[%s6795_s1 + $0x1b8] ss:$12 sps:$4 sm:$0xff]  }
  0x12   :  { %v4077_v50 = vld [vmem:[%s6795_s1 + $0x1a0] ss:$12 sps:$4 sm:$0xff]   ;;  %v4026_v51 = vld [vmem:[%s6795_s1 + $0x150] ss:$12 sps:$4 sm:$0xff]   ;;  %v4029_v54 = vld [vmem:[%s6795_s1 + $0x168] ss:$12 sps:$4 sm:$0xff]  }
  0x13   :  { %696 = vmatpush1.bf16.msra.mxu0 %v3996_v9  ;;  %v4027_v52 = vld [vmem:[%s6795_s1 + $0x16c] ss:$12 sps:$4 sm:$0xff]   ;;  %v4037_v56 = vld [vmem:[%s6795_s1 + $0x184] ss:$12 sps:$4 sm:$0xff]   ;;  %v4701_v59 = vld [vmem:[%s6796_s0 + $0x94] ss:$12 sps:$4 sm:$0xff]  }
  0x14   :  { %697 = vmatprep.subr.bf16.mxu0 %v3997_v10  ;;  %3807 = vmatpush3.bf16.msra.mxu1 %v4567_v28  ;;  %v4685_v55 = vld [vmem:[%s6796_s0] ss:$12 sps:$4 sm:$0xff]   ;;  %v4693_v57 = vld [vmem:[%s6796_s0 + $0x78] ss:$12 sps:$4 sm:$0xff]   ;;  %v4085_v60 = vld [vmem:[%s6795_s1 + $0x1d0] ss:$12 sps:$4 sm:$0xff]  }
  0x15   :  { %3800 = vmatprep.subr.bf16.mxu1 %v4573_v29  ;;  %v4035_v58 = vld [vmem:[%s6795_s1 + $0x180] ss:$12 sps:$4 sm:$0xff]   ;;  %v4709_v61 = vld [vmem:[%s6796_s0 + $0x1c] ss:$12 sps:$4 sm:$0xff]   ;;  %v4045_v63 = vld [vmem:[%s6795_s1 + $0x198] ss:$12 sps:$4 sm:$0xff]  }
  0x16   :  { %v4047_v62 = vld [vmem:[%s6795_s1 + $0x19c] ss:$12 sps:$4 sm:$0xff]   ;;  %v4057_v1 = vld [vmem:[%s6795_s1 + $0x1b4] ss:$12 sps:$4 sm:$0xff]   ;;  %v4730_v2 = vld [vmem:[%s6796_s0 + $0x18] ss:$12 sps:$4 sm:$0xff]  }
  0x17   :  { %698 = vmatpush1.bf16.msra.mxu0 %v3999_v11  ;;  %v4089_v0 = vld [vmem:[%s6795_s1 + $0x1e8] ss:$12 sps:$4 sm:$0xff]   ;;  %v4735_v3 = vld [vmem:[%s6796_s0 + $0x90] ss:$12 sps:$4 sm:$0xff]   ;;  %v4745_v5 = vld [vmem:[%s6796_s0 + $0xac] ss:$12 sps:$4 sm:$0xff]  }
  0x18   :  { %699 = vmatprep.subr.bf16.mxu0 %v4000_v12  ;;  %3808 = vmatpush3.bf16.msra.mxu1 %v4582_v31  ;;  %v4740_v4 = vld [vmem:[%s6796_s0 + $0x34] ss:$12 sps:$4 sm:$0xff]   ;;  %v4055_v7 = vld [vmem:[%s6795_s1 + $0x1b0] ss:$12 sps:$4 sm:$0xff]   ;;  %v4067_v8 = vld [vmem:[%s6795_s1 + $0x1cc] ss:$12 sps:$4 sm:$0xff]  }
  0x19   :  { %3801 = vmatprep.subr.bf16.mxu1 %v4594_v34  ;;  %v4093_v6 = vld [vmem:[%s6795_s1 + $0x200] ss:$12 sps:$4 sm:$0xff]   ;;  %v4097_v9 = vld [vmem:[%s6795_s1 + $0x218] ss:$12 sps:$4 sm:$0xff]   ;;  %v4065_v10 = vld [vmem:[%s6795_s1 + $0x1c8] ss:$12 sps:$4 sm:$0xff]  }
  0x1a   :  { %v4076_v11 = vld [vmem:[%s6795_s1 + $0x1e4] ss:$12 sps:$4 sm:$0xff]   ;;  %v4772_v12 = vld [vmem:[%s6796_s0 + $0xa8] ss:$12 sps:$4 sm:$0xff]   ;;  %vm3391_vm4 = vcmask 261312   ;;  %vm3398_vm5 = vcmask 326912  }
  0x1b   :  { %700 = vmatpush1.bf16.msra.mxu0 %v4002_v13  ;;  %v4777_v13 = vld [vmem:[%s6796_s0 + $0x8] ss:$12 sps:$4 sm:$0xff]   ;;  %vm3405_vm6 = vcmask 392512   ;;  %vm3412_vm7 = vcmask 458112   ;;  %vm3419_vm8 = vcmask 523712   ;;  %vm3426_vm9 = vcmask 589312  }
  0x1c   :  { %701 = vmatprep.subr.bf16.mxu0 %v4003_v16  ;;  %3809 = vmatpush3.bf16.msra.mxu1 %v4600_v35  ;;  %v4782_v16 = vld [vmem:[%s6796_s0 + $0x30] ss:$12 sps:$4 sm:$0xff]   ;;  %vm3433_vm10 = vcmask 654912   ;;  %vm3440_vm11 = vcmask 720512   ;;  %vm3447_vm12 = vcmask 786112   ;;  %vm3454_vm13 = vcmask 851712  }
  0x1d   :  { %3802 = vmatprep.subr.bf16.mxu1 %v4606_v36  ;;  %vm3461_vm14 = vcmask 917312   ;;  %vm3468_vm15 = vcmask 982912  }
  0x1f   :  { %702 = vmatpush1.bf16.msra.mxu0 %v4005_v18  ;;  %v4101_v18 = vld [vmem:[%s6795_s1 + $0x230] ss:$12 sps:$4 sm:$0xff]  }
  0x20   :  { %703 = vmatprep.subr.bf16.mxu0 %v4006_v19  ;;  %3810 = vmatpush3.bf16.msra.mxu1 %v4621_v40  ;;  %v4790_v19 = vld [vmem:[%s6796_s0 + $0x4c] ss:$12 sps:$4 sm:$0xff]  }
  0x21   :  { %3803 = vmatprep.subr.bf16.mxu1 %v4627_v41 }
  0x23   :  { %704 = vmatpush1.bf16.msra.mxu0 %v4008_v24  ;;  %v4074_v24 = vld [vmem:[%s6795_s1 + $0x1e0] ss:$12 sps:$4 sm:$0xff]  }
  0x24   :  { %705 = vmatprep.subr.bf16.mxu0 %v4009_v25  ;;  %3811 = vmatpush3.bf16.msra.mxu1 %v4635_v43  ;;  %v4084_v25 = vld [vmem:[%s6795_s1 + $0x1fc] ss:$12 sps:$4 sm:$0xff]  }
  0x25   :  { %3740 = vmatprep.subr.bf16.mxu1 %v4073_v45 }
  0x27   :  { %706 = vmatpush1.bf16.msra.mxu0 %v4011_v26  ;;  %978 = vmatmul.mubr.bf16.vlgmr.msra.gmra.mrb[0].mxu1 %v4657_v48  ;;  %v4082_v26 = vld [vmem:[%s6795_s1 + $0x1f8] ss:$12 sps:$4 sm:$0xff]  }
  0x28   :  { %707 = vmatprep.subr.bf16.mxu0 %v4012_v30  ;;  %3741 = vmatpush3.bf16.msra.mxu1 %v4073_v45  ;;  %v4092_v30 = vld [vmem:[%s6795_s1 + $0x214] ss:$12 sps:$4 sm:$0xff]   ;;  %v4835_v45 = vld [vmem:[%s6796_s0 + $0x50] ss:$12 sps:$4 sm:$0xff]  }
  0x29   :  { %985 = vmatprep.mubr.bf16.mxu1 %v4663_v49  ;;  %3742 = vmatprep.subr.bf16.mxu1 %v4077_v50 }
  0x2b   :  { %708 = vmatpush1.bf16.msra.mxu0 %v4014_v32  ;;  %v4103_v32 = vld [vmem:[%s6796_s0 + $0x20] ss:$12 sps:$4 sm:$0xff]  }
  0x2c   :  { %709 = vmatprep.subr.bf16.mxu0 %v4015_v33  ;;  %3743 = vmatpush3.bf16.msra.mxu1 %v4077_v50  ;;  %v4814_v33 = vld [vmem:[%s6796_s0 + $0x38] ss:$12 sps:$4 sm:$0xff]   ;;  %v4847_v50 = vld [vmem:[%s6796_s0 + $0x68] ss:$12 sps:$4 sm:$0xff]  }
  0x2d   :  { %3744 = vmatprep.subr.bf16.mxu1 %v4081_v53 }
  0x2f   :  { %710 = vmatpush1.bf16.msra.mxu0 %v4017_v37  ;;  %986 = vmatmul.mubr.bf16.gmra.mrb[4].mxu1 %v4693_v57  ;;  %v4819_v37 = vld [vmem:[%s6796_s0 + $0x48] ss:$12 sps:$4 sm:$0xff]  }
  0x30   :  { %711 = vmatprep.subr.bf16.mxu0 %v4018_v38  ;;  %3745 = vmatpush3.bf16.msra.mxu1 %v4081_v53  ;;  %v4090_v38 = vld [vmem:[%s6795_s1 + $0x210] ss:$12 sps:$4 sm:$0xff]   ;;  %v4116_v53 = vld [vmem:[%s6797_s3 + $0x20] ss:$8 sps:$4 sm:$0xff]  }
  0x31   :  { %993 = vmatprep.mubr.bf16.mxu1 %v4701_v59  ;;  %3746 = vmatprep.subr.bf16.mxu1 %v4085_v60 }
  0x33   :  { %712 = vmatpush1.bf16.msra.mxu0 %v4020_v39  ;;  %v4100_v39 = vld [vmem:[%s6795_s1 + $0x22c] ss:$12 sps:$4 sm:$0xff]  }
  0x34   :  { %713 = vmatprep.subr.bf16.mxu0 %v4021_v42  ;;  %3747 = vmatpush3.bf16.msra.mxu1 %v4085_v60  ;;  %v4098_v42 = vld [vmem:[%s6795_s1 + $0x228] ss:$12 sps:$4 sm:$0xff]   ;;  %v4149_v60 = vld [vmem:[%s6797_s3 + $0xd0] ss:$8 sps:$4 sm:$0xff]  }
  0x35   :  { %3748 = vmatprep.subr.bf16.mxu1 %v4089_v0 }
  0x37   :  { %714 = vmatpush1.bf16.msra.mxu0 %v4023_v46  ;;  %994 = vmatmul.mubr.bf16.gmra.mrb[8].mxu1 %v4735_v3  ;;  %v4110_v46 = vld [vmem:[%s6797_s3] ss:$8 sps:$4 sm:$0xff]  }
  0x38   :  { %715 = vmatprep.subr.bf16.mxu0 %v4024_v47  ;;  %3749 = vmatpush3.bf16.msra.mxu1 %v4089_v0  ;;  %v4112_v47 = vld [vmem:[%s6797_s3 + $0x4] ss:$8 sps:$4 sm:$0xff]   ;;  %v4157_v0 = vld [vmem:[%s6797_s3 + $0xf4] ss:$8 sps:$4 sm:$0xff]  }
  0x39   :  { %1001 = vmatprep.mubr.bf16.mxu1 %v4745_v5  ;;  %3750 = vmatprep.subr.bf16.mxu1 %v4093_v6 }
  0x3b   :  { %716 = vmatpush1.bf16.msra.mxu0 %v4026_v51  ;;  %v4115_v51 = vld [vmem:[%s6797_s3 + $0x14] ss:$8 sps:$4 sm:$0xff]  }
  0x3c   :  { %717 = vmatprep.subr.bf16.mxu0 %v4027_v52  ;;  %3751 = vmatpush3.bf16.msra.mxu1 %v4093_v6  ;;  %v4118_v52 = vld [vmem:[%s6797_s3 + $0x24] ss:$8 sps:$4 sm:$0xff]  }
  0x3d   :  { %3752 = vmatprep.subr.bf16.mxu1 %v4097_v9 }
  0x3f   :  { %718 = vmatpush1.bf16.msra.mxu0 %v4029_v54  ;;  %1002 = vmatmul.mubr.bf16.gmra.mrb[12].mxu1 %v4772_v12  ;;  %v4107_v54 = vld [vmem:[%s6796_s0 + $0x80] ss:$12 sps:$4 sm:$0xff]  }
  0x40   :  { %800 = vmatprep.subr.bf16.mxu0 %v4037_v56  ;;  %3753 = vmatpush3.bf16.msra.mxu1 %v4097_v9  ;;  %v4108_v56 = vld [vmem:[%s6796_s0 + $0x98] ss:$12 sps:$4 sm:$0xff]  }
  0x41   :  { %3756 = vmatprep.mubr.bf16.mxu1 %v4777_v13  ;;  %3754 = vmatprep.subr.bf16.mxu1 %v4101_v18 }
  0x42   :  { %720 = vmatmul.mubr.bf16.vlgmr.msra.gmra.mrb[0].mxu0 %v4685_v55 }
  0x43   :  { %801 = vmatpush1.bf16.msra.mxu0 %v4035_v58  ;;  %729 = vmatprep.mubr.bf16.mxu0 %v4709_v61  ;;  %v6805_v58 = vmov 0  }
  0x44   :  { %802 = vmatprep.subr.bf16.mxu0 %v4047_v62  ;;  %3755 = vmatpush3.bf16.msra.mxu1 %v4101_v18  ;;  %v4152_v62 = vld [vmem:[%s6797_s3 + $0xe0] ss:$8 sps:$4 sm:$0xff]  }
  0x45   :  { %1995 = vmatprep.subr.bf16.mxu1 %v4112_v47 }
  0x47   :  { %803 = vmatpush1.bf16.msra.mxu0 %v4045_v63  ;;  %3757 = vmatmul.mubr.bf16.vlgmr.msra.gmra.mrb[16].mxu1 %v4103_v32  ;;  %v6804_v63 = vlaneseq }
  0x48   :  { %804 = vmatprep.subr.bf16.mxu0 %v4057_v1  ;;  %3760 = vmatprep.mubr.bf16.mxu1 %v4814_v33  ;;  %v4155_v1 = vld [vmem:[%s6797_s3 + $0xf0] ss:$8 sps:$4 sm:$0xff]  }
  0x49   :  { %1996 = vmatpush1.bf16.msra.mxu1 %v4110_v46 }
  0x4a   :  { %730 = vmatmul.mubr.bf16.gmra.mrb[4].mxu0 %v4730_v2  ;;  %1997 = vmatprep.subr.bf16.mxu1 %v4115_v51 }
  0x4b   :  { %739 = vmatprep.mubr.bf16.mxu0 %v4740_v4  ;;  %805 = vmatpush1.bf16.msra.mxu0 %v4055_v7 }
  0x4c   :  { %806 = vmatprep.subr.bf16.mxu0 %v4067_v8 }
  0x4f   :  { %807 = vmatpush1.bf16.msra.mxu0 %v4065_v10  ;;  %3761 = vmatmul.mubr.bf16.gmra.mrb[20].mxu1 %v4835_v45 }
  0x50   :  { %808 = vmatprep.subr.bf16.mxu0 %v4076_v11  ;;  %3764 = vmatprep.mubr.bf16.mxu1 %v4847_v50 }
  0x52   :  { %740 = vmatmul.mubr.bf16.gmra.mrb[8].mxu0 %v4782_v16 }
  0x53   :  { %749 = vmatprep.mubr.bf16.mxu0 %v4790_v19  ;;  %809 = vmatpush1.bf16.msra.mxu0 %v4074_v24 }
  0x54   :  { %810 = vmatprep.subr.bf16.mxu0 %v4084_v25 }
  0x57   :  { %811 = vmatpush1.bf16.msra.mxu0 %v4082_v26  ;;  %3765 = vmatmul.mubr.bf16.gmra.mrb[24].mxu1 %v4107_v54 }
  0x58   :  { %812 = vmatprep.subr.bf16.mxu0 %v4092_v30  ;;  %3768 = vmatprep.mubr.bf16.mxu1 %v4108_v56 }
  0x5a   :  { %750 = vmatmul.mubr.bf16.gmra.mrb[12].mxu0 %v4819_v37 }
  0x5b   :  { %759 = vmatprep.mubr.bf16.mxu0 %v4641_v44  ;;  %813 = vmatpush1.bf16.msra.mxu0 %v4090_v38  ;;  %v4113_v44 = vld [vmem:[%s6797_s3 + $0x10] ss:$8 sps:$4 sm:$0xff]  }
  0x5c   :  { %814 = vmatprep.subr.bf16.mxu0 %v4100_v39  ;;  %1998 = vmatpush1.bf16.msra.mxu1 %v4113_v44 }
  0x5d   :  { %1999 = vmatprep.subr.bf16.mxu1 %v4118_v52 }
  0x5f   :  { %815 = vmatpush1.bf16.msra.mxu0 %v4098_v42 }
  0x60   :  { %3648 = vmatprep.subr.bf16.mxu0 %v4502_v14  ;;  %v4121_v14 = vld [vmem:[%s6797_s3 + $0x34] ss:$8 sps:$4 sm:$0xff]   ;;  %2000 = vmatpush1.bf16.msra.mxu1 %v4116_v53 }
  0x61   :  { %2001 = vmatprep.subr.bf16.mxu1 %v4121_v14 }
  0x62   :  { %760 = vmatmul.mubr.bf16.gmra.mrb[16].mxu0 %v4657_v48  ;;  %v4119_v48 = vld [vmem:[%s6797_s3 + $0x30] ss:$8 sps:$4 sm:$0xff]  }
  0x63   :  { %769 = vmatprep.mubr.bf16.mxu0 %v4663_v49  ;;  %v4109_v49 = vld [vmem:[%s6796_s0 + $0xb0] ss:$12 sps:$4 sm:$0xff]  }
  0x64   :  { %2002 = vmatpush1.bf16.msra.mxu1 %v4119_v48  ;;  %v4160_v48 = vld [vmem:[%s6797_s3 + $0x104] ss:$8 sps:$4 sm:$0xff]  }
  0x65   :  { %3769 = vmatmul.mubr.bf16.gmra.mrb[28].mxu1 %v4109_v49 }
  0x6a   :  { %770 = vmatmul.mubr.bf16.gmra.mrb[20].mxu0 %v4693_v57  ;;  %v4146_v57 = vld [vmem:[%s6797_s3 + $0xc0] ss:$8 sps:$4 sm:$0xff]  }
  0x6b   :  { %779 = vmatprep.mubr.bf16.mxu0 %v4701_v59  ;;  %v4151_v59 = vld [vmem:[%s6797_s3 + $0xd4] ss:$8 sps:$4 sm:$0xff]  }
  0x72   :  { %780 = vmatmul.mubr.bf16.gmra.mrb[24].mxu0 %v4735_v3 }
  0x73   :  { %789 = vmatprep.mubr.bf16.mxu0 %v4745_v5 }
  0x7a   :  { %790 = vmatmul.mubr.bf16.gmra.mrb[28].mxu0 %v4772_v12 }
  0x7b   :  { %832 = vmatprep.mubr.bf16.mxu0 %v6805_v58 }
  0x82   :  { %833 = vmatmul.mubr.bf16.vlgmr.msra.gmra.mrb[0].mxu0 %v4777_v13 }
  0x83   :  { %3649 = vmatpush3.bf16.msra.mxu0 %v4507_v15  ;;  %842 = vmatprep.mubr.bf16.mxu0 %v6805_v58  ;;  %v4122_v15 = vld [vmem:[%s6797_s3 + $0x40] ss:$8 sps:$4 sm:$0xff]  }
  0x84   :  { %3650 = vmatprep.subr.bf16.mxu0 %v4529_v20  ;;  %v4124_v20 = vld [vmem:[%s6797_s3 + $0x44] ss:$8 sps:$4 sm:$0xff]  }
  0x85   :  { %2003 = vmatprep.subr.bf16.mxu1 %v4124_v20 }
  0x86   :  { %2004 = vmatpush1.bf16.msra.mxu1 %v4122_v15 }
  0x87   :  { %3651 = vmatpush3.bf16.msra.mxu0 %v4534_v21  ;;  %v4125_v21 = vld [vmem:[%s6797_s3 + $0x50] ss:$8 sps:$4 sm:$0xff]  }
  0x88   :  { %3652 = vmatprep.subr.bf16.mxu0 %v4540_v22  ;;  %v4127_v22 = vld [vmem:[%s6797_s3 + $0x54] ss:$8 sps:$4 sm:$0xff]  }
  0x89   :  { %2005 = vmatprep.subr.bf16.mxu1 %v4127_v22 }
  0x8a   :  { %843 = vmatmul.mubr.bf16.gmra.mrb[4].mxu0 %v4103_v32  ;;  %2006 = vmatpush1.bf16.msra.mxu1 %v4125_v21 }
  0x8b   :  { %852 = vmatprep.mubr.bf16.mxu0 %v6805_v58  ;;  %3653 = vmatpush3.bf16.msra.mxu0 %v4546_v23  ;;  %v4130_v23 = vld [vmem:[%s6797_s3 + $0x64] ss:$8 sps:$4 sm:$0xff]  }
  0x8c   :  { %3654 = vmatprep.subr.bf16.mxu0 %v4562_v27  ;;  %2007 = vmatprep.subr.bf16.mxu1 %v4130_v23  ;;  %v4133_v27 = vld [vmem:[%s6797_s3 + $0x74] ss:$8 sps:$4 sm:$0xff]  }
  0x8f   :  { %3655 = vmatpush3.bf16.msra.mxu0 %v4567_v28  ;;  %v4131_v28 = vld [vmem:[%s6797_s3 + $0x70] ss:$8 sps:$4 sm:$0xff]  }
  0x90   :  { %3656 = vmatprep.subr.bf16.mxu0 %v4573_v29  ;;  %v4136_v29 = vld [vmem:[%s6797_s3 + $0x84] ss:$8 sps:$4 sm:$0xff]  }
  0x92   :  { %853 = vmatmul.mubr.bf16.gmra.mrb[8].mxu0 %v4814_v33 }
  0x93   :  { %862 = vmatprep.mubr.bf16.mxu0 %v6805_v58  ;;  %3657 = vmatpush3.bf16.msra.mxu0 %v4582_v31  ;;  %v4134_v31 = vld [vmem:[%s6797_s3 + $0x80] ss:$8 sps:$4 sm:$0xff]  }
  0x94   :  { %3658 = vmatprep.subr.bf16.mxu0 %v4594_v34  ;;  %v4139_v34 = vld [vmem:[%s6797_s3 + $0x94] ss:$8 sps:$4 sm:$0xff]  }
  0x97   :  { %3659 = vmatpush3.bf16.msra.mxu0 %v4600_v35  ;;  %v4137_v35 = vld [vmem:[%s6797_s3 + $0x90] ss:$8 sps:$4 sm:$0xff]  }
  0x98   :  { %3660 = vmatprep.subr.bf16.mxu0 %v4606_v36  ;;  %v4142_v36 = vld [vmem:[%s6797_s3 + $0xa4] ss:$8 sps:$4 sm:$0xff]  }
  0x9a   :  { %863 = vmatmul.mubr.bf16.gmra.mrb[12].mxu0 %v4835_v45 }
  0x9b   :  { %872 = vmatprep.mubr.bf16.mxu0 %v6805_v58  ;;  %3661 = vmatpush3.bf16.msra.mxu0 %v4621_v40  ;;  %v4140_v40 = vld [vmem:[%s6797_s3 + $0xa0] ss:$8 sps:$4 sm:$0xff]  }
  0x9c   :  { %3662 = vmatprep.subr.bf16.mxu0 %v4627_v41  ;;  %v4145_v41 = vld [vmem:[%s6797_s3 + $0xb4] ss:$8 sps:$4 sm:$0xff]  }
  0x9f   :  { %3663 = vmatpush3.bf16.msra.mxu0 %v4635_v43  ;;  %v4143_v43 = vld [vmem:[%s6797_s3 + $0xb0] ss:$8 sps:$4 sm:$0xff]  }
  0xa2   :  { %873 = vmatmul.mubr.bf16.gmra.mrb[16].mxu0 %v4847_v50 }
  0xa3   :  { %882 = vmatprep.mubr.bf16.mxu0 %v6805_v58 }
  0xaa   :  { %883 = vmatmul.mubr.bf16.gmra.mrb[20].mxu0 %v4107_v54 }
  0xab   :  { %892 = vmatprep.mubr.bf16.mxu0 %v6805_v58 }
  0xb2   :  { %893 = vmatmul.mubr.bf16.gmra.mrb[24].mxu0 %v4108_v56 }
  0xb3   :  { %902 = vmatprep.mubr.bf16.mxu0 %v6805_v58 }
  0xba   :  { %903 = vmatmul.mubr.bf16.gmra.mrb[28].mxu0 %v4109_v49 }
  0xbb   :  { %945 = vmatprep.mubr.bf16.mxu0 %v4516_v17  ;;  %v4128_v17 = vld [vmem:[%s6797_s3 + $0x60] ss:$8 sps:$4 sm:$0xff]  }
  0xbc   :  { %2008 = vmatpush1.bf16.msra.mxu1 %v4128_v17 }
  0xbd   :  { %2009 = vmatprep.subr.bf16.mxu1 %v4133_v27 }
  0xc0   :  { %2010 = vmatpush1.bf16.msra.mxu1 %v4131_v28 }
  0xc1   :  { %2011 = vmatprep.subr.bf16.mxu1 %v4136_v29 }
  0xc2   :  { %946 = vmatmul.mubr.bf16.vlgmr.msra.gmra.mrb[32].mxu0 %v4685_v55  ;;  %v4148_v55 = vld [vmem:[%s6797_s3 + $0xc4] ss:$8 sps:$4 sm:$0xff]  }
  0xc3   :  { %953 = vmatprep.mubr.bf16.mxu0 %v4709_v61  ;;  %v4154_v61 = vld [vmem:[%s6797_s3 + $0xe4] ss:$8 sps:$4 sm:$0xff]  }
  0xc4   :  { %2012 = vmatpush1.bf16.msra.mxu1 %v4134_v31 }
  0xc5   :  { %2013 = vmatprep.subr.bf16.mxu1 %v4139_v34 }
  0xc8   :  { %2014 = vmatpush1.bf16.msra.mxu1 %v4137_v35 }
  0xc9   :  { %2015 = vmatprep.subr.bf16.mxu1 %v4142_v36 }
  0xca   :  { %954 = vmatmul.mubr.bf16.gmra.mrb[36].mxu0 %v4730_v2  ;;  %v4994_v2 = vshrl.u32 %v6804_v63, 7 }
  0xcb   :  { %961 = vmatprep.mubr.bf16.mxu0 %v4740_v4  ;;  %v5002_v4 = vld [vmem:[%s6798_s2] ss:$4 sm:$0x7] }
  0xcc   :  { %2016 = vmatpush1.bf16.msra.mxu1 %v4140_v40  ;;  %6816 = vst [vmem:[#allocation2_spill] sm:$0xff] %v4994_v2  ;;  %v4997_v3 = vsub.s32 2, %v4994_v2 }
  0xcd   :  { %2017 = vmatprep.subr.bf16.mxu1 %v4145_v41 }
  0xce   :  { %v5006_v6 = vrot.slane %v5002_v4, %v4997_v3 }
  0xd0   :  { %2018 = vmatpush1.bf16.msra.mxu1 %v4143_v43 }
  0xd1   :  { %2019 = vmatprep.subr.bf16.mxu1 %v4148_v55 }
  0xd2   :  { %962 = vmatmul.mubr.bf16.gmra.mrb[40].mxu0 %v4782_v16 }
  0xd3   :  { %969 = vmatprep.mubr.bf16.mxu0 %v4790_v19 }
  0xd4   :  { %2020 = vmatpush1.bf16.msra.mxu1 %v4146_v57 }
  0xd5   :  { %2021 = vmatprep.subr.bf16.mxu1 %v4151_v59 }
  0xd8   :  { %2022 = vmatpush1.bf16.msra.mxu1 %v4149_v60 }
  0xd9   :  { %2023 = vmatprep.subr.bf16.mxu1 %v4154_v61 }
  0xda   :  { %970 = vmatmul.mubr.bf16.gmra.mrb[44].mxu0 %v4819_v37 }
  0xdc   :  { %2024 = vmatpush1.bf16.msra.mxu1 %v4152_v62 }
  0xdd   :  { %2025 = vmatprep.subr.bf16.mxu1 %v4157_v0 }
  0xe0   :  { %2026 = vmatpush1.bf16.msra.mxu1 %v4155_v1 }
  0xe1   :  { %2108 = vmatprep.subr.bf16.mxu1 %v4160_v48 }
  0xfa   :  { %v3688_v5 = vpop.f32.mrb[0].mxu1 }
  0xfb   :  { %v3689_v7 = vpop.f32.mrb[1].mxu1 }
  0xfc   :  { %v3690_v8 = vadd.f32 %v3689_v7, %v3688_v5  ;;  %v3691_v9 = vpop.f32.mrb[2].mxu1 }
  0xfd   :  { %v3692_v10 = vpop.f32.mrb[3].mxu1 }
  0xfe   :  { %v3693_v11 = vadd.f32 %v3692_v10, %v3691_v9  ;;  %v980_v12 = vadd.f32 %v3690_v8, %v5006_v6 }
 0x100   :  { %v983_v13 = vadd.f32 %v3693_v11, %v5006_v6 }
 0x102   :  { %v3694_v16 = vpop.f32.mrb[4].mxu1 }
 0x103   :  { %v3695_v18 = vpop.f32.mrb[5].mxu1 }
 0x104   :  { %v3696_v19 = vadd.f32 %v3695_v18, %v3694_v16  ;;  %v3697_v24 = vpop.f32.mrb[6].mxu1 }
 0x105   :  { %v3698_v25 = vpop.f32.mrb[7].mxu1 }
 0x106   :  { %v3699_v26 = vadd.f32 %v3698_v25, %v3697_v24  ;;  %v988_v30 = vadd.f32 %v3696_v19, %v5006_v6 }
 0x108   :  { %v991_v32 = vadd.f32 %v3699_v26, %v5006_v6 }
 0x10a   :  { %v3700_v33 = vpop.f32.mrb[8].mxu1 }
 0x10b   :  { %v3701_v37 = vpop.f32.mrb[9].mxu1 }
 0x10c   :  { %v3702_v38 = vadd.f32 %v3701_v37, %v3700_v33  ;;  %v3703_v39 = vpop.f32.mrb[10].mxu1 }
 0x10d   :  { %v3704_v42 = vpop.f32.mrb[11].mxu1 }
 0x10e   :  { %v3705_v45 = vadd.f32 %v3704_v42, %v3703_v39  ;;  %v996_v46 = vadd.f32 %v3702_v38, %v5006_v6 }
 0x110   :  { %v999_v47 = vadd.f32 %v3705_v45, %v5006_v6 }
 0x112   :  { %v3706_v50 = vpop.f32.mrb[12].mxu1 }
 0x113   :  { %v3707_v51 = vpop.f32.mrb[13].mxu1 }
 0x114   :  { %v3708_v44 = vadd.f32 %v3707_v51, %v3706_v50  ;;  %v3709_v52 = vpop.f32.mrb[14].mxu1 }
 0x115   :  { %v3710_v53 = vpop.f32.mrb[15].mxu1 }
 0x116   :  { %v3711_v54 = vadd.f32 %v3710_v53, %v3709_v52  ;;  %v1004_v14 = vadd.f32 %v3708_v44, %v5006_v6 }
 0x118   :  { %v1007_v56 = vadd.f32 %v3711_v54, %v5006_v6 }
 0x11a   :  { %v5019_v49 = vpop.f32.mrb[16].mxu1 }
 0x11b   :  { %v5021_v15 = vpop.f32.mrb[17].mxu1 }
 0x11c   :  { %v5023_v20 = vpop.f32.mrb[18].mxu1 }
 0x11d   :  { %v5025_v21 = vpop.f32.mrb[19].mxu1 }
 0x122   :  { %v5027_v22 = vpop.f32.mrb[20].mxu1 }
 0x123   :  { %6817 = vst [vmem:[#allocation3_spill] sm:$0xff] %v5027_v22  ;;  %v5029_v23 = vpop.f32.mrb[21].mxu1 }
 0x124   :  { %v5031_v17 = vpop.f32.mrb[22].mxu1 }
 0x125   :  { %6818 = vst [vmem:[#allocation4_spill] sm:$0xff] %v5031_v17  ;;  %v5033_v27 = vpop.f32.mrb[23].mxu1 }
 0x12a   :  { %v3766_v28 = vpop.f32.mrb[24].mxu1 }
 0x12b   :  { %v5035_v29 = vadd.f32 %v3766_v28, %v988_v30  ;;  %v1076_v31 = vpop.f32.mrb[25].mxu1  ;;  %v5082_v28 = vsub.s32 0, %v4994_v2 }
 0x12c   :  { %v5037_v34 = vadd.f32 %v1076_v31, %v980_v12  ;;  %v3767_v35 = vpop.f32.mrb[26].mxu1 }
 0x12d   :  { %v1139_v36 = vmul.f32 %v5035_v29, %v5035_v29  ;;  %v5041_v40 = vadd.f32 %v3767_v35, %v991_v32  ;;  %v1079_v41 = vpop.f32.mrb[27].mxu1  ;;  %6819 = vst [vmem:[#allocation5_spill] sm:$0xff] %v5082_v28 }
 0x12e   :  { %v1133_v43 = vmul.f32 %v5037_v34, %v5037_v34  ;;  %v5045_v55 = vadd.f32 %v1079_v41, %v983_v13 }
 0x12f   :  { %v1187_v57 = vmul.f32 %v1139_v36, %v5035_v29  ;;  %v1142_v59 = vmul.f32 %v5041_v40, %v5041_v40  ;;  %v5086_v36 = vsub.s32 1, %v4994_v2 }
 0x130   :  { %v1181_v60 = vmul.f32 %v1133_v43, %v5037_v34  ;;  %v1136_v61 = vmul.f32 %v5045_v55, %v5045_v55 }
 0x131   :  { %v1235_v62 = vmul.f32 0.044715, %v1187_v57  ;;  %v1190_v0 = vmul.f32 %v1142_v59, %v5041_v40  ;;  %6820 = vst [vmem:[#allocation6_spill] sm:$0xff] %v5086_v36  ;;  %v3579_v57 = vld [vmem:[%s6798_s2 + $0x1] ss:$4 sm:$0x7] }
 0x132   :  { %v1229_v1 = vmul.f32 0.044715, %v1181_v60  ;;  %v1184_v5 = vmul.f32 %v1136_v61, %v5045_v55  ;;  %v3580_v59 = vld [vmem:[%s6798_s2 + $0x2] ss:$4 sm:$0x7] }
 0x133   :  { %v1283_v8 = vadd.f32 %v1235_v62, %v5035_v29  ;;  %v1238_v9 = vmul.f32 0.044715, %v1190_v0  ;;  %v5097_v62 = vrot.slane %v5002_v4, %v5082_v28 }
 0x134   :  { %v1277_v12 = vadd.f32 %v1229_v1, %v5037_v34  ;;  %v1232_v13 = vmul.f32 0.044715, %v1184_v5  ;;  %v5101_v1 = vrot.slane %v5002_v4, %v5086_v36 }
 0x135   :  { %v1331_v19 = vmul.f32 0.7978846, %v1283_v8  ;;  %v1286_v24 = vadd.f32 %v1238_v9, %v5041_v40  ;;  %v5104_v8 = vrot.slane %v3579_v57, %v5082_v28  ;;  %v5107_v9 = vrot.slane %v3580_v59, %v5082_v28 }
 0x136   :  { %v1325_v32 = vmul.f32 0.7978846, %v1277_v12  ;;  %v1280_v33 = vadd.f32 %v1232_v13, %v5045_v55 }
 0x137   :  { %4186 = vtanh.f32 %v1331_v19  ;;  %v1334_v39 = vmul.f32 0.7978846, %v1286_v24  ;;  %v5113_v24 = vrot.slane %v3580_v59, %v4997_v3 }
 0x138   :  { %v3770_v7 = vpop.f32.mrb[28].mxu1  ;;  %4188 = vtanh.f32 %v1325_v32 }
 0x139   :  { %v5056_v10 = vadd.f32 %v3770_v7, %v1004_v14  ;;  %v1092_v11 = vpop.f32.mrb[29].mxu1  ;;  %4190 = vtanh.f32 %v1334_v39  ;;  %6822 = vst [vmem:[#allocation8_spill] sm:$0xff] %v5113_v24  ;;  %v5119_v39 = vrot.slane %v3579_v57, %v5086_v36 }
 0x13a   :  { %v5059_v16 = vadd.f32 %v1092_v11, %v996_v46  ;;  %v3771_v18 = vpop.f32.mrb[30].mxu1  ;;  %v1328_v46 = vmul.f32 0.7978846, %v1280_v33  ;;  %v5110_v11 = vrot.slane %v3579_v57, %v4997_v3  ;;  %v5126_v3 = vrot.slane %v3580_v59, %v5086_v36 }
 0x13b   :  { %v1151_v25 = vmul.f32 %v5056_v10, %v5056_v10  ;;  %v5064_v26 = vadd.f32 %v3771_v18, %v1007_v56  ;;  %v1095_v30 = vpop.f32.mrb[31].mxu1 }
 0x13c   :  { %v1145_v37 = vmul.f32 %v5059_v16, %v5059_v16  ;;  %v5069_v38 = vadd.f32 %v1095_v30, %v999_v47  ;;  %4192 = vtanh.f32 %v1328_v46  ;;  %6821 = vst [vmem:[#allocation7_spill] sm:$0xff] %v5110_v11 }
 0x13d   :  { %v1199_v42 = vmul.f32 %v1151_v25, %v5056_v10  ;;  %v1154_v45 = vmul.f32 %v5064_v26, %v5064_v26 }
 0x13e   :  { %v1193_v50 = vmul.f32 %v1145_v37, %v5059_v16  ;;  %v1148_v51 = vmul.f32 %v5069_v38, %v5069_v38 }
 0x13f   :  { %v1247_v44 = vmul.f32 0.044715, %v1199_v42  ;;  %v1202_v52 = vmul.f32 %v1154_v45, %v5064_v26 }
 0x140   :  { %v1241_v47 = vmul.f32 0.044715, %v1193_v50  ;;  %v1196_v53 = vmul.f32 %v1148_v51, %v5069_v38 }
 0x141   :  { %v1295_v54 = vadd.f32 %v1247_v44, %v5056_v10  ;;  %v1250_v14 = vmul.f32 0.044715, %v1202_v52  ;;  %v4187_v61 = vpop.eup %4186 }
 0x142   :  { %v1289_v56 = vadd.f32 %v1241_v47, %v5059_v16  ;;  %v1244_v48 = vmul.f32 0.044715, %v1196_v53  ;;  %v4189_v0 = vpop.eup %4188  ;;  %v1427_v5 = vadd.f32 1.0, %v4187_v61 }
 0x143   :  { %v1343_v31 = vmul.f32 0.7978846, %v1295_v54  ;;  %v1298_v35 = vadd.f32 %v1250_v14, %v5064_v26  ;;  %v4191_v7 = vpop.eup %4190  ;;  %v1421_v12 = vadd.f32 1.0, %v4189_v0 }
 0x144   :  { %v1337_v41 = vmul.f32 0.7978846, %v1289_v56  ;;  %v1292_v60 = vadd.f32 %v1244_v48, %v5069_v38  ;;  %v1475_v19 = vmul.f32 0.5, %v1427_v5  ;;  %v1430_v4 = vadd.f32 1.0, %v4191_v7 }
 0x145   :  { %4194 = vtanh.f32 %v1343_v31  ;;  %v1346_v43 = vmul.f32 0.7978846, %v1298_v35  ;;  %v1469_v33 = vmul.f32 0.5, %v1421_v12 }
 0x146   :  { %4196 = vtanh.f32 %v1337_v41  ;;  %v4193_v13 = vpop.eup %4192  ;;  %v1340_v25 = vmul.f32 0.7978846, %v1292_v60  ;;  %v1523_v46 = vmul.f32 %v1475_v19, %v5035_v29  ;;  %v1478_v50 = vmul.f32 0.5, %v1430_v4 }
 0x147   :  { %4198 = vtanh.f32 %v1346_v43  ;;  %v1424_v37 = vadd.f32 1.0, %v4193_v13  ;;  %v1517_v47 = vmul.f32 %v1469_v33, %v5037_v34 }
 0x148   :  { %v5140_v29 = vmul.f32 %v1478_v50, %v5041_v40  ;;  %4200 = vtanh.f32 %v1340_v25  ;;  %v5153_v59 = vmul.f32 %v5110_v11, %v1523_v46 }
 0x149   :  { %v1472_v53 = vmul.f32 0.5, %v1424_v37  ;;  %v5147_v34 = vmul.f32 %v5110_v11, %v1517_v47 }
 0x14a   :  { %6823 = vst [vmem:[#allocation9_spill] sm:$0xff] %v5140_v29  ;;  %6825 = vst [vmem:[#allocation11_spill] sm:$0xff] %v5153_v59 }
 0x14b   :  { %v1520_v35 = vmul.f32 %v1472_v53, %v5045_v55  ;;  %6824 = vst [vmem:[#allocation10_spill] sm:$0xff] %v5147_v34 }
 0x14d   :  { %v5157_v55 = vmul.f32 %v5110_v11, %v1520_v35 }
 0x14f   :  { %v4195_v56 = vpop.eup %4194  ;;  %6826 = vst [vmem:[#allocation12_spill] sm:$0xff] %v5157_v55 }
 0x150   :  { %v4197_v41 = vpop.eup %4196  ;;  %v1439_v40 = vadd.f32 1.0, %v4195_v56 }
 0x151   :  { %v4199_v60 = vpop.eup %4198  ;;  %v1433_v5 = vadd.f32 1.0, %v4197_v41 }
 0x152   :  { %v1442_v19 = vadd.f32 1.0, %v4199_v60  ;;  %v4201_v60 = vpop.eup %4200 }
 0x153   :  { %v1481_v37 = vmul.f32 0.5, %v1433_v5 }
 0x155   :  { %v834_v18 = vpop.f32.mrb[0].mxu0 }
 0x156   :  { %v5116_v30 = vadd.f32 %v834_v18, %v5097_v62  ;;  %v836_v32 = vpop.f32.mrb[1].mxu0  ;;  %v1487_v18 = vmul.f32 0.5, %v1439_v40 }
 0x157   :  { %v5122_v42 = vadd.f32 %v836_v32, %v5101_v1  ;;  %v838_v45 = vpop.f32.mrb[2].mxu0 }
 0x158   :  { %v1107_v51 = vmul.f32 %v5116_v30, %v5116_v30  ;;  %v5131_v44 = vadd.f32 %v838_v45, %v5097_v62  ;;  %v840_v52 = vpop.f32.mrb[3].mxu0 }
 0x159   :  { %v1108_v54 = vmul.f32 %v5122_v42, %v5122_v42  ;;  %v5137_v14 = vadd.f32 %v840_v52, %v5101_v1  ;;  %v5169_v52 = vmul.f32 %v1487_v18, %v5056_v10 }
 0x15a   :  { %v1155_v48 = vmul.f32 %v5116_v30, %v1107_v51  ;;  %v1110_v31 = vmul.f32 %v5131_v44, %v5131_v44 }
 0x15b   :  { %v1156_v43 = vmul.f32 %v5122_v42, %v1108_v54  ;;  %v1111_v57 = vmul.f32 %v5137_v14, %v5137_v14  ;;  %6827 = vst [vmem:[#allocation13_spill] sm:$0xff] %v5169_v52 }
 0x15c   :  { %v1203_v61 = vmul.f32 0.044715, %v1155_v48  ;;  %v1158_v0 = vmul.f32 %v5131_v44, %v1110_v31 }
 0x15d   :  { %v1204_v7 = vmul.f32 0.044715, %v1156_v43  ;;  %v1159_v12 = vmul.f32 %v5137_v14, %v1111_v57  ;;  %v844_v13 = vpop.f32.mrb[4].mxu0 }
 0x15e   :  { %v1251_v4 = vadd.f32 %v5116_v30, %v1203_v61  ;;  %v1206_v25 = vmul.f32 0.044715, %v1158_v0  ;;  %v5162_v32 = vadd.f32 %v844_v13, %v5097_v62  ;;  %v846_v33 = vpop.f32.mrb[5].mxu0  ;;  %v5191_v13 = vmul.f32 %v1481_v37, %v5059_v16 }
 0x15f   :  { %v1252_v45 = vadd.f32 %v5122_v42, %v1204_v7  ;;  %v1207_v46 = vmul.f32 0.044715, %v1159_v12  ;;  %v5166_v50 = vadd.f32 %v846_v33, %v5101_v1  ;;  %v848_v51 = vpop.f32.mrb[6].mxu0  ;;  %v1490_v33 = vmul.f32 0.5, %v1442_v19 }
 0x160   :  { %v1299_v47 = vmul.f32 0.7978846, %v1251_v4  ;;  %v1254_v53 = vadd.f32 %v5131_v44, %v1206_v25  ;;  %v1113_v54 = vmul.f32 %v5162_v32, %v5162_v32  ;;  %v5175_v56 = vadd.f32 %v848_v51, %v5097_v62  ;;  %v850_v48 = vpop.f32.mrb[7].mxu0  ;;  %6828 = vst [vmem:[#allocation14_spill] sm:$0xff] %v5191_v13 }
 0x161   :  { %v1300_v31 = vmul.f32 0.7978846, %v1252_v45  ;;  %v1255_v35 = vadd.f32 %v5137_v14, %v1207_v46  ;;  %v1114_v41 = vmul.f32 %v5166_v50, %v5166_v50  ;;  %v5181_v43 = vadd.f32 %v850_v48, %v5101_v1 }
 0x162   :  { %4202 = vtanh.f32 %v1299_v47  ;;  %v1302_v10 = vmul.f32 0.7978846, %v1254_v53  ;;  %v1161_v57 = vmul.f32 %v5162_v32, %v1113_v54  ;;  %v1116_v40 = vmul.f32 %v5175_v56, %v5175_v56 }
 0x163   :  { %4204 = vtanh.f32 %v1300_v31  ;;  %v1303_v61 = vmul.f32 0.7978846, %v1255_v35  ;;  %v1162_v0 = vmul.f32 %v5166_v50, %v1114_v41  ;;  %v1117_v5 = vmul.f32 %v5181_v43, %v5181_v43 }
 0x164   :  { %4206 = vtanh.f32 %v1302_v10  ;;  %v1209_v7 = vmul.f32 0.044715, %v1161_v57  ;;  %v1164_v12 = vmul.f32 %v5175_v56, %v1116_v40  ;;  %v1436_v53 = vadd.f32 1.0, %v4201_v60 }
 0x165   :  { %4208 = vtanh.f32 %v1303_v61  ;;  %v1210_v18 = vmul.f32 0.044715, %v1162_v0  ;;  %v1165_v4 = vmul.f32 %v5181_v43, %v1117_v5  ;;  %v854_v25 = vpop.f32.mrb[8].mxu0  ;;  %v5203_v31 = vmul.f32 %v1490_v33, %v5064_v26 }
 0x166   :  { %v1257_v45 = vadd.f32 %v5162_v32, %v1209_v7  ;;  %v1212_v46 = vmul.f32 0.044715, %v1164_v12  ;;  %v5196_v51 = vadd.f32 %v854_v25, %v5097_v62  ;;  %v856_v47 = vpop.f32.mrb[9].mxu0 }
 0x167   :  { %v1258_v54 = vadd.f32 %v5166_v50, %v1210_v18  ;;  %v1213_v48 = vmul.f32 0.044715, %v1165_v4  ;;  %v5200_v16 = vadd.f32 %v856_v47, %v5101_v1  ;;  %v858_v37 = vpop.f32.mrb[10].mxu0  ;;  %6829 = vst [vmem:[#allocation15_spill] sm:$0xff] %v5203_v31 }
 0x168   :  { %v1305_v35 = vmul.f32 0.7978846, %v1257_v45  ;;  %v1260_v19 = vadd.f32 %v5175_v56, %v1212_v46  ;;  %v1119_v41 = vmul.f32 %v5196_v51, %v5196_v51  ;;  %v5209_v10 = vadd.f32 %v858_v37, %v5097_v62  ;;  %v860_v57 = vpop.f32.mrb[11].mxu0 }
 0x169   :  { %v1306_v40 = vmul.f32 0.7978846, %v1258_v54  ;;  %v1261_v60 = vadd.f32 %v5181_v43, %v1213_v48  ;;  %v1120_v61 = vmul.f32 %v5200_v16, %v5200_v16  ;;  %v5215_v0 = vadd.f32 %v860_v57, %v5101_v1 }
 0x16a   :  { %4210 = vtanh.f32 %v1305_v35  ;;  %v1308_v26 = vmul.f32 0.7978846, %v1260_v19  ;;  %v1167_v5 = vmul.f32 %v5196_v51, %v1119_v41  ;;  %v1122_v7 = vmul.f32 %v5209_v10, %v5209_v10 }
 0x16b   :  { %4212 = vtanh.f32 %v1306_v40  ;;  %v1309_v12 = vmul.f32 0.7978846, %v1261_v60  ;;  %v1168_v18 = vmul.f32 %v5200_v16, %v1120_v61  ;;  %v1123_v4 = vmul.f32 %v5215_v0, %v5215_v0 }
 0x16c   :  { %v4203_v25 = vpop.eup %4202  ;;  %4214 = vtanh.f32 %v1308_v26  ;;  %v1215_v33 = vmul.f32 0.044715, %v1167_v5  ;;  %v1170_v45 = vmul.f32 %v5209_v10, %v1122_v7  ;;  %v5224_v46 = vmul.f32 0.5, %v1436_v53 }
 0x16d   :  { %v4205_v47 = vpop.eup %4204  ;;  %v1395_v54 = vadd.f32 1.0, %v4203_v25  ;;  %4216 = vtanh.f32 %v1309_v12  ;;  %v1216_v48 = vmul.f32 0.044715, %v1168_v18  ;;  %v1171_v37 = vmul.f32 %v5215_v0, %v1123_v4  ;;  %v864_v35 = vpop.f32.mrb[12].mxu0 }
 0x16e   :  { %v4207_v19 = vpop.eup %4206  ;;  %v1396_v41 = vadd.f32 1.0, %v4205_v47  ;;  %v1263_v57 = vadd.f32 %v5196_v51, %v1215_v33  ;;  %v1218_v40 = vmul.f32 0.044715, %v1170_v45  ;;  %v5229_v60 = vadd.f32 %v864_v35, %v5097_v62  ;;  %v866_v61 = vpop.f32.mrb[13].mxu0 }
 0x16f   :  { %v4209_v26 = vpop.eup %4208  ;;  %v1443_v5 = vmul.f32 0.5, %v1395_v54  ;;  %v1398_v53 = vadd.f32 1.0, %v4207_v19  ;;  %v1264_v7 = vadd.f32 %v5200_v16, %v1216_v48  ;;  %v1219_v25 = vmul.f32 0.044715, %v1171_v37  ;;  %v868_v12 = vpop.f32.mrb[14].mxu0 }
 0x170   :  { %v1444_v18 = vmul.f32 0.5, %v1396_v41  ;;  %v1399_v63 = vadd.f32 1.0, %v4209_v26  ;;  %v1311_v4 = vmul.f32 0.7978846, %v1263_v57  ;;  %v1266_v58 = vadd.f32 %v5209_v10, %v1218_v40  ;;  %v870_v47 = vpop.f32.mrb[15].mxu0 }
 0x171   :  { %v1491_v33 = vmul.f32 %v5116_v30, %v1443_v5  ;;  %v1446_v45 = vmul.f32 0.5, %v1398_v53  ;;  %v1312_v2 = vmul.f32 0.7978846, %v1264_v7  ;;  %v1267_v35 = vadd.f32 %v5215_v0, %v1219_v25 }
 0x172   :  { %v5236_v36 = vmul.f32 %v5122_v42, %v1444_v18  ;;  %v1447_v54 = vmul.f32 0.5, %v1399_v63  ;;  %4218 = vtanh.f32 %v1311_v4  ;;  %v1314_v48 = vmul.f32 0.7978846, %v1266_v58 }
 0x173   :  { %v1557_v37 = vmul.f32 %v5104_v8, %v1491_v33  ;;  %v1494_v19 = vmul.f32 %v5131_v44, %v1446_v45  ;;  %4220 = vtanh.f32 %v1312_v2  ;;  %v1315_v41 = vmul.f32 0.7978846, %v1267_v35 }
 0x174   :  { %v4211_v57 = vpop.eup %4210  ;;  %v5241_v40 = vmul.f32 %v5137_v14, %v1447_v54  ;;  %4222 = vtanh.f32 %v1314_v48  ;;  %v1125_v30 = vmul.f32 %v5229_v60, %v5229_v60  ;;  %v5246_v42 = vadd.f32 %v866_v61, %v5101_v1 }
 0x175   :  { %v4213_v63 = vpop.eup %4212  ;;  %v5249_v58 = vadd.f32 %v5107_v9, %v1557_v37  ;;  %v1560_v26 = vmul.f32 %v5104_v8, %v1494_v19  ;;  %v1401_v44 = vadd.f32 1.0, %v4211_v57  ;;  %4224 = vtanh.f32 %v1315_v41  ;;  %v874_v2 = vpop.f32.mrb[16].mxu0 }
 0x176   :  { %v4215_v5 = vpop.eup %4214  ;;  %v1402_v53 = vadd.f32 1.0, %v4213_v63  ;;  %v1173_v14 = vmul.f32 %v5229_v60, %v1125_v30  ;;  %v1126_v7 = vmul.f32 %v5246_v42, %v5246_v42  ;;  %v5256_v25 = vadd.f32 %v868_v12, %v5097_v62  ;;  %v876_v61 = vpop.f32.mrb[17].mxu0 }
 0x177   :  { %v4217_v18 = vpop.eup %4216  ;;  %v5259_v4 = vadd.f32 %v5107_v9, %v1560_v26  ;;  %v1449_v33 = vmul.f32 0.5, %v1401_v44  ;;  %v1404_v45 = vadd.f32 1.0, %v4215_v5  ;;  %v5262_v35 = vadd.f32 %v870_v47, %v5101_v1  ;;  %v878_v54 = vpop.f32.mrb[18].mxu0 }
 0x178   :  { %v1450_v48 = vmul.f32 0.5, %v1402_v53  ;;  %v1405_v37 = vadd.f32 1.0, %v4217_v18  ;;  %v1221_v19 = vmul.f32 0.044715, %v1173_v14  ;;  %v1174_v41 = vmul.f32 %v5246_v42, %v1126_v7  ;;  %v880_v57 = vpop.f32.mrb[19].mxu0 }
 0x179   :  { %v5266_v12 = vmul.f32 %v5162_v32, %v1449_v33  ;;  %v1452_v30 = vmul.f32 0.5, %v1404_v45  ;;  %v1128_v63 = vmul.f32 %v5256_v25, %v5256_v25  ;;  %v1129_v26 = vmul.f32 %v5262_v35, %v5262_v35 }
 0x17a   :  { %v5273_v47 = vmul.f32 %v5166_v50, %v1450_v48  ;;  %v1453_v44 = vmul.f32 0.5, %v1405_v37  ;;  %v1269_v5 = vadd.f32 %v5229_v60, %v1221_v19  ;;  %v1222_v53 = vmul.f32 0.044715, %v1174_v41 }
 0x17b   :  { %v5277_v14 = vmul.f32 %v5175_v56, %v1452_v30  ;;  %v1176_v32 = vmul.f32 %v5256_v25, %v1128_v63  ;;  %v1177_v7 = vmul.f32 %v5262_v35, %v1129_v26  ;;  %v5282_v18 = vadd.f32 %v874_v2, %v5097_v62 }
 0x17c   :  { %v4219_v33 = vpop.eup %4218  ;;  %v5285_v45 = vmul.f32 %v5181_v43, %v1453_v44  ;;  %v1317_v50 = vmul.f32 0.7978846, %v1269_v5  ;;  %v1270_v48 = vadd.f32 %v5246_v42, %v1222_v53  ;;  %v5290_v37 = vmul.f32 %v5224_v46, %v5069_v38 }
 0x17d   :  { %v4221_v56 = vpop.eup %4220  ;;  %v1407_v19 = vadd.f32 1.0, %v4219_v33  ;;  %v1224_v41 = vmul.f32 0.044715, %v1176_v32  ;;  %v1225_v30 = vmul.f32 0.044715, %v1177_v7  ;;  %v1131_v63 = vmul.f32 %v5282_v18, %v5282_v18  ;;  %v884_v2 = vpop.f32.mrb[20].mxu0 }
 0x17e   :  { %6830 = vst [vmem:[#allocation16_spill] sm:$0xff] %v5290_v37  ;;  %v4223_v26 = vpop.eup %4222  ;;  %v1408_v28 = vadd.f32 1.0, %v4221_v56  ;;  %4226 = vtanh.f32 %v1317_v50  ;;  %v1318_v43 = vmul.f32 0.7978846, %v1270_v48  ;;  %v5295_v44 = vadd.f32 %v876_v61, %v5101_v1  ;;  %v886_v5 = vpop.f32.mrb[21].mxu0 }
 0x17f   :  { %v4225_v53 = vpop.eup %4224  ;;  %v1455_v31 = vmul.f32 0.5, %v1407_v19  ;;  %v1410_v38 = vadd.f32 1.0, %v4223_v26  ;;  %v1272_v46 = vadd.f32 %v5256_v25, %v1224_v41  ;;  %v1273_v32 = vadd.f32 %v5262_v35, %v1225_v30  ;;  %v888_v7 = vpop.f32.mrb[22].mxu0 }
 0x180   :  { %v1456_v33 = vmul.f32 0.5, %v1408_v28  ;;  %v1411_v52 = vadd.f32 1.0, %v4225_v53  ;;  %4228 = vtanh.f32 %v1318_v43  ;;  %v1179_v37 = vmul.f32 %v5282_v18, %v1131_v63  ;;  %v5300_v56 = vpop.f32.mrb[23].mxu0 }
 0x181   :  { %v5303_v50 = vmul.f32 %v5196_v51, %v1455_v31  ;;  %v1458_v61 = vmul.f32 0.5, %v1410_v38  ;;  %v1320_v48 = vmul.f32 0.7978846, %v1272_v46  ;;  %v1321_v13 = vmul.f32 0.7978846, %v1273_v32 }
 0x182   :  { %v5306_v19 = vmul.f32 %v5200_v16, %v1456_v33  ;;  %v1459_v41 = vmul.f32 0.5, %v1411_v52  ;;  %v1227_v26 = vmul.f32 0.044715, %v1179_v37  ;;  %v1132_v28 = vmul.f32 %v5295_v44, %v5295_v44 }
 0x183   :  { %v5311_v30 = vmul.f32 %v5209_v10, %v1458_v61  ;;  %4230 = vtanh.f32 %v1320_v48  ;;  %v5314_v63 = vadd.f32 %v878_v54, %v5097_v62  ;;  %v5317_v51 = vadd.f32 %v880_v57, %v5101_v1 }
 0x184   :  { %v5320_v31 = vmul.f32 %v5215_v0, %v1459_v41  ;;  %4232 = vtanh.f32 %v1321_v13  ;;  %v1275_v52 = vadd.f32 %v5282_v18, %v1227_v26  ;;  %v1180_v16 = vmul.f32 %v5295_v44, %v1132_v28 }
 0x185   :  { %v1134_v37 = vmul.f32 %v5314_v63, %v5314_v63  ;;  %v1135_v10 = vmul.f32 %v5317_v51, %v5317_v51  ;;  %v1558_v54 = vmul.f32 %v5119_v39, %v5236_v36  ;;  %v1561_v57 = vmul.f32 %v5119_v39, %v5241_v40  ;;  %v5332_v43 = vpop.f32.mrb[24].mxu0 }
 0x186   :  { %v1323_v0 = vmul.f32 0.7978846, %v1275_v52  ;;  %v1228_v13 = vmul.f32 0.044715, %v1180_v16  ;;  %v5335_v53 = vadd.f32 %v884_v2, %v5097_v62  ;;  %v1671_v38 = vpack.c.bf16 %v5259_v4, %v5249_v58  ;;  %v5339_v46 = vpop.f32.mrb[25].mxu0 }
 0x187   :  { %v1182_v32 = vmul.f32 %v5314_v63, %v1134_v37  ;;  %v1183_v33 = vmul.f32 %v5317_v51, %v1135_v10  ;;  %v1624_v36 = vadd.f32 %v5126_v3, %v1558_v54  ;;  %v1627_v40 = vadd.f32 %v5126_v3, %v1561_v57  ;;  %v5345_v61 = vpop.f32.mrb[26].mxu0  ;;  %v4158_v4 = vld [vmem:[%s6797_s3 + $0x100] ss:$8 sps:$4 sm:$0xff]  }
 0x188   :  { %v4227_v48 = vpop.eup %4226  ;;  %4234 = vtanh.f32 %v1323_v0  ;;  %v1276_v2 = vadd.f32 %v5295_v44, %v1228_v13  ;;  %v1137_v41 = vmul.f32 %v5335_v53, %v5335_v53  ;;  %v5351_v58 = vadd.f32 %v886_v5, %v5101_v1  ;;  %v5356_v26 = vpop.f32.mrb[27].mxu0  ;;  %v4163_v13 = vld [vmem:[%s6797_s3 + $0x114] ss:$8 sps:$4 sm:$0xff]  }
 0x189   :  { %v1413_v28 = vadd.f32 1.0, %v4227_v48  ;;  %v1230_v52 = vmul.f32 0.044715, %v1182_v32  ;;  %v1231_v16 = vmul.f32 0.044715, %v1183_v33  ;;  %v1672_v37 = vpack.c.bf16 %v1627_v40, %v1624_v36 }
 0x18a   :  { %v4229_v10 = vpop.eup %4228  ;;  %v1324_v54 = vmul.f32 0.7978846, %v1276_v2  ;;  %v1185_v57 = vmul.f32 %v5335_v53, %v1137_v41  ;;  %v1138_v0 = vmul.f32 %v5351_v58, %v5351_v58  ;;  %v5362_v5 = vadd.f32 %v888_v7, %v5097_v62  ;;  %v4161_v48 = vld [vmem:[%s6797_s3 + $0x110] ss:$8 sps:$4 sm:$0xff]  }
 0x18b   :  { %v1461_v59 = vmul.f32 0.5, %v1413_v28  ;;  %v1414_v29 = vadd.f32 1.0, %v4229_v10  ;;  %v1278_v32 = vadd.f32 %v5314_v63, %v1230_v52  ;;  %v1279_v33 = vadd.f32 %v5317_v51, %v1231_v16  ;;  %2027 = vmatprep.mubr.bf16.mxu1 %v1672_v37 }
 0x18c   :  { %4236 = vtanh.f32 %v1324_v54  ;;  %v1233_v36 = vmul.f32 0.044715, %v1185_v57  ;;  %2028 = vmatmul.mubr.bf16.vlgmr.msra.gmra.mrb[32].mxu1 %v1671_v38  ;;  %v1186_v40 = vmul.f32 %v5351_v58, %v1138_v0  ;;  %v1140_v7 = vmul.f32 %v5362_v5, %v5362_v5 }
 0x18d   :  { %v4231_v2 = vpop.eup %4230  ;;  %v5376_v41 = vmul.f32 %v5229_v60, %v1461_v59  ;;  %v1462_v28 = vmul.f32 0.5, %v1414_v29  ;;  %v1326_v52 = vmul.f32 0.7978846, %v1278_v32  ;;  %v1327_v16 = vmul.f32 0.7978846, %v1279_v33  ;;  %2109 = vmatpush1.bf16.msra.mxu1 %v4158_v4  ;;  %v5378_v37 = vpop.f32.mrb[28].mxu0 }
 0x18e   :  { %v4233_v38 = vpop.eup %4232  ;;  %v1416_v10 = vadd.f32 1.0, %v4231_v2  ;;  %v1281_v54 = vadd.f32 %v5335_v53, %v1233_v36  ;;  %v1234_v57 = vmul.f32 0.044715, %v1186_v40  ;;  %v1188_v0 = vmul.f32 %v5362_v5, %v1140_v7  ;;  %2110 = vmatprep.subr.bf16.mxu1 %v4163_v13  ;;  %v5382_v55 = vpop.f32.mrb[29].mxu0  ;;  %v4166_v59 = vld [vmem:[%s6797_s3 + $0x124] ss:$8 sps:$4 sm:$0xff]  }
 0x18f   :  { %v5388_v29 = vmul.f32 %v5246_v42, %v1462_v28  ;;  %v1417_v60 = vadd.f32 1.0, %v4233_v38  ;;  %4238 = vtanh.f32 %v1326_v52  ;;  %v5392_v4 = vadd.f32 %v5300_v56, %v5101_v1  ;;  %v5394_v32 = vpop.f32.mrb[30].mxu0  ;;  %v4164_v56 = vld [vmem:[%s6797_s3 + $0x120] ss:$8 sps:$4 sm:$0xff]  }
 0x190   :  { %v1464_v33 = vmul.f32 0.5, %v1416_v10  ;;  %4240 = vtanh.f32 %v1327_v16  ;;  %v1329_v13 = vmul.f32 0.7978846, %v1281_v54  ;;  %v1282_v36 = vadd.f32 %v5351_v58, %v1234_v57  ;;  %v5397_v40 = vpop.f32.mrb[31].mxu0  ;;  %v4169_v54 = vld [vmem:[%s6797_s3 + $0x134] ss:$8 sps:$4 sm:$0xff]  }
 0x191   :  { %v1465_v7 = vmul.f32 0.5, %v1417_v60  ;;  %v1236_v2 = vmul.f32 0.044715, %v1188_v0  ;;  %v1141_v42 = vmul.f32 %v5392_v4, %v5392_v4  ;;  %v1564_v28 = vmul.f32 %v5119_v39, %v5273_v47  ;;  %2111 = vmatpush1.bf16.msra.mxu1 %v4161_v48 }
 0x192   :  { %v4235_v52 = vpop.eup %4234  ;;  %v5407_v16 = vmul.f32 %v5256_v25, %v1464_v33  ;;  %4242 = vtanh.f32 %v1329_v13  ;;  %v1330_v38 = vmul.f32 0.7978846, %v1282_v36  ;;  %v1567_v10 = vmul.f32 %v5119_v39, %v5285_v45  ;;  %2112 = vmatprep.subr.bf16.mxu1 %v4166_v59  ;;  %v4167_v59 = vld [vmem:[%s6797_s3 + $0x130] ss:$8 sps:$4 sm:$0xff]  }
 0x193   :  { %v5415_v47 = vmul.f32 %v5262_v35, %v1465_v7  ;;  %v1419_v48 = vadd.f32 1.0, %v4235_v52  ;;  %v1284_v57 = vadd.f32 %v5362_v5, %v1236_v2  ;;  %v1189_v0 = vmul.f32 %v5392_v4, %v1141_v42 }
 0x194   :  { %4244 = vtanh.f32 %v1330_v38  ;;  %v1630_v25 = vadd.f32 %v5126_v3, %v1564_v28  ;;  %v1633_v60 = vadd.f32 %v5126_v3, %v1567_v10  ;;  %v5423_v45 = vadd.f32 %v5332_v43, %v5097_v62 }
 0x195   :  { %v1467_v35 = vmul.f32 0.5, %v1419_v48  ;;  %v1332_v33 = vmul.f32 0.7978846, %v1284_v57  ;;  %v1237_v13 = vmul.f32 0.044715, %v1189_v0  ;;  %v1563_v36 = vmul.f32 %v5104_v8, %v5266_v12  ;;  %2113 = vmatpush1.bf16.msra.mxu1 %v4164_v56  ;;  %v5430_v7 = vpop.f32.mrb[32].mxu0 }
 0x196   :  { %v4237_v2 = vpop.eup %4236  ;;  %v1675_v42 = vpack.c.bf16 %v1633_v60, %v1630_v25  ;;  %v1143_v28 = vmul.f32 %v5423_v45, %v5423_v45  ;;  %v1566_v43 = vmul.f32 %v5104_v8, %v5277_v14  ;;  %v5438_v52 = vadd.f32 %v5339_v46, %v5101_v1  ;;  %v5440_v38 = vpop.f32.mrb[33].mxu0  ;;  %2114 = vmatprep.subr.bf16.mxu1 %v4169_v54  ;;  %v4172_v12 = vld [vmem:[%s6797_s3 + $0x144] ss:$8 sps:$4 sm:$0xff]  }
 0x197   :  { %v5446_v56 = vmul.f32 %v5282_v18, %v1467_v35  ;;  %v1420_v10 = vadd.f32 1.0, %v4237_v2  ;;  %4246 = vtanh.f32 %v1332_v33  ;;  %v1285_v48 = vadd.f32 %v5392_v4, %v1237_v13  ;;  %v5449_v57 = vpop.f32.mrb[34].mxu0 }
 0x198   :  { %2037 = vmatprep.mubr.bf16.mxu1 %v1675_v42  ;;  %v1191_v14 = vmul.f32 %v5423_v45, %v1143_v28  ;;  %v1629_v46 = vadd.f32 %v5107_v9, %v1563_v36  ;;  %v1632_v54 = vadd.f32 %v5107_v9, %v1566_v43  ;;  %v1144_v0 = vmul.f32 %v5438_v52, %v5438_v52  ;;  %v5456_v25 = vpop.f32.mrb[35].mxu0  ;;  %v4170_v36 = vld [vmem:[%s6797_s3 + $0x140] ss:$8 sps:$4 sm:$0xff]  }
 0x199   :  { %v4239_v18 = vpop.eup %4238  ;;  %v1468_v60 = vmul.f32 0.5, %v1420_v10  ;;  %v1333_v35 = vmul.f32 0.7978846, %v1285_v48  ;;  %v5460_v33 = vadd.f32 %v5345_v61, %v5097_v62  ;;  %v5464_v13 = vadd.f32 %v5356_v26, %v5101_v1  ;;  %2115 = vmatpush1.bf16.msra.mxu1 %v4167_v59  ;;  %v4175_v61 = vld [vmem:[%s6797_s3 + $0x154] ss:$8 sps:$4 sm:$0xff]  }
 0x19a   :  { %v4241_v2 = vpop.eup %4240  ;;  %v1422_v42 = vadd.f32 1.0, %v4239_v18  ;;  %v1239_v28 = vmul.f32 0.044715, %v1191_v14  ;;  %v1674_v43 = vpack.c.bf16 %v1632_v54, %v1629_v46  ;;  %v1192_v10 = vmul.f32 %v5438_v52, %v1144_v0  ;;  %2116 = vmatprep.subr.bf16.mxu1 %v4172_v12 }
 0x19b   :  { %v5474_v48 = vmul.f32 %v5295_v44, %v1468_v60  ;;  %v1423_v26 = vadd.f32 1.0, %v4241_v2  ;;  %4248 = vtanh.f32 %v1333_v35  ;;  %v1146_v59 = vmul.f32 %v5460_v33, %v5460_v33  ;;  %v4173_v35 = vld [vmem:[%s6797_s3 + $0x150] ss:$8 sps:$4 sm:$0xff]  }
 0x19c   :  { %v4243_v34 = vpop.eup %4242  ;;  %v1470_v24 = vmul.f32 0.5, %v1422_v42  ;;  %v1287_v14 = vadd.f32 %v5423_v45, %v1239_v28  ;;  %2038 = vmatmul.mubr.bf16.gmra.mrb[36].mxu1 %v1674_v43  ;;  %v1240_v46 = vmul.f32 0.044715, %v1192_v10  ;;  %v1147_v12 = vmul.f32 %v5464_v13, %v5464_v13 }
 0x19d   :  { %v1471_v54 = vmul.f32 0.5, %v1423_v26  ;;  %v1425_v0 = vadd.f32 1.0, %v4243_v34  ;;  %v1194_v18 = vmul.f32 %v5460_v33, %v1146_v59  ;;  %v1570_v44 = vmul.f32 %v5119_v39, %v5306_v19  ;;  %v5484_v60 = vpop.f32.mrb[36].mxu0  ;;  %2117 = vmatpush1.bf16.msra.mxu1 %v4170_v36  ;;  %v4178_v19 = vld [vmem:[%s6797_s3 + $0x164] ss:$8 sps:$4 sm:$0xff]  }
 0x19e   :  { %v4245_v2 = vpop.eup %4244  ;;  %v5490_v42 = vmul.f32 %v5314_v63, %v1470_v24  ;;  %v1335_v28 = vmul.f32 0.7978846, %v1287_v14  ;;  %v1288_v43 = vadd.f32 %v5438_v52, %v1240_v46  ;;  %v1195_v34 = vmul.f32 %v5464_v13, %v1147_v12  ;;  %v5494_v10 = vpop.f32.mrb[37].mxu0  ;;  %2118 = vmatprep.subr.bf16.mxu1 %v4175_v61 }
 0x19f   :  { %v5500_v36 = vmul.f32 %v5317_v51, %v1471_v54  ;;  %v1473_v26 = vmul.f32 0.5, %v1425_v0  ;;  %v1426_v59 = vadd.f32 1.0, %v4245_v2  ;;  %v1242_v11 = vmul.f32 0.044715, %v1194_v18  ;;  %v5502_v24 = vpop.f32.mrb[38].mxu0 }
 0x1a0   :  { %4250 = vtanh.f32 %v1335_v28  ;;  %v1336_v63 = vmul.f32 0.7978846, %v1288_v43  ;;  %v1243_v14 = vmul.f32 0.044715, %v1195_v34  ;;  %v1573_v46 = vmul.f32 %v5119_v39, %v5320_v31  ;;  %v5506_v12 = vpop.f32.mrb[39].mxu0 }
 0x1a1   :  { %v4247_v61 = vpop.eup %4246  ;;  %v5509_v17 = vmul.f32 %v5335_v53, %v1473_v26  ;;  %v1474_v22 = vmul.f32 0.5, %v1426_v59  ;;  %v1290_v51 = vadd.f32 %v5460_v33, %v1242_v11  ;;  %v1636_v54 = vadd.f32 %v5126_v3, %v1570_v44  ;;  %2119 = vmatpush1.bf16.msra.mxu1 %v4173_v35  ;;  %v4176_v0 = vld [vmem:[%s6797_s3 + $0x160] ss:$8 sps:$4 sm:$0xff]   ;;  %v4181_v53 = vld [vmem:[%s6797_s3 + $0x174] ss:$8 sps:$4 sm:$0xff]  }
 0x1a2   :  { %v1428_v18 = vadd.f32 1.0, %v4247_v61  ;;  %4252 = vtanh.f32 %v1336_v63  ;;  %v1291_v31 = vadd.f32 %v5464_v13, %v1243_v14  ;;  %v1639_v2 = vadd.f32 %v5126_v3, %v1573_v46  ;;  %2120 = vmatprep.subr.bf16.mxu1 %v4178_v19 }
 0x1a3   :  { %v5522_v11 = vmul.f32 %v5351_v58, %v1474_v22  ;;  %v1338_v44 = vmul.f32 0.7978846, %v1290_v51  ;;  %v5526_v35 = vadd.f32 %v5378_v37, %v5097_v62  ;;  %v1569_v28 = vmul.f32 %v5104_v8, %v5303_v50  ;;  %v4179_v50 = vld [vmem:[%s6797_s3 + $0x170] ss:$8 sps:$4 sm:$0xff]  }
 0x1a4   :  { %v1476_v43 = vmul.f32 0.5, %v1428_v18  ;;  %v1339_v34 = vmul.f32 0.7978846, %v1291_v31  ;;  %v1678_v26 = vpack.c.bf16 %v1639_v2, %v1636_v54  ;;  %v1572_v19 = vmul.f32 %v5104_v8, %v5311_v30 }
 0x1a5   :  { %v4249_v59 = vpop.eup %4248  ;;  %4254 = vtanh.f32 %v1338_v44  ;;  %v1149_v22 = vmul.f32 %v5526_v35, %v5526_v35  ;;  %v1635_v58 = vadd.f32 %v5107_v9, %v1569_v28  ;;  %v5537_v37 = vadd.f32 %v5382_v55, %v5101_v1  ;;  %v5539_v63 = vpop.f32.mrb[40].mxu0  ;;  %2121 = vmatpush1.bf16.msra.mxu1 %v4176_v0 }
 0x1a6   :  { %v5545_v30 = vmul.f32 %v5362_v5, %v1476_v43  ;;  %v1429_v14 = vadd.f32 1.0, %v4249_v59  ;;  %4256 = vtanh.f32 %v1339_v34  ;;  %2047 = vmatprep.mubr.bf16.mxu1 %v1678_v26  ;;  %v1638_v46 = vadd.f32 %v5107_v9, %v1572_v19  ;;  %v5548_v61 = vpop.f32.mrb[41].mxu0  ;;  %2122 = vmatprep.subr.bf16.mxu1 %v4181_v53 }
 0x1a7   :  { %v1197_v55 = vmul.f32 %v5526_v35, %v1149_v22  ;;  %v1150_v51 = vmul.f32 %v5537_v37, %v5537_v37  ;;  %v5555_v54 = vadd.f32 %v5394_v32, %v5097_v62  ;;  %v5559_v5 = vadd.f32 %v5397_v40, %v5101_v1  ;;  %v5561_v0 = vpop.f32.mrb[42].mxu0 }
 0x1a8   :  { %v1477_v18 = vmul.f32 0.5, %v1429_v14  ;;  %v1677_v31 = vpack.c.bf16 %v1638_v46, %v1635_v58  ;;  %v1576_v2 = vmul.f32 %v5119_v39, %v5388_v29  ;;  %v1579_v53 = vmul.f32 %v5119_v39, %v5415_v47  ;;  %v5567_v44 = vpop.f32.mrb[43].mxu0 }
 0x1a9   :  { %v1245_v28 = vmul.f32 0.044715, %v1197_v55  ;;  %v1198_v62 = vmul.f32 %v5537_v37, %v1150_v51  ;;  %v1152_v32 = vmul.f32 %v5555_v54, %v5555_v54  ;;  %v1153_v1 = vmul.f32 %v5559_v5, %v5559_v5  ;;  %2123 = vmatpush1.bf16.msra.mxu1 %v4179_v50 }
 0x1aa   :  { %v4251_v40 = vpop.eup %4250  ;;  %v5575_v43 = vmul.f32 %v5392_v4, %v1477_v18  ;;  %2048 = vmatmul.mubr.bf16.gmra.mrb[40].mxu1 %v1677_v31  ;;  %v1642_v29 = vadd.f32 %v5126_v3, %v1576_v2  ;;  %v1645_v47 = vadd.f32 %v5126_v3, %v1579_v53  ;;  %v1575_v34 = vmul.f32 %v5104_v8, %v5376_v41 }
 0x1ab   :  { %v1431_v26 = vadd.f32 1.0, %v4251_v40  ;;  %v1293_v19 = vadd.f32 %v5526_v35, %v1245_v28  ;;  %v1246_v59 = vmul.f32 0.044715, %v1198_v62  ;;  %v1200_v22 = vmul.f32 %v5555_v54, %v1152_v32 }
 0x1ac   :  { %v4253_v58 = vpop.eup %4252  ;;  %v1201_v50 = vmul.f32 %v5559_v5, %v1153_v1  ;;  %v1681_v14 = vpack.c.bf16 %v1645_v47, %v1642_v29  ;;  %v1578_v4 = vmul.f32 %v5104_v8, %v5407_v16  ;;  %v1641_v46 = vadd.f32 %v5107_v9, %v1575_v34 }
 0x1ad   :  { %v1479_v55 = vmul.f32 0.5, %v1431_v26  ;;  %v1432_v51 = vadd.f32 1.0, %v4253_v58  ;;  %v1341_v18 = vmul.f32 0.7978846, %v1293_v19  ;;  %v1294_v41 = vadd.f32 %v5537_v37, %v1246_v59  ;;  %v5588_v31 = vpop.f32.mrb[44].mxu0 }
 0x1ae   :  { %v1248_v2 = vmul.f32 0.044715, %v1200_v22  ;;  %v1249_v53 = vmul.f32 0.044715, %v1201_v50  ;;  %2057 = vmatprep.mubr.bf16.mxu1 %v1681_v14  ;;  %v1644_v28 = vadd.f32 %v5107_v9, %v1578_v4  ;;  %v3666_v62 = vadd.f32 %v5440_v38, %v5430_v7  ;;  %v5593_v32 = vpop.f32.mrb[45].mxu0 }
 0x1af   :  { %v4255_v16 = vpop.eup %4254  ;;  %v5596_v1 = vmul.f32 %v5423_v45, %v1479_v55  ;;  %v1480_v40 = vmul.f32 0.5, %v1432_v51  ;;  %4258 = vtanh.f32 %v1341_v18  ;;  %v1342_v29 = vmul.f32 0.7978846, %v1294_v41  ;;  %v5598_v47 = vpop.f32.mrb[46].mxu0 }
 0x1b0   :  { %v4257_v34 = vpop.eup %4256  ;;  %v1434_v26 = vadd.f32 1.0, %v4255_v16  ;;  %v1296_v19 = vadd.f32 %v5555_v54, %v1248_v2  ;;  %v1297_v59 = vadd.f32 %v5559_v5, %v1249_v53  ;;  %v1680_v22 = vpack.c.bf16 %v1644_v28, %v1641_v46  ;;  %v5602_v58 = vpop.f32.mrb[47].mxu0 }
 0x1b1   :  { %v5605_v7 = vmul.f32 %v5438_v52, %v1480_v40  ;;  %v1435_v38 = vadd.f32 1.0, %v4257_v34  ;;  %4260 = vtanh.f32 %v1342_v29  ;;  %v948_v45 = vadd.f32 %v3666_v62, %v5006_v6 }
 0x1b2   :  { %v1482_v50 = vmul.f32 0.5, %v1434_v26  ;;  %v1344_v14 = vmul.f32 0.7978846, %v1296_v19  ;;  %v1345_v4 = vmul.f32 0.7978846, %v1297_v59  ;;  %2058 = vmatmul.mubr.bf16.gmra.mrb[44].mxu1 %v1680_v22  ;;  %v3669_v55 = vadd.f32 %v5456_v25, %v5449_v57 }
 0x1b3   :  { %v1483_v51 = vmul.f32 0.5, %v1435_v38  ;;  %v5611_v18 = vadd.f32 %v5021_v15, %v948_v45  ;;  %v1582_v46 = vmul.f32 %v5119_v39, %v5474_v48  ;;  %v1585_v52 = vmul.f32 %v5119_v39, %v5500_v36 }
 0x1b4   :  { %v5618_v41 = vmul.f32 %v5460_v33, %v1482_v50  ;;  %4262 = vtanh.f32 %v1344_v14  ;;  %v951_v2 = vadd.f32 %v3669_v55, %v5006_v6  ;;  %v1581_v53 = vmul.f32 %v5104_v8, %v5446_v56 }
 0x1b5   :  { %v5624_v57 = vmul.f32 %v5464_v13, %v1483_v51  ;;  %4264 = vtanh.f32 %v1345_v4  ;;  %v1109_v15 = vmul.f32 %v5611_v18, %v5611_v18  ;;  %v1648_v25 = vadd.f32 %v5126_v3, %v1582_v46 }
 0x1b6   :  { %v5630_v48 = vadd.f32 %v5025_v21, %v951_v2  ;;  %v1651_v33 = vadd.f32 %v5126_v3, %v1585_v52  ;;  %v1584_v36 = vmul.f32 %v5104_v8, %v5490_v42  ;;  %v1647_v28 = vadd.f32 %v5107_v9, %v1581_v53 }
 0x1b7   :  { %v1157_v56 = vmul.f32 %v1109_v15, %v5611_v18  ;;  %v3672_v13 = vadd.f32 %v5494_v10, %v5484_v60  ;;  %v3675_v62 = vadd.f32 %v5506_v12, %v5502_v24  ;;  %v1588_v16 = vmul.f32 %v5119_v39, %v5522_v11 }
 0x1b8   :  { %v1112_v21 = vmul.f32 %v5630_v48, %v5630_v48  ;;  %v1684_v40 = vpack.c.bf16 %v1651_v33, %v1648_v25  ;;  %v1650_v29 = vadd.f32 %v5107_v9, %v1584_v36  ;;  %v1591_v42 = vmul.f32 %v5119_v39, %v5575_v43 }
 0x1b9   :  { %v4259_v34 = vpop.eup %4258  ;;  %v1205_v26 = vmul.f32 0.044715, %v1157_v56  ;;  %v956_v19 = vadd.f32 %v3672_v13, %v5006_v6  ;;  %v959_v60 = vadd.f32 %v3675_v62, %v5006_v6  ;;  %v1654_v10 = vadd.f32 %v5126_v3, %v1588_v16 }
 0x1ba   :  { %v1437_v24 = vadd.f32 1.0, %v4259_v34  ;;  %v1160_v12 = vmul.f32 %v1112_v21, %v5630_v48  ;;  %2067 = vmatprep.mubr.bf16.mxu1 %v1684_v40  ;;  %v1683_v11 = vpack.c.bf16 %v1650_v29, %v1647_v28  ;;  %v1657_v59 = vadd.f32 %v5126_v3, %v1591_v42 }
 0x1bb   :  { %v4261_v22 = vpop.eup %4260  ;;  %v1253_v38 = vadd.f32 %v1205_v26, %v5611_v18  ;;  %v5655_v43 = vadd.f32 %v5019_v49, %v956_v19  ;;  %v5658_v45 = vadd.f32 %v5023_v20, %v959_v60  ;;  %v1587_v50 = vmul.f32 %v5104_v8, %v5509_v17 }
 0x1bc   :  { %v1485_v14 = vmul.f32 0.5, %v1437_v24  ;;  %v1438_v4 = vadd.f32 1.0, %v4261_v22  ;;  %v1208_v55 = vmul.f32 0.044715, %v1160_v12  ;;  %2068 = vmatmul.mubr.bf16.gmra.mrb[48].mxu1 %v1683_v11  ;;  %v1687_v51 = vpack.c.bf16 %v1657_v59, %v1654_v10 }
 0x1bd   :  { %v1301_v46 = vmul.f32 0.7978846, %v1253_v38  ;;  %v1115_v52 = vmul.f32 %v5655_v43, %v5655_v43  ;;  %v1118_v2 = vmul.f32 %v5658_v45, %v5658_v45  ;;  %v1590_v49 = vmul.f32 %v5104_v8, %v5545_v30 }
 0x1be   :  { %v4263_v20 = vpop.eup %4262  ;;  %v5669_v53 = vmul.f32 %v5526_v35, %v1485_v14  ;;  %v1486_v17 = vmul.f32 0.5, %v1438_v4  ;;  %v1256_v15 = vadd.f32 %v1208_v55, %v5630_v48  ;;  %2077 = vmatprep.mubr.bf16.mxu1 %v1687_v51  ;;  %v1653_v25 = vadd.f32 %v5107_v9, %v1587_v50 }
 0x1bf   :  { %v4265_v33 = vpop.eup %4264  ;;  %v1440_v36 = vadd.f32 1.0, %v4263_v20  ;;  %4266 = vtanh.f32 %v1301_v46  ;;  %v1163_v28 = vmul.f32 %v1115_v52, %v5655_v43  ;;  %v1166_v56 = vmul.f32 %v1118_v2, %v5658_v45 }
 0x1c0   :  { %v1534_v13 = vmul.f32 %v5537_v37, %v1486_v17  ;;  %v1441_v30 = vadd.f32 1.0, %v4265_v33  ;;  %v1304_v62 = vmul.f32 0.7978846, %v1256_v15  ;;  %v1656_v35 = vadd.f32 %v5107_v9, %v1590_v49  ;;  %v6831_v49 = vld [vmem:[#allocation3_spill] sm:$0xff] }
 0x1c1   :  { %v1488_v16 = vmul.f32 0.5, %v1440_v36  ;;  %v1211_v21 = vmul.f32 0.044715, %v1163_v28  ;;  %v1214_v40 = vmul.f32 0.044715, %v1166_v56  ;;  %v3678_v29 = vadd.f32 %v5548_v61, %v5539_v63 }
 0x1c2   :  { %v1489_v42 = vmul.f32 0.5, %v1441_v30  ;;  %4268 = vtanh.f32 %v1304_v62  ;;  %v1686_v34 = vpack.c.bf16 %v1656_v35, %v1653_v25  ;;  %v3681_v26 = vadd.f32 %v5567_v44, %v5561_v0 }
 0x1c3   :  { %v1536_v19 = vmul.f32 %v5555_v54, %v1488_v16  ;;  %v1259_v37 = vadd.f32 %v1211_v21, %v5655_v43  ;;  %v1262_v60 = vadd.f32 %v1214_v40, %v5658_v45  ;;  %v964_v10 = vadd.f32 %v3678_v29, %v5006_v6  ;;  %v6833_v29 = vld [vmem:[#allocation7_spill] sm:$0xff] }
 0x1c4   :  { %v1537_v24 = vmul.f32 %v5559_v5, %v1489_v42  ;;  %2078 = vmatmul.mubr.bf16.gmra.mrb[52].mxu1 %v1686_v34  ;;  %v967_v12 = vadd.f32 %v3681_v26, %v5006_v6  ;;  %v1594_v63 = vmul.f32 %v5119_v39, %v5605_v7  ;;  %v1597_v61 = vmul.f32 %v5119_v39, %v5624_v57 }
 0x1c5   :  { %v1307_v0 = vmul.f32 0.7978846, %v1259_v37  ;;  %v1310_v44 = vmul.f32 0.7978846, %v1262_v60  ;;  %v5692_v54 = vadd.f32 %v5029_v23, %v964_v10  ;;  %v1593_v11 = vmul.f32 %v5104_v8, %v5596_v1 }
 0x1c6   :  { %v5697_v59 = vadd.f32 %v5033_v27, %v967_v12  ;;  %v1660_v5 = vadd.f32 %v5126_v3, %v1594_v63  ;;  %v1663_v22 = vadd.f32 %v5126_v3, %v1597_v61  ;;  %v1596_v7 = vmul.f32 %v5104_v8, %v5618_v41  ;;  %v6834_v12 = vld [vmem:[#allocation8_spill] sm:$0xff] }
 0x1c7   :  { %4270 = vtanh.f32 %v1307_v0  ;;  %v1121_v57 = vmul.f32 %v5692_v54, %v5692_v54  ;;  %v1659_v23 = vadd.f32 %v5107_v9, %v1593_v11  ;;  %v3684_v38 = vadd.f32 %v5593_v32, %v5588_v31 }
 0x1c8   :  { %4272 = vtanh.f32 %v1310_v44  ;;  %v1124_v27 = vmul.f32 %v5697_v59, %v5697_v59  ;;  %v1690_v1 = vpack.c.bf16 %v1663_v22, %v1660_v5  ;;  %v1662_v50 = vadd.f32 %v5107_v9, %v1596_v7  ;;  %v6835_v22 = vld [vmem:[#allocation10_spill] sm:$0xff]  ;;  %v6836_v7 = vld [vmem:[#allocation12_spill] sm:$0xff] }
 0x1c9   :  { %v4267_v14 = vpop.eup %4266  ;;  %v1169_v4 = vmul.f32 %v1121_v57, %v5692_v54  ;;  %v972_v41 = vadd.f32 %v3684_v38, %v5006_v6  ;;  %v3687_v55 = vadd.f32 %v5602_v58, %v5598_v47  ;;  %v1600_v51 = vmul.f32 %v5119_v39, %v1534_v13  ;;  %v6832_v13 = vld [vmem:[#allocation4_spill] sm:$0xff] }
 0x1ca   :  { %v1397_v46 = vadd.f32 1.0, %v4267_v14  ;;  %v1172_v31 = vmul.f32 %v1124_v27, %v5697_v59  ;;  %2087 = vmatprep.mubr.bf16.mxu1 %v1690_v1  ;;  %v1689_v32 = vpack.c.bf16 %v1662_v50, %v1659_v23  ;;  %v1603_v52 = vmul.f32 %v5119_v39, %v1537_v24  ;;  %v6837_v23 = vld [vmem:[#allocation9_spill] sm:$0xff] }
 0x1cb   :  { %v1217_v2 = vmul.f32 0.044715, %v1169_v4  ;;  %v5719_v20 = vadd.f32 %v6831_v49, %v972_v41  ;;  %v975_v17 = vadd.f32 %v3687_v55, %v5006_v6  ;;  %v1666_v15 = vadd.f32 %v5126_v3, %v1600_v51  ;;  %v6839_v51 = vld [vmem:[#allocation11_spill] sm:$0xff] }
 0x1cc   :  { %v4269_v25 = vpop.eup %4268  ;;  %v1445_v33 = vmul.f32 0.5, %v1397_v46  ;;  %v1220_v47 = vmul.f32 0.044715, %v1172_v31  ;;  %2088 = vmatmul.mubr.bf16.gmra.mrb[56].mxu1 %v1689_v32  ;;  %v1669_v58 = vadd.f32 %v5126_v3, %v1603_v52  ;;  %v1599_v36 = vmul.f32 %v5104_v8, %v5669_v53 }
 0x1cd   :  { %v1400_v28 = vadd.f32 1.0, %v4269_v25  ;;  %v1265_v39 = vadd.f32 %v1217_v2, %v5692_v54  ;;  %v1127_v56 = vmul.f32 %v5719_v20, %v5719_v20  ;;  %v5730_v30 = vadd.f32 %v6832_v13, %v975_v17 }
 0x1ce   :  { %v1493_v6 = vmul.f32 %v1445_v33, %v5611_v18  ;;  %v1268_v62 = vadd.f32 %v1220_v47, %v5697_v59  ;;  %v1693_v35 = vpack.c.bf16 %v1669_v58, %v1666_v15  ;;  %v1602_v16 = vmul.f32 %v5104_v8, %v1536_v19  ;;  %v6840_v15 = vld [vmem:[#allocation14_spill] sm:$0xff]  ;;  %v6842_v58 = vld [vmem:[#allocation13_spill] sm:$0xff] }
 0x1cf   :  { %v1448_v3 = vmul.f32 0.5, %v1400_v28  ;;  %v1313_v21 = vmul.f32 0.7978846, %v1265_v39  ;;  %v1175_v53 = vmul.f32 %v1127_v56, %v5719_v20  ;;  %v1130_v40 = vmul.f32 %v5730_v30, %v5730_v30  ;;  %v6843_v28 = vld [vmem:[#allocation15_spill] sm:$0xff] }
 0x1d0   :  { %v1559_v42 = vmul.f32 %v6833_v29, %v1493_v6  ;;  %v1316_v34 = vmul.f32 0.7978846, %v1268_v62  ;;  %2097 = vmatprep.mubr.bf16.mxu1 %v1693_v35  ;;  %v1665_v26 = vadd.f32 %v5107_v9, %v1599_v36  ;;  %v1668_v18 = vadd.f32 %v5107_v9, %v1602_v16 }
 0x1d1   :  { %v4271_v37 = vpop.eup %4270  ;;  %v1496_v60 = vmul.f32 %v1448_v3, %v5630_v48  ;;  %4274 = vtanh.f32 %v1313_v21  ;;  %v1223_v8 = vmul.f32 0.044715, %v1175_v53  ;;  %v1178_v19 = vmul.f32 %v1130_v40, %v5730_v30 }
 0x1d2   :  { %v4273_v10 = vpop.eup %4272  ;;  %4276 = vtanh.f32 %v1316_v34  ;;  %v1692_v24 = vpack.c.bf16 %v1668_v18, %v1665_v26  ;;  %v1625_v63 = vadd.f32 %v6834_v12, %v1559_v42  ;;  %v1403_v61 = vadd.f32 1.0, %v4271_v37 }
 0x1d3   :  { %v1562_v0 = vmul.f32 %v6833_v29, %v1496_v60  ;;  %v1271_v44 = vadd.f32 %v1223_v8, %v5719_v20  ;;  %v1226_v11 = vmul.f32 0.044715, %v1178_v19  ;;  %v1406_v5 = vadd.f32 1.0, %v4273_v10 }
 0x1d4   :  { %2098 = vmatmul.mubr.bf16.gmra.mrb[60].mxu1 %v1692_v24  ;;  %v1451_v9 = vmul.f32 0.5, %v1403_v61  ;;  %v5748_v48 = vadd.f32 %v6834_v12, %v6835_v22  ;;  %v5752_v57 = vadd.f32 %v6834_v12, %v6836_v7  ;;  %v1592_v38 = vmul.f32 %v6833_v29, %v6837_v23 }
 0x1d5   :  { %v1319_v27 = vmul.f32 0.7978846, %v1271_v44  ;;  %v1274_v1 = vadd.f32 %v1226_v11, %v5730_v30  ;;  %v6838_v50 = vmov 0   ;;  %v1628_v14 = vadd.f32 %v6834_v12, %v1562_v0 }
 0x1d6   :  { %2140 = vmatprep.mubr.bf16.mxu1 %v6838_v50  ;;  %v1454_v4 = vmul.f32 0.5, %v1406_v5  ;;  %v1499_v41 = vmul.f32 %v1451_v9, %v5655_v43  ;;  %v1685_v55 = vpack.c.bf16 %v5752_v57, %v5748_v48  ;;  %v1655_v46 = vadd.f32 %v6834_v12, %v6839_v51  ;;  %v6841_v43 = vld [vmem:[#allocation16_spill] sm:$0xff] }
 0x1d7   :  { %v1658_v31 = vadd.f32 %v6834_v12, %v1592_v38  ;;  %4278 = vtanh.f32 %v1319_v27  ;;  %v1322_v32 = vmul.f32 0.7978846, %v1274_v1  ;;  %v1673_v52 = vpack.c.bf16 %v1628_v14, %v1625_v63 }
 0x1d8   :  { %v1502_v2 = vmul.f32 %v1454_v4, %v5658_v45  ;;  %v1565_v49 = vmul.f32 %v6833_v29, %v1499_v41  ;;  %v1595_v25 = vmul.f32 %v6833_v29, %v6840_v15  ;;  %v1598_v33 = vmul.f32 %v6833_v29, %v6841_v43 }
 0x1d9   :  { %v1688_v17 = vpack.c.bf16 %v1658_v31, %v1655_v46  ;;  %4280 = vtanh.f32 %v1322_v32  ;;  %v1601_v36 = vmul.f32 %v6833_v29, %v6842_v58  ;;  %v1604_v39 = vmul.f32 %v6833_v29, %v6843_v28 }
 0x1da   :  { %v1568_v47 = vmul.f32 %v6833_v29, %v1502_v2  ;;  %v1631_v45 = vadd.f32 %v6834_v12, %v1565_v49  ;;  %v1661_v56 = vadd.f32 %v6834_v12, %v1595_v25  ;;  %v1664_v13 = vadd.f32 %v6834_v12, %v1598_v33 }
 0x1db   :  { %v4275_v6 = vpop.eup %4274  ;;  %v1667_v35 = vadd.f32 %v6834_v12, %v1601_v36  ;;  %v1670_v16 = vadd.f32 %v6834_v12, %v1604_v39 }
 0x1dc   :  { %v1634_v62 = vadd.f32 %v6834_v12, %v1568_v47  ;;  %v4277_v3 = vpop.eup %4276  ;;  %2141 = vmatmul.mubr.bf16.vlgmr.msra.gmra.mrb[32].mxu1 %v1673_v52  ;;  %v1409_v21 = vadd.f32 1.0, %v4275_v6  ;;  %v1691_v53 = vpack.c.bf16 %v1664_v13, %v1661_v56 }
 0x1dd   :  { %2150 = vmatprep.mubr.bf16.mxu1 %v6838_v50  ;;  %v1412_v42 = vadd.f32 1.0, %v4277_v3  ;;  %v1694_v34 = vpack.c.bf16 %v1670_v16, %v1667_v35 }
 0x1de   :  { %v1676_v40 = vpack.c.bf16 %v1634_v62, %v1631_v45  ;;  %v1457_v26 = vmul.f32 0.5, %v1409_v21 }
 0x1df   :  { %v1460_v18 = vmul.f32 0.5, %v1412_v42 }
 0x1e0   :  { %v1505_v37 = vmul.f32 %v1457_v26, %v5692_v54 }
 0x1e1   :  { %v4279_v60 = vpop.eup %4278  ;;  %v1508_v8 = vmul.f32 %v1460_v18, %v5697_v59 }
 0x1e2   :  { %v1571_v19 = vmul.f32 %v6833_v29, %v1505_v37  ;;  %v1415_v10 = vadd.f32 1.0, %v4279_v60 }
 0x1e3   :  { %v4281_v24 = vpop.eup %4280  ;;  %v1574_v63 = vmul.f32 %v6833_v29, %v1508_v8 }
 0x1e4   :  { %2151 = vmatmul.mubr.bf16.gmra.mrb[36].mxu1 %v1676_v40  ;;  %v1637_v61 = vadd.f32 %v6834_v12, %v1571_v19  ;;  %v1418_v0 = vadd.f32 1.0, %v4281_v24  ;;  %v1463_v44 = vmul.f32 0.5, %v1415_v10  ;;  %v3629_v19 = vld [vmem:[%s6799_s4 + $0x1] ss:$4 sm:$0x3] }
 0x1e5   :  { %2160 = vmatprep.mubr.bf16.mxu1 %v6838_v50  ;;  %v1640_v11 = vadd.f32 %v6834_v12, %v1574_v63 }
 0x1e6   :  { %v1466_v5 = vmul.f32 0.5, %v1418_v0  ;;  %v1511_v54 = vmul.f32 %v1463_v44, %v5719_v20  ;;  %v1743_v20 = vld [vmem:[%s6799_s4] ss:$4 sm:$0x3] }
 0x1e7   :  { %v1679_v9 = vpack.c.bf16 %v1640_v11, %v1637_v61 }
 0x1e8   :  { %v1514_v59 = vmul.f32 %v1466_v5, %v5730_v30  ;;  %v1577_v22 = vmul.f32 %v6833_v29, %v1511_v54  ;;  %v6844_v30 = vld [vmem:[#allocation5_spill] sm:$0xff] }
 0x1ea   :  { %v1580_v48 = vmul.f32 %v6833_v29, %v1514_v59  ;;  %v1643_v7 = vadd.f32 %v6834_v12, %v1577_v22  ;;  %v5805_v29 = vrot.slane %v1743_v20, %v6844_v30 }
 0x1ec   :  { %2161 = vmatmul.mubr.bf16.gmra.mrb[40].mxu1 %v1679_v9  ;;  %v1646_v57 = vadd.f32 %v6834_v12, %v1580_v48  ;;  %v6845_v12 = vld [vmem:[#allocation6_spill] sm:$0xff] }
 0x1ed   :  { %2170 = vmatprep.mubr.bf16.mxu1 %v6838_v50  ;;  %v5808_v38 = vrot.slane %v1743_v20, %v6845_v12  ;;  %v5870_v9 = vrot.slane %v3629_v19, %v6845_v12 }
 0x1ee   :  { %v1682_v23 = vpack.c.bf16 %v1646_v57, %v1643_v7 }
 0x1f4   :  { %2171 = vmatmul.mubr.bf16.gmra.mrb[44].mxu1 %v1682_v23 }
 0x1f5   :  { %2180 = vmatprep.mubr.bf16.mxu1 %v6838_v50 }
 0x1fc   :  { %2181 = vmatmul.mubr.bf16.gmra.mrb[48].mxu1 %v1685_v55 }
 0x1fd   :  { %2190 = vmatprep.mubr.bf16.mxu1 %v6838_v50 }
 0x204   :  { %2191 = vmatmul.mubr.bf16.gmra.mrb[52].mxu1 %v1688_v17 }
 0x205   :  { %2200 = vmatprep.mubr.bf16.mxu1 %v6838_v50 }
 0x20c   :  { %2201 = vmatmul.mubr.bf16.gmra.mrb[56].mxu1 %v1691_v53 }
 0x20d   :  { %2210 = vmatprep.mubr.bf16.mxu1 %v6838_v50 }
 0x214   :  { %2211 = vmatmul.mubr.bf16.gmra.mrb[60].mxu1 %v1694_v34 }
 0x2af   :  { %v2142_v27 = vpop.f32.mrb[32].mxu1 }
 0x2b0   :  { %v5811_v1 = vadd.f32 %v2142_v27, %v5805_v29  ;;  %v2144_v14 = vpop.f32.mrb[33].mxu1 }
 0x2b1   :  { %v5814_v4 = vadd.f32 %v2144_v14, %v5808_v38  ;;  %v2146_v50 = vpop.f32.mrb[34].mxu1 }
 0x2b2   :  { %v2221_v41 = vmul.f32 %v5811_v1, %v5811_v1  ;;  %v5819_v55 = vadd.f32 %v2146_v50, %v5805_v29  ;;  %v2148_v51 = vpop.f32.mrb[35].mxu1 }
 0x2b3   :  { %v2222_v46 = vmul.f32 %v5814_v4, %v5814_v4  ;;  %v5824_v31 = vadd.f32 %v2148_v51, %v5808_v38 }
 0x2b4   :  { %v2253_v32 = vmul.f32 %v5811_v1, %v2221_v41  ;;  %v2223_v52 = vmul.f32 %v5819_v55, %v5819_v55 }
 0x2b5   :  { %v2254_v2 = vmul.f32 %v5814_v4, %v2222_v46  ;;  %v2224_v49 = vmul.f32 %v5824_v31, %v5824_v31 }
 0x2b6   :  { %v2285_v17 = vmul.f32 0.044715, %v2253_v32  ;;  %v2255_v15 = vmul.f32 %v5819_v55, %v2223_v52 }
 0x2b7   :  { %v2286_v25 = vmul.f32 0.044715, %v2254_v2  ;;  %v2256_v43 = vmul.f32 %v5824_v31, %v2224_v49  ;;  %v2152_v33 = vpop.f32.mrb[36].mxu1  ;;  %v3630_v49 = vld [vmem:[%s6799_s4 + $0x2] ss:$4 sm:$0x3] }
 0x2b8   :  { %v2317_v47 = vadd.f32 %v5811_v1, %v2285_v17  ;;  %v2287_v58 = vmul.f32 0.044715, %v2255_v15  ;;  %v5836_v36 = vadd.f32 %v2152_v33, %v5805_v29  ;;  %v2154_v28 = vpop.f32.mrb[37].mxu1 }
 0x2b9   :  { %v2318_v39 = vadd.f32 %v5814_v4, %v2286_v25  ;;  %v2288_v45 = vmul.f32 0.044715, %v2256_v43  ;;  %v5840_v56 = vadd.f32 %v2154_v28, %v5808_v38  ;;  %v2156_v13 = vpop.f32.mrb[38].mxu1 }
 0x2ba   :  { %v2349_v6 = vmul.f32 0.7978846, %v2317_v47  ;;  %v2319_v62 = vadd.f32 %v5819_v55, %v2287_v58  ;;  %v2225_v35 = vmul.f32 %v5836_v36, %v5836_v36  ;;  %v5846_v16 = vadd.f32 %v2156_v13, %v5805_v29  ;;  %v2158_v3 = vpop.f32.mrb[39].mxu1 }
 0x2bb   :  { %v2350_v21 = vmul.f32 0.7978846, %v2318_v39  ;;  %v2320_v53 = vadd.f32 %v5824_v31, %v2288_v45  ;;  %v2226_v40 = vmul.f32 %v5840_v56, %v5840_v56  ;;  %v5852_v42 = vadd.f32 %v2158_v3, %v5808_v38 }
 0x2bc   :  { %4282 = vtanh.f32 %v2349_v6  ;;  %v2351_v34 = vmul.f32 0.7978846, %v2319_v62  ;;  %v2257_v26 = vmul.f32 %v5836_v36, %v2225_v35  ;;  %v2227_v18 = vmul.f32 %v5846_v16, %v5846_v16 }
 0x2bd   :  { %4284 = vtanh.f32 %v2350_v21  ;;  %v2352_v37 = vmul.f32 0.7978846, %v2320_v53  ;;  %v2258_v60 = vmul.f32 %v5840_v56, %v2226_v40  ;;  %v2228_v8 = vmul.f32 %v5852_v42, %v5852_v42 }
 0x2be   :  { %4286 = vtanh.f32 %v2351_v34  ;;  %v2289_v10 = vmul.f32 0.044715, %v2257_v26  ;;  %v2259_v24 = vmul.f32 %v5846_v16, %v2227_v18  ;;  %v5899_v58 = vrot.slane %v3629_v19, %v6844_v30 }
 0x2bf   :  { %4288 = vtanh.f32 %v2352_v37  ;;  %v2290_v63 = vmul.f32 0.044715, %v2258_v60  ;;  %v2260_v61 = vmul.f32 %v5852_v42, %v2228_v8  ;;  %v2162_v0 = vpop.f32.mrb[40].mxu1  ;;  %v5903_v6 = vrot.slane %v3630_v49, %v6844_v30 }
 0x2c0   :  { %v2321_v44 = vadd.f32 %v5836_v36, %v2289_v10  ;;  %v2291_v11 = vmul.f32 0.044715, %v2259_v24  ;;  %v5867_v5 = vadd.f32 %v2162_v0, %v5805_v29  ;;  %v2164_v54 = vpop.f32.mrb[41].mxu1  ;;  %v5914_v30 = vrot.slane %v3630_v49, %v6845_v12 }
 0x2c1   :  { %v2322_v59 = vadd.f32 %v5840_v56, %v2290_v63  ;;  %v2292_v22 = vmul.f32 0.044715, %v2260_v61  ;;  %v5874_v48 = vadd.f32 %v2164_v54, %v5808_v38  ;;  %v2166_v7 = vpop.f32.mrb[42].mxu1 }
 0x2c2   :  { %v2353_v57 = vmul.f32 0.7978846, %v2321_v44  ;;  %v2323_v23 = vadd.f32 %v5846_v16, %v2291_v11  ;;  %v2229_v20 = vmul.f32 %v5867_v5, %v5867_v5  ;;  %v5880_v27 = vadd.f32 %v2166_v7, %v5805_v29  ;;  %v2168_v14 = vpop.f32.mrb[43].mxu1 }
 0x2c3   :  { %v2354_v50 = vmul.f32 0.7978846, %v2322_v59  ;;  %v2324_v41 = vadd.f32 %v5852_v42, %v2292_v22  ;;  %v2230_v51 = vmul.f32 %v5874_v48, %v5874_v48  ;;  %v5886_v46 = vadd.f32 %v2168_v14, %v5808_v38 }
 0x2c4   :  { %4290 = vtanh.f32 %v2353_v57  ;;  %v2355_v32 = vmul.f32 0.7978846, %v2323_v23  ;;  %v2261_v52 = vmul.f32 %v5867_v5, %v2229_v20  ;;  %v2231_v2 = vmul.f32 %v5880_v27, %v5880_v27 }
 0x2c5   :  { %4292 = vtanh.f32 %v2354_v50  ;;  %v2356_v17 = vmul.f32 0.7978846, %v2324_v41  ;;  %v2262_v15 = vmul.f32 %v5874_v48, %v2230_v51  ;;  %v2232_v25 = vmul.f32 %v5886_v46, %v5886_v46 }
 0x2c6   :  { %v4283_v43 = vpop.eup %4282  ;;  %4294 = vtanh.f32 %v2355_v32  ;;  %v2293_v33 = vmul.f32 0.044715, %v2261_v52  ;;  %v2263_v47 = vmul.f32 %v5880_v27, %v2231_v2 }
 0x2c7   :  { %v4285_v28 = vpop.eup %4284  ;;  %4296 = vtanh.f32 %v2356_v17  ;;  %v2294_v39 = vmul.f32 0.044715, %v2262_v15  ;;  %v2264_v45 = vmul.f32 %v5886_v46, %v2232_v25  ;;  %v2172_v13 = vpop.f32.mrb[44].mxu1  ;;  %v2413_v59 = vadd.f32 1.0, %v4283_v43 }
 0x2c8   :  { %v4287_v62 = vpop.eup %4286  ;;  %v2414_v35 = vadd.f32 1.0, %v4285_v28  ;;  %v2325_v3 = vadd.f32 %v5867_v5, %v2293_v33  ;;  %v2295_v21 = vmul.f32 0.044715, %v2263_v47  ;;  %v5907_v53 = vadd.f32 %v2172_v13, %v5805_v29  ;;  %v2174_v40 = vpop.f32.mrb[45].mxu1 }
 0x2c9   :  { %v4289_v34 = vpop.eup %4288  ;;  %v2326_v26 = vadd.f32 %v5874_v48, %v2294_v39  ;;  %v2296_v18 = vmul.f32 0.044715, %v2264_v45  ;;  %v5911_v37 = vadd.f32 %v2174_v40, %v5808_v38  ;;  %v2176_v60 = vpop.f32.mrb[46].mxu1  ;;  %v5925_v22 = vadd.f32 1.0, %v4287_v62 }
 0x2ca   :  { %v2446_v8 = vmul.f32 0.5, %v2414_v35  ;;  %v2416_v19 = vadd.f32 1.0, %v4289_v34  ;;  %v2357_v10 = vmul.f32 0.7978846, %v2325_v3  ;;  %v2327_v24 = vadd.f32 %v5880_v27, %v2295_v21  ;;  %v2178_v63 = vpop.f32.mrb[47].mxu1 }
 0x2cb   :  { %v2358_v61 = vmul.f32 0.7978846, %v2326_v26  ;;  %v2328_v0 = vadd.f32 %v5886_v46, %v2296_v18  ;;  %v2233_v44 = vmul.f32 %v5907_v53, %v5907_v53  ;;  %v2234_v11 = vmul.f32 %v5911_v37, %v5911_v37 }
 0x2cc   :  { %v5923_v54 = vmul.f32 %v5814_v4, %v2446_v8  ;;  %v2448_v12 = vmul.f32 0.5, %v2416_v19  ;;  %v2359_v14 = vmul.f32 0.7978846, %v2327_v24  ;;  %v5930_v50 = vadd.f32 %v2176_v60, %v5805_v29 }
 0x2cd   :  { %4298 = vtanh.f32 %v2358_v61  ;;  %v2360_v7 = vmul.f32 0.7978846, %v2328_v0  ;;  %v2265_v57 = vmul.f32 %v5907_v53, %v2233_v44  ;;  %v2266_v23 = vmul.f32 %v5911_v37, %v2234_v11 }
 0x2ce   :  { %v4291_v20 = vpop.eup %4290  ;;  %4300 = vtanh.f32 %v2357_v10  ;;  %v5933_v41 = vadd.f32 %v2178_v63, %v5808_v38  ;;  %v2235_v15 = vmul.f32 %v5930_v50, %v5930_v50  ;;  %v5947_v26 = vmul.f32 %v5824_v31, %v2448_v12 }
 0x2cf   :  { %v4293_v4 = vpop.eup %4292  ;;  %v2417_v51 = vadd.f32 1.0, %v4291_v20  ;;  %4302 = vtanh.f32 %v2360_v7  ;;  %v2297_v32 = vmul.f32 0.044715, %v2265_v57  ;;  %v2298_v52 = vmul.f32 0.044715, %v2266_v23  ;;  %v2182_v2 = vpop.f32.mrb[48].mxu1 }
 0x2d0   :  { %v4295_v49 = vpop.eup %4294  ;;  %v2418_v17 = vadd.f32 1.0, %v4293_v4  ;;  %v2236_v25 = vmul.f32 %v5933_v41, %v5933_v41  ;;  %v5940_v43 = vadd.f32 %v2182_v2, %v5805_v29  ;;  %v2184_v33 = vpop.f32.mrb[49].mxu1  ;;  %v2267_v21 = vmul.f32 %v5930_v50, %v2235_v15 }
 0x2d1   :  { %v4297_v47 = vpop.eup %4296  ;;  %v2449_v28 = vmul.f32 0.5, %v2417_v51  ;;  %v2419_v39 = vadd.f32 1.0, %v4295_v49  ;;  %v2329_v45 = vadd.f32 %v5907_v53, %v2297_v32  ;;  %v2330_v13 = vadd.f32 %v5911_v37, %v2298_v52  ;;  %v2186_v62 = vpop.f32.mrb[50].mxu1 }
 0x2d2   :  { %v2450_v35 = vmul.f32 0.5, %v2418_v17  ;;  %v2420_v3 = vadd.f32 1.0, %v4297_v47  ;;  %v2268_v40 = vmul.f32 %v5933_v41, %v2236_v25  ;;  %v2188_v34 = vpop.f32.mrb[51].mxu1  ;;  %4304 = vtanh.f32 %v2359_v14 }
 0x2d3   :  { %v2361_v18 = vmul.f32 0.7978846, %v2329_v45  ;;  %v2362_v60 = vmul.f32 0.7978846, %v2330_v13  ;;  %v5950_v8 = vmul.f32 %v5836_v36, %v2449_v28  ;;  %v2451_v19 = vmul.f32 0.5, %v2419_v39 }
 0x2d4   :  { %v2299_v10 = vmul.f32 0.044715, %v2267_v21  ;;  %v2300_v24 = vmul.f32 0.044715, %v2268_v40  ;;  %v5953_v63 = vmul.f32 %v5840_v56, %v2450_v35  ;;  %v2237_v61 = vmul.f32 %v5940_v43, %v5940_v43 }
 0x2d5   :  { %4306 = vtanh.f32 %v2361_v18  ;;  %v5958_v0 = vadd.f32 %v2184_v33, %v5808_v38  ;;  %v2452_v31 = vmul.f32 0.5, %v2420_v3  ;;  %v5966_v7 = vadd.f32 %v2186_v62, %v5805_v29 }
 0x2d6   :  { %4308 = vtanh.f32 %v2362_v60  ;;  %v2331_v44 = vadd.f32 %v5930_v50, %v2299_v10  ;;  %v2332_v36 = vadd.f32 %v5933_v41, %v2300_v24  ;;  %v2269_v12 = vmul.f32 %v5940_v43, %v2237_v61 }
 0x2d7   :  { %v4299_v11 = vpop.eup %4298  ;;  %v2238_v56 = vmul.f32 %v5958_v0, %v5958_v0  ;;  %v5969_v57 = vadd.f32 %v2188_v34, %v5808_v38  ;;  %v2192_v23 = vpop.f32.mrb[52].mxu1  ;;  %v2445_v32 = vmul.f32 0.5, %v2413_v59  ;;  %v2239_v17 = vmul.f32 %v5966_v7, %v5966_v7 }
 0x2d8   :  { %v5971_v20 = vpop.eup %4300  ;;  %v2422_v14 = vadd.f32 1.0, %v4299_v11  ;;  %v2363_v4 = vmul.f32 0.7978846, %v2331_v44  ;;  %v2364_v51 = vmul.f32 0.7978846, %v2332_v36  ;;  %v2194_v25 = vpop.f32.mrb[53].mxu1  ;;  %v5979_v33 = vmul.f32 %v5846_v16, %v2451_v19 }
 0x2d9   :  { %v4303_v52 = vpop.eup %4302  ;;  %v2301_v2 = vmul.f32 0.044715, %v2269_v12  ;;  %v2270_v49 = vmul.f32 %v5958_v0, %v2238_v56  ;;  %v2240_v15 = vmul.f32 %v5969_v57, %v5969_v57  ;;  %v2447_v28 = vmul.f32 0.5, %v5925_v22  ;;  %v2196_v39 = vpop.f32.mrb[54].mxu1  ;;  %v4183_v44 = vld [vmem:[%s6800_s5 + $0x8] sm:$0xff]  }
 0x2da   :  { %v2424_v47 = vadd.f32 1.0, %v4303_v52  ;;  %4310 = vtanh.f32 %v2363_v4  ;;  %v2271_v13 = vmul.f32 %v5966_v7, %v2239_v17  ;;  %v2198_v62 = vpop.f32.mrb[55].mxu1  ;;  %v2454_v35 = vmul.f32 0.5, %v2422_v14 }
 0x2db   :  { %4312 = vtanh.f32 %v2364_v51  ;;  %v2333_v59 = vadd.f32 %v5940_v43, %v2301_v2  ;;  %v2302_v45 = vmul.f32 0.044715, %v2270_v49  ;;  %v2272_v21 = vmul.f32 %v5969_v57, %v2240_v15 }
 0x2dc   :  { %v2456_v3 = vmul.f32 0.5, %v2424_v47  ;;  %v2477_v40 = vmul.f32 %v5811_v1, %v2445_v32  ;;  %v5986_v16 = vpop.eup %4304  ;;  %v2303_v22 = vmul.f32 0.044715, %v2271_v13  ;;  %v2479_v60 = vmul.f32 %v5819_v55, %v2447_v28  ;;  %v4182_v1 = vld [vmem:[%s6800_s5] sm:$0xff]  }
 0x2dd   :  { %v2365_v34 = vmul.f32 0.7978846, %v2333_v59  ;;  %v2334_v18 = vadd.f32 %v5958_v0, %v2302_v45  ;;  %v5991_v19 = vmul.f32 %v5852_v42, %v2452_v31  ;;  %v2304_v10 = vmul.f32 0.044715, %v2272_v21  ;;  %3772 = vmatprep.subr.bf16.mxu0 %v4182_v1 }
 0x2de   :  { %v2522_v24 = vmul.f32 %v5899_v58, %v2477_v40  ;;  %v5995_v61 = vadd.f32 %v2192_v23, %v5805_v29  ;;  %v2335_v42 = vadd.f32 %v5966_v7, %v2303_v22  ;;  %v2524_v31 = vmul.f32 %v5899_v58, %v2479_v60  ;;  %3773 = vmatpush3.bf16.msra.mxu0 %v4182_v1 }
 0x2df   :  { %v4307_v36 = vpop.eup %4306  ;;  %4314 = vtanh.f32 %v2365_v34  ;;  %v2366_v55 = vmul.f32 0.7978846, %v2334_v18  ;;  %v6005_v11 = vpop.f32.mrb[56].mxu1  ;;  %v2336_v23 = vadd.f32 %v5969_v57, %v2304_v10  ;;  %v6021_v17 = vmul.f32 %v5874_v48, %v2454_v35  ;;  %3774 = vmatprep.subr.bf16.mxu0 %v4183_v44 }
 0x2e0   :  { %v4309_v12 = vpop.eup %4308  ;;  %v2425_v56 = vadd.f32 1.0, %v4307_v36  ;;  %v6009_v14 = vadd.f32 %v5903_v6, %v2522_v24  ;;  %v2241_v4 = vmul.f32 %v5995_v61, %v5995_v61  ;;  %v6013_v51 = vpop.f32.mrb[57].mxu1  ;;  %v2367_v52 = vmul.f32 0.7978846, %v2335_v42  ;;  %v4185_v36 = vld [vmem:[%s6800_s5 + $0x18] sm:$0xff]  }
 0x2e1   :  { %v2426_v32 = vadd.f32 1.0, %v4309_v12  ;;  %4316 = vtanh.f32 %v2366_v55  ;;  %v6016_v2 = vadd.f32 %v5903_v6, %v2524_v31  ;;  %v6018_v49 = vpop.f32.mrb[58].mxu1  ;;  %v2368_v15 = vmul.f32 0.7978846, %v2336_v23 }
 0x2e2   :  { %v2273_v47 = vmul.f32 %v5995_v61, %v2241_v4  ;;  %v6025_v28 = vadd.f32 %v2194_v25, %v5808_v38  ;;  %v6027_v59 = vpop.f32.mrb[59].mxu1  ;;  %v2457_v45 = vmul.f32 0.5, %v2425_v56  ;;  %4318 = vtanh.f32 %v2367_v52  ;;  %3775 = vmatpush3.bf16.msra.mxu0 %v4183_v44 }
 0x2e3   :  { %v3942_v13 = vpack.i.bf16 %v6016_v2, %v6009_v14  ;;  %v6032_v21 = vadd.f32 %v2196_v39, %v5805_v29  ;;  %v2458_v48 = vmul.f32 0.5, %v2426_v32  ;;  %4320 = vtanh.f32 %v2368_v15 }
 0x2e4   :  { %v4311_v40 = vpop.eup %4310  ;;  %v2305_v35 = vmul.f32 0.044715, %v2273_v47  ;;  %v2242_v34 = vmul.f32 %v6025_v28, %v6025_v28  ;;  %v6037_v18 = vmul.f32 %v5886_v46, %v2456_v3  ;;  %v6043_v39 = vadd.f32 %v2198_v62, %v5808_v38  ;;  %v4184_v3 = vld [vmem:[%s6800_s5 + $0x10] sm:$0xff]  }
 0x2e5   :  { %v4313_v25 = vpop.eup %4312  ;;  %v2427_v22 = vadd.f32 1.0, %v4311_v40  ;;  %3943 = vrot.lane.b32.xlu0 %v3942_v13, %s4411_s10  ;;  %v2243_v60 = vmul.f32 %v6032_v21, %v6032_v21  ;;  %v2526_v46 = vmul.f32 %v5899_v58, %v5950_v8  ;;  %v6056_v62 = vmul.f32 %v5907_v53, %v2457_v45  ;;  %3776 = vmatprep.subr.bf16.mxu0 %v4184_v3 }
 0x2e6   :  { %v2428_v10 = vadd.f32 1.0, %v4313_v25  ;;  %v2337_v24 = vadd.f32 %v5995_v61, %v2305_v35  ;;  %v2274_v1 = vmul.f32 %v6025_v28, %v2242_v34  ;;  %v2244_v55 = vmul.f32 %v6043_v39, %v6043_v39  ;;  %3777 = vmatpush3.bf16.msra.mxu0 %v4184_v3 }
 0x2e7   :  { %v2275_v44 = vmul.f32 %v6032_v21, %v2243_v60  ;;  %v2528_v42 = vmul.f32 %v5899_v58, %v5979_v33  ;;  %v6063_v8 = vpop.f32.mrb[60].mxu1  ;;  %v6066_v31 = vmul.f32 %v5911_v37, %v2458_v48  ;;  %v2459_v12 = vmul.f32 0.5, %v2427_v22  ;;  %3778 = vmatprep.subr.bf16.mxu0 %v4185_v36 }
 0x2e8   :  { %v2369_v56 = vmul.f32 0.7978846, %v2337_v24  ;;  %v2306_v23 = vmul.f32 0.044715, %v2274_v1  ;;  %v6068_v4 = vpop.f32.mrb[61].mxu1  ;;  %v2276_v52 = vmul.f32 %v6043_v39, %v2244_v55  ;;  %v6072_v15 = vadd.f32 %v5903_v6, %v2526_v46 }
 0x2e9   :  { %v4315_v53 = vpop.eup %4314  ;;  %v2307_v32 = vmul.f32 0.044715, %v2275_v44  ;;  %v6075_v33 = vadd.f32 %v5903_v6, %v2528_v42  ;;  %v6077_v47 = vpop.f32.mrb[62].mxu1  ;;  %v2460_v37 = vmul.f32 0.5, %v2428_v10  ;;  %v6087_v22 = vadd.f32 %v6005_v11, %v5805_v29 }
 0x2ea   :  { %v2429_v45 = vadd.f32 1.0, %v4315_v53  ;;  %4322 = vtanh.f32 %v2369_v56  ;;  %v2338_v13 = vadd.f32 %v6025_v28, %v2306_v23  ;;  %v6080_v40 = vpop.f32.mrb[63].mxu1  ;;  %v2308_v34 = vmul.f32 0.044715, %v2276_v52  ;;  %3779 = vmatpush3.bf16.msra.mxu0 %v4185_v36 }
 0x2eb   :  { %v4317_v48 = vpop.eup %4316  ;;  %v2339_v35 = vadd.f32 %v6032_v21, %v2307_v32  ;;  %v3947_v25 = vpack.i.bf16 %v6075_v33, %v6072_v15  ;;  %v6091_v1 = vadd.f32 %v6013_v51, %v5808_v38  ;;  %v2245_v55 = vmul.f32 %v6087_v22, %v6087_v22 }
 0x2ec   :  { %v2461_v60 = vmul.f32 0.5, %v2429_v45  ;;  %v2430_v10 = vadd.f32 1.0, %v4317_v48  ;;  %v2370_v24 = vmul.f32 0.7978846, %v2338_v13  ;;  %v4319_v46 = vpop.eup %4318  ;;  %v2340_v44 = vadd.f32 %v6043_v39, %v2308_v34 }
 0x2ed   :  { %v2371_v3 = vmul.f32 0.7978846, %v2339_v35  ;;  %3948 = vrot.lane.b32.xlu0 %v3947_v25, %s4411_s10  ;;  %v6099_v11 = vadd.f32 %v6018_v49, %v5805_v29  ;;  %v4321_v42 = vpop.eup %4320  ;;  %v6102_v56 = vmul.f32 %v5930_v50, %v2459_v12  ;;  %v2431_v23 = vadd.f32 1.0, %v4319_v46 }
 0x2ee   :  { %v2462_v51 = vmul.f32 0.5, %v2430_v10  ;;  %4324 = vtanh.f32 %v2370_v24  ;;  %v2432_v53 = vadd.f32 1.0, %v4321_v42  ;;  %v2372_v32 = vmul.f32 0.7978846, %v2340_v44 }
 0x2ef   :  { %4326 = vtanh.f32 %v2371_v3  ;;  %v2277_v52 = vmul.f32 %v6087_v22, %v2245_v55  ;;  %v6106_v45 = vmul.f32 %v5933_v41, %v2460_v37  ;;  %v6109_v13 = vmul.f32 %v5940_v43, %v2461_v60 }
 0x2f0   :  { %v2246_v49 = vmul.f32 %v6091_v1, %v6091_v1  ;;  %v2247_v50 = vmul.f32 %v6099_v11, %v6099_v11  ;;  %v6116_v36 = vmul.f32 %v5958_v0, %v2462_v51  ;;  %4328 = vtanh.f32 %v2372_v32 }
 0x2f1   :  { %v2309_v12 = vmul.f32 0.044715, %v2277_v52  ;;  %v6120_v48 = vadd.f32 %v6027_v59, %v5808_v38  ;;  %v2463_v41 = vmul.f32 0.5, %v2431_v23  ;;  %v2421_v35 = vadd.f32 1.0, %v5971_v20 }
 0x2f2   :  { %v2278_v37 = vmul.f32 %v6091_v1, %v2246_v49  ;;  %v2279_v43 = vmul.f32 %v6099_v11, %v2247_v50  ;;  %v2464_v34 = vmul.f32 0.5, %v2432_v53  ;;  %v2423_v60 = vadd.f32 1.0, %v5986_v16 }
 0x2f3   :  { %v2341_v25 = vadd.f32 %v6087_v22, %v2309_v12  ;;  %v2248_v0 = vmul.f32 %v6120_v48, %v6120_v48  ;;  %v2453_v59 = vmul.f32 0.5, %v2421_v35  ;;  %v6131_v3 = vadd.f32 %v6063_v8, %v5805_v29 }
 0x2f4   :  { %v4323_v10 = vpop.eup %4322  ;;  %v2310_v24 = vmul.f32 0.044715, %v2278_v37  ;;  %v2311_v46 = vmul.f32 0.044715, %v2279_v43  ;;  %v2455_v42 = vmul.f32 0.5, %v2423_v60  ;;  %v2495_v32 = vmul.f32 %v5966_v7, %v2463_v41 }
 0x2f5   :  { %v2433_v44 = vadd.f32 1.0, %v4323_v10  ;;  %v2373_v55 = vmul.f32 0.7978846, %v2341_v25  ;;  %v2280_v20 = vmul.f32 %v6120_v48, %v2248_v0  ;;  %v2485_v53 = vmul.f32 %v5867_v5, %v2453_v59 }
 0x2f6   :  { %v2342_v51 = vadd.f32 %v6091_v1, %v2310_v24  ;;  %v2343_v23 = vadd.f32 %v6099_v11, %v2311_v46  ;;  %v2249_v16 = vmul.f32 %v6131_v3, %v6131_v3  ;;  %v2487_v8 = vmul.f32 %v5880_v27, %v2455_v42 }
 0x2f7   :  { %4330 = vtanh.f32 %v2373_v55  ;;  %v2312_v52 = vmul.f32 0.044715, %v2280_v20  ;;  %v2530_v37 = vmul.f32 %v5899_v58, %v2485_v53  ;;  %v2465_v25 = vmul.f32 0.5, %v2433_v44 }
 0x2f8   :  { %v4325_v49 = vpop.eup %4324  ;;  %v2374_v50 = vmul.f32 0.7978846, %v2342_v51  ;;  %v2375_v12 = vmul.f32 0.7978846, %v2343_v23  ;;  %v2281_v43 = vmul.f32 %v6131_v3, %v2249_v16  ;;  %v2532_v60 = vmul.f32 %v5899_v58, %v2487_v8 }
 0x2f9   :  { %v4327_v35 = vpop.eup %4326  ;;  %v2434_v0 = vadd.f32 1.0, %v4325_v49  ;;  %v2344_v5 = vadd.f32 %v6120_v48, %v2312_v52  ;;  %v6146_v7 = vadd.f32 %v5903_v6, %v2530_v37  ;;  %v6152_v44 = vmul.f32 %v5969_v57, %v2464_v34 }
 0x2fa   :  { %v2435_v10 = vadd.f32 1.0, %v4327_v35  ;;  %4332 = vtanh.f32 %v2374_v50  ;;  %v2313_v27 = vmul.f32 0.044715, %v2281_v43  ;;  %v4329_v41 = vpop.eup %4328  ;;  %v6149_v59 = vadd.f32 %v5903_v6, %v2532_v60 }
 0x2fb   :  { %v2466_v24 = vmul.f32 0.5, %v2434_v0  ;;  %4334 = vtanh.f32 %v2375_v12  ;;  %v2376_v46 = vmul.f32 0.7978846, %v2344_v5  ;;  %v6157_v42 = vadd.f32 %v6068_v4, %v5808_v38 }
 0x2fc   :  { %v2467_v55 = vmul.f32 0.5, %v2435_v10  ;;  %v2345_v20 = vadd.f32 %v6131_v3, %v2313_v27  ;;  %v2497_v51 = vmul.f32 %v5995_v61, %v2465_v25  ;;  %v3952_v23 = vpack.i.bf16 %v6149_v59, %v6146_v7 }
 0x2fd   :  { %4336 = vtanh.f32 %v2376_v46  ;;  %v6164_v53 = vadd.f32 %v6077_v47, %v5805_v29  ;;  %v6167_v57 = vmul.f32 %v6025_v28, %v2466_v24  ;;  %v2436_v34 = vadd.f32 1.0, %v4329_v41 }
 0x2fe   :  { %v2377_v16 = vmul.f32 0.7978846, %v2345_v20  ;;  %v2250_v52 = vmul.f32 %v6157_v42, %v6157_v42  ;;  %3953 = vrot.lane.b32.xlu1 %v3952_v23, %s4411_s10  ;;  %v6176_v4 = vadd.f32 %v6080_v40, %v5808_v38  ;;  %v2534_v29 = vmul.f32 %v5899_v58, %v6056_v62 }
 0x2ff   :  { %v2251_v61 = vmul.f32 %v6164_v53, %v6164_v53  ;;  %v2536_v28 = vmul.f32 %v5899_v58, %v6102_v56  ;;  %v2499_v47 = vmul.f32 %v6032_v21, %v2467_v55  ;;  %v2538_v49 = vmul.f32 %v5899_v58, %v6109_v13 }
 0x300   :  { %4338 = vtanh.f32 %v2377_v16  ;;  %v2282_v8 = vmul.f32 %v6157_v42, %v2250_v52  ;;  %v2252_v38 = vmul.f32 %v6176_v4, %v6176_v4  ;;  %v6190_v40 = vadd.f32 %v5903_v6, %v2534_v29 }
 0x301   :  { %v4331_v50 = vpop.eup %4330  ;;  %v2283_v12 = vmul.f32 %v6164_v53, %v2251_v61  ;;  %v6193_v62 = vadd.f32 %v5903_v6, %v2536_v28  ;;  %v2540_v37 = vmul.f32 %v5899_v58, %v2495_v32  ;;  %v6197_v43 = vadd.f32 %v5903_v6, %v2538_v49 }
 0x302   :  { %v2437_v56 = vadd.f32 1.0, %v4331_v50  ;;  %v2314_v21 = vmul.f32 0.044715, %v2282_v8  ;;  %v2284_v35 = vmul.f32 %v6176_v4, %v2252_v38  ;;  %v2542_v0 = vmul.f32 %v5899_v58, %v2497_v51 }
 0x303   :  { %v2315_v13 = vmul.f32 0.044715, %v2283_v12  ;;  %v3957_v25 = vpack.i.bf16 %v6193_v62, %v6190_v40  ;;  %v6205_v27 = vadd.f32 %v5903_v6, %v2540_v37  ;;  %v2544_v32 = vmul.f32 %v5899_v58, %v2499_v47 }
 0x304   :  { %v4333_v5 = vpop.eup %4332  ;;  %v2469_v60 = vmul.f32 0.5, %v2437_v56  ;;  %v2346_v10 = vadd.f32 %v6157_v42, %v2314_v21  ;;  %v2468_v24 = vmul.f32 0.5, %v2436_v34  ;;  %v2316_v20 = vmul.f32 0.044715, %v2284_v35 }
 0x305   :  { %v4335_v41 = vpop.eup %4334  ;;  %v2438_v46 = vadd.f32 1.0, %v4333_v5  ;;  %v2347_v55 = vadd.f32 %v6164_v53, %v2315_v13  ;;  %3958 = vrot.lane.b32.xlu1 %v3957_v25, %s4411_s10  ;;  %v3962_v52 = vpack.i.bf16 %v6205_v27, %v6197_v43  ;;  %v6215_v47 = vadd.f32 %v5903_v6, %v2542_v0 }
 0x306   :  { %v2501_v23 = vmul.f32 %v6087_v22, %v2469_v60  ;;  %v2439_v51 = vadd.f32 1.0, %v4335_v41  ;;  %v2378_v16 = vmul.f32 0.7978846, %v2346_v10  ;;  %v2348_v28 = vadd.f32 %v6176_v4, %v2316_v20 }
 0x307   :  { %v4337_v61 = vpop.eup %4336  ;;  %v2379_v29 = vmul.f32 0.7978846, %v2347_v55  ;;  %v6218_v34 = vadd.f32 %v5903_v6, %v2544_v32  ;;  %v2470_v8 = vmul.f32 0.5, %v2438_v46  ;;  %3963 = vrot.lane.b32.xlu0 %v3962_v52, %s4411_s10  ;;  %v2500_v21 = vmul.f32 %v6043_v39, %v2468_v24 }
 0x308   :  { %v2471_v49 = vmul.f32 0.5, %v2439_v51  ;;  %v2440_v50 = vadd.f32 1.0, %v4337_v61  ;;  %4340 = vtanh.f32 %v2378_v16  ;;  %v2380_v22 = vmul.f32 0.7978846, %v2348_v28 }
 0x309   :  { %4342 = vtanh.f32 %v2379_v29  ;;  %v3967_v12 = vpack.i.bf16 %v6218_v34, %v6215_v47  ;;  %v2546_v38 = vmul.f32 %v5899_v58, %v2501_v23  ;;  %v2523_v35 = vmul.f32 %v5870_v9, %v5923_v54 }
 0x30a   :  { %v4339_v56 = vpop.eup %4338  ;;  %v2503_v37 = vmul.f32 %v6099_v11, %v2471_v49  ;;  %v2472_v13 = vmul.f32 0.5, %v2440_v50  ;;  %4344 = vtanh.f32 %v2380_v22  ;;  %v2525_v0 = vmul.f32 %v5870_v9, %v5947_v26 }
 0x30b   :  { %v2441_v25 = vadd.f32 1.0, %v4339_v56  ;;  %3968 = vrot.lane.b32.xlu1 %v3967_v12, %s4411_s10  ;;  %v2527_v5 = vmul.f32 %v5870_v9, %v5953_v63  ;;  %v2502_v60 = vmul.f32 %v6091_v1, %v2470_v8  ;;  %v6236_v11 = vadd.f32 %v5914_v30, %v2523_v35 }
 0x30c   :  { %v2548_v39 = vmul.f32 %v5899_v58, %v2503_v37  ;;  %v2529_v54 = vmul.f32 %v5870_v9, %v5991_v19  ;;  %v2504_v10 = vmul.f32 %v6120_v48, %v2472_v13  ;;  %v6242_v32 = vadd.f32 %v5903_v6, %v2546_v38 }
 0x30d   :  { %v2570_v26 = vadd.f32 %v5914_v30, %v2525_v0  ;;  %v6246_v41 = vadd.f32 %v5914_v30, %v2527_v5  ;;  %v2531_v24 = vmul.f32 %v5870_v9, %v6021_v17  ;;  %v2533_v19 = vmul.f32 %v5870_v9, %v6037_v18 }
 0x30e   :  { %v6249_v63 = vadd.f32 %v5903_v6, %v2548_v39  ;;  %v6252_v1 = vadd.f32 %v5914_v30, %v2529_v54  ;;  %v2473_v48 = vmul.f32 0.5, %v2441_v25  ;;  %v2535_v46 = vmul.f32 %v5870_v9, %v6066_v31 }
 0x30f   :  { %v2537_v55 = vmul.f32 %v5870_v9, %v6106_v45  ;;  %v2539_v20 = vmul.f32 %v5870_v9, %v6116_v36  ;;  %v6267_v51 = vadd.f32 %v5914_v30, %v2531_v24  ;;  %v6270_v17 = vadd.f32 %v5914_v30, %v2533_v19 }
 0x310   :  { %v3972_v23 = vpack.i.bf16 %v6249_v63, %v6242_v32  ;;  %v2541_v18 = vmul.f32 %v5870_v9, %v6152_v44  ;;  %v6275_v31 = vadd.f32 %v5914_v30, %v2535_v46  ;;  %v2543_v61 = vmul.f32 %v5870_v9, %v6167_v57 }
 0x311   :  { %v6278_v45 = vadd.f32 %v5914_v30, %v2537_v55  ;;  %v6281_v36 = vadd.f32 %v5914_v30, %v2539_v20  ;;  %v2545_v44 = vmul.f32 %v5870_v9, %v2500_v21  ;;  %v2547_v29 = vmul.f32 %v5870_v9, %v2502_v60 }
 0x312   :  { %v4341_v16 = vpop.eup %4340  ;;  %3973 = vrot.lane.b32.xlu0 %v3972_v23, %s4411_s10  ;;  %v6285_v52 = vadd.f32 %v5914_v30, %v2541_v18  ;;  %v2505_v8 = vmul.f32 %v6131_v3, %v2473_v48  ;;  %v2549_v50 = vmul.f32 %v5870_v9, %v2504_v10  ;;  %v6294_v12 = vadd.f32 %v5914_v30, %v2543_v61 }
 0x313   :  { %v4343_v28 = vpop.eup %4342  ;;  %v2442_v49 = vadd.f32 1.0, %v4341_v16  ;;  %v6297_v38 = vadd.f32 %v5914_v30, %v2545_v44  ;;  %v6300_v56 = vadd.f32 %v5914_v30, %v2547_v29 }
 0x314   :  { %v2443_v22 = vadd.f32 1.0, %v4343_v28  ;;  %v4345_v57 = vpop.eup %4344  ;;  %v6303_v37 = vadd.f32 %v5914_v30, %v2549_v50  ;;  %v2550_v5 = vmul.f32 %v5899_v58, %v2505_v8 }
 0x315   :  { %v2474_v21 = vmul.f32 0.5, %v2442_v49  ;;  %v2444_v3 = vadd.f32 1.0, %v4345_v57 }
 0x316   :  { %v2475_v13 = vmul.f32 0.5, %v2443_v22  ;;  %v6315_v24 = vadd.f32 %v5903_v6, %v2550_v5 }
 0x317   :  { %v2506_v35 = vmul.f32 %v6157_v42, %v2474_v21  ;;  %v2476_v0 = vmul.f32 0.5, %v2444_v3 }
 0x318   :  { %v2507_v25 = vmul.f32 %v6164_v53, %v2475_v13 }
 0x319   :  { %v2551_v60 = vmul.f32 %v5870_v9, %v2506_v35  ;;  %v2508_v39 = vmul.f32 %v6176_v4, %v2476_v0 }
 0x31a   :  { %v2552_v54 = vmul.f32 %v5899_v58, %v2507_v25 }
 0x31b   :  { %v6312_v10 = vadd.f32 %v5914_v30, %v2551_v60  ;;  %v2553_v42 = vmul.f32 %v5870_v9, %v2508_v39 }
 0x31c   :  { %v6318_v19 = vadd.f32 %v5903_v6, %v2552_v54 }
 0x31d   :  { %v6324_v48 = vadd.f32 %v5914_v30, %v2553_v42 }
 0x31e   :  { %v3977_v53 = vpack.i.bf16 %v6318_v19, %v6315_v24 }
 0x320   :  { %3978 = vrot.lane.b32.xlu1 %v3977_v53, %s4411_s10 }
 0x357   :  { %v3944_v58 = vpop.permute.xlu0 %3943 }
 0x358   :  { %v3946_v4 = vunpack.i.h.bf16 %v3944_v58  ;;  %v3945_v46 = vunpack.i.l.bf16 %v3944_v58 }
 0x35a   :  { %v2664_v55 = vmax.f32 %v6016_v2, %v3946_v4  ;;  %v2663_v20 = vmax.f32 %v6009_v14, %v3945_v46 }
 0x35c   :  { %v2680_v23 = vmax.f32 %v2664_v55, %v2570_v26  ;;  %v2679_v6 = vmax.f32 %v2663_v20, %v6236_v11 }
 0x35e   :  { %v2695_v9 = vpack.c.bf16 %v2680_v23, %v2679_v6 }
 0x35f   :  { %v3949_v18 = vpop.permute.xlu0 %3948 }
 0x360   :  { %v3951_v16 = vunpack.i.h.bf16 %v3949_v18  ;;  %v3950_v61 = vunpack.i.l.bf16 %v3949_v18  ;;  %3780 = vmatprep.mubr.msk.bf16.mxu0 %vm2740_vm0, %v2695_v9 }
 0x362   :  { %v2666_v30 = vmax.f32 %v6075_v33, %v3951_v16  ;;  %v2665_v44 = vmax.f32 %v6072_v15, %v3950_v61 }
 0x364   :  { %v2682_v29 = vmax.f32 %v2666_v30, %v6252_v1  ;;  %v2681_v2 = vmax.f32 %v2665_v44, %v6246_v41 }
 0x366   :  { %v2696_v28 = vpack.c.bf16 %v2682_v29, %v2681_v2 }
 0x368   :  { %3781 = vmatmul.mubr.msk.bf16.vlgmr.msra.gmra.mrb[48].mxu0 %vm2740_vm0, %v2696_v28 }
 0x370   :  { %v3954_v14 = vpop.permute.xlu1 %3953 }
 0x371   :  { %v3956_v11 = vunpack.i.h.bf16 %v3954_v14  ;;  %v3955_v26 = vunpack.i.l.bf16 %v3954_v14 }
 0x373   :  { %v2668_v8 = vmax.f32 %v6149_v59, %v3956_v11  ;;  %v2667_v49 = vmax.f32 %v6146_v7, %v3955_v26 }
 0x375   :  { %v2684_v50 = vmax.f32 %v2668_v8, %v6270_v17  ;;  %v2683_v33 = vmax.f32 %v2667_v49, %v6267_v51 }
 0x377   :  { %v3959_v22 = vpop.permute.xlu1 %3958  ;;  %v2697_v1 = vpack.c.bf16 %v2684_v50, %v2683_v33 }
 0x378   :  { %v3961_v15 = vunpack.i.h.bf16 %v3959_v22  ;;  %v3960_v57 = vunpack.i.l.bf16 %v3959_v22 }
 0x379   :  { %3784 = vmatprep.mubr.msk.bf16.mxu0 %vm2740_vm0, %v2697_v1  ;;  %v3964_v13 = vpop.permute.xlu0 %3963 }
 0x37a   :  { %v2670_v41 = vmax.f32 %v6193_v62, %v3961_v15  ;;  %v2669_v21 = vmax.f32 %v6190_v40, %v3960_v57  ;;  %v3966_v3 = vunpack.i.h.bf16 %v3964_v13  ;;  %v3965_v35 = vunpack.i.l.bf16 %v3964_v13 }
 0x37c   :  { %v2686_v59 = vmax.f32 %v2670_v41, %v6278_v45  ;;  %v2685_v7 = vmax.f32 %v2669_v21, %v6275_v31  ;;  %v2672_v17 = vmax.f32 %v6205_v27, %v3966_v3  ;;  %v2671_v51 = vmax.f32 %v6197_v43, %v3965_v35 }
 0x37d   :  { %v3969_v25 = vpop.permute.xlu1 %3968 }
 0x37e   :  { %v2698_v0 = vpack.c.bf16 %v2686_v59, %v2685_v7  ;;  %v3971_v5 = vunpack.i.h.bf16 %v3969_v25  ;;  %v3970_v60 = vunpack.i.l.bf16 %v3969_v25  ;;  %v2688_v62 = vmax.f32 %v2672_v17, %v6285_v52 }
 0x37f   :  { %v2687_v40 = vmax.f32 %v2671_v51, %v6281_v36 }
 0x380   :  { %3785 = vmatmul.mubr.msk.bf16.gmra.mrb[52].mxu0 %vm2740_vm0, %v2698_v0  ;;  %v2674_v39 = vmax.f32 %v6218_v34, %v3971_v5  ;;  %v2673_v45 = vmax.f32 %v6215_v47, %v3970_v60 }
 0x381   :  { %v2699_v54 = vpack.c.bf16 %v2688_v62, %v2687_v40 }
 0x382   :  { %v2690_v31 = vmax.f32 %v2674_v39, %v6297_v38  ;;  %v2689_v27 = vmax.f32 %v2673_v45, %v6294_v12 }
 0x383   :  { %3788 = vmatprep.mubr.msk.bf16.mxu0 %vm2740_vm0, %v2699_v54 }
 0x384   :  { %v3974_v43 = vpop.permute.xlu0 %3973  ;;  %v2700_v42 = vpack.c.bf16 %v2690_v31, %v2689_v27 }
 0x385   :  { %v3976_v53 = vunpack.i.h.bf16 %v3974_v43  ;;  %v3975_v58 = vunpack.i.l.bf16 %v3974_v43 }
 0x387   :  { %v2676_v52 = vmax.f32 %v6249_v63, %v3976_v53  ;;  %v2675_v36 = vmax.f32 %v6242_v32, %v3975_v58 }
 0x388   :  { %3789 = vmatmul.mubr.msk.bf16.gmra.mrb[56].mxu0 %vm2740_vm0, %v2700_v42 }
 0x389   :  { %v2692_v34 = vmax.f32 %v2676_v52, %v6303_v37  ;;  %v2691_v47 = vmax.f32 %v2675_v36, %v6300_v56  ;;  %v3631_v56 = vld [vmem:[%s6801_s6] ss:$0 sm:$0xff] }
 0x38b   :  { %v2701_v4 = vpack.c.bf16 %v2692_v34, %v2691_v47 }
 0x38d   :  { %3792 = vmatprep.mubr.msk.bf16.mxu0 %vm2740_vm0, %v2701_v4 }
 0x392   :  { %v3979_v12 = vpop.permute.xlu1 %3978 }
 0x393   :  { %v3981_v38 = vunpack.i.h.bf16 %v3979_v12  ;;  %v3980_v46 = vunpack.i.l.bf16 %v3979_v12 }
 0x395   :  { %v2678_v55 = vmax.f32 %v6318_v19, %v3981_v38  ;;  %v2677_v20 = vmax.f32 %v6315_v24, %v3980_v46 }
 0x397   :  { %v2694_v63 = vmax.f32 %v2678_v55, %v6324_v48  ;;  %v2693_v32 = vmax.f32 %v2677_v20, %v6312_v10 }
 0x399   :  { %v2702_v23 = vpack.c.bf16 %v2694_v63, %v2693_v32 }
 0x39b   :  { %3793 = vmatmul.mubr.msk.bf16.gmra.mrb[60].mxu0 %vm2740_vm0, %v2702_v23  ;;  %vm3475_vm0 = vcmask 1048512  }
 0x43b   :  { %v3782_v37 = vpop.f32.mrb[48].mxu0 }
 0x43c   :  { %v6369_v6 = vadd.f32 %v3782_v37, %v3631_v56  ;;  %v2799_v9 = vpop.f32.mrb[49].mxu0 }
 0x43d   :  { %v3783_v18 = vpop.f32.mrb[50].mxu0  ;;  %v6371_v19 = vadd.f32 %v3631_v56, %v2799_v9 }
 0x43e   :  { %v2802_v24 = vpop.f32.mrb[51].mxu0  ;;  %v2869_v48 = vsel %vm2862_vm1, %v6369_v6, 0.0  ;;  %v6379_v61 = vadd.f32 %v3783_v18, %v3631_v56 }
 0x43f   :  { %v6375_v10 = vadd.f32 %v3631_v56, %v2802_v24  ;;  %2870 = vadd.xlane.f32.xlu0 %v2869_v48  ;;  %v2863_v30 = vsel %vm2862_vm1, %v6371_v19, 0.0 }
 0x440   :  { %v2872_v44 = vsel %vm2862_vm1, %v6379_v61, 0.0 }
 0x441   :  { %v2866_v16 = vsel %vm2862_vm1, %v6375_v10, 0.0 }
 0x442   :  { %2867 = vadd.xlane.f32.xlu1 %v2866_v16 }
 0x443   :  { %2864 = vadd.xlane.f32.xlu0 %v2863_v30 }
 0x447   :  { %2873 = vadd.xlane.f32.xlu0 %v2872_v44 }
 0x453   :  { %v3786_v29 = vpop.f32.mrb[52].mxu0 }
 0x454   :  { %v6385_v2 = vadd.f32 %v3786_v29, %v3631_v56  ;;  %v2815_v28 = vpop.f32.mrb[53].mxu0 }
 0x455   :  { %v3787_v14 = vpop.f32.mrb[54].mxu0  ;;  %v6387_v11 = vadd.f32 %v3631_v56, %v2815_v28 }
 0x456   :  { %v6389_v26 = vadd.f32 %v3787_v14, %v3631_v56  ;;  %v2818_v8 = vpop.f32.mrb[55].mxu0  ;;  %v2881_v49 = vsel %vm2862_vm1, %v6385_v2, 0.0 }
 0x457   :  { %2882 = vadd.xlane.f32.xlu1 %v2881_v49  ;;  %v6393_v50 = vadd.f32 %v3631_v56, %v2818_v8  ;;  %v2875_v22 = vsel %vm2862_vm1, %v6387_v11, 0.0 }
 0x458   :  { %v2884_v33 = vsel %vm2862_vm1, %v6389_v26, 0.0 }
 0x459   :  { %2885 = vadd.xlane.f32.xlu0 %v2884_v33  ;;  %v2878_v57 = vsel %vm2862_vm1, %v6393_v50, 0.0 }
 0x45b   :  { %2876 = vadd.xlane.f32.xlu1 %v2875_v22  ;;  %v3790_v15 = vpop.f32.mrb[56].mxu0 }
 0x45c   :  { %v6401_v1 = vadd.f32 %v3790_v15, %v3631_v56  ;;  %v2831_v41 = vpop.f32.mrb[57].mxu0 }
 0x45d   :  { %2879 = vadd.xlane.f32.xlu0 %v2878_v57  ;;  %v3791_v21 = vpop.f32.mrb[58].mxu0  ;;  %v6403_v13 = vadd.f32 %v3631_v56, %v2831_v41 }
 0x45e   :  { %v6405_v3 = vadd.f32 %v3791_v21, %v3631_v56  ;;  %v2834_v35 = vpop.f32.mrb[59].mxu0  ;;  %v2893_v59 = vsel %vm2862_vm1, %v6401_v1, 0.0 }
 0x45f   :  { %2894 = vadd.xlane.f32.xlu1 %v2893_v59  ;;  %v6409_v7 = vadd.f32 %v3631_v56, %v2834_v35  ;;  %v2887_v51 = vsel %vm2862_vm1, %v6403_v13, 0.0 }
 0x460   :  { %v2896_v17 = vsel %vm2862_vm1, %v6405_v3, 0.0 }
 0x461   :  { %2897 = vadd.xlane.f32.xlu0 %v2896_v17  ;;  %v2890_v25 = vsel %vm2862_vm1, %v6409_v7, 0.0 }
 0x463   :  { %2888 = vadd.xlane.f32.xlu1 %v2887_v51 }
 0x465   :  { %2891 = vadd.xlane.f32.xlu0 %v2890_v25 }
 0x46e   :  { %v3794_v0 = vpop.f32.mrb[60].mxu0 }
 0x46f   :  { %v2847_v5 = vpop.f32.mrb[61].mxu0  ;;  %v6419_v39 = vadd.f32 %v3794_v0, %v3631_v56 }
 0x470   :  { %v6417_v60 = vadd.f32 %v3631_v56, %v2847_v5  ;;  %v3795_v62 = vpop.f32.mrb[62].mxu0 }
 0x471   :  { %v2850_v40 = vpop.f32.mrb[63].mxu0  ;;  %v6425_v31 = vadd.f32 %v3795_v62, %v3631_v56  ;;  %v2905_v43 = vsel %vm2862_vm1, %v6419_v39, 0.0 }
 0x472   :  { %v6421_v45 = vadd.f32 %v3631_v56, %v2850_v40  ;;  %v2899_v54 = vsel %vm2862_vm1, %v6417_v60, 0.0 }
 0x473   :  { %2900 = vadd.xlane.f32.xlu1 %v2899_v54  ;;  %v2908_v42 = vsel %vm2862_vm1, %v6425_v31, 0.0 }
 0x474   :  { %v2902_v27 = vsel %vm2862_vm1, %v6421_v45, 0.0 }
 0x475   :  { %2903 = vadd.xlane.f32.xlu0 %v2902_v27 }
 0x477   :  { %2906 = vadd.xlane.f32.xlu1 %v2905_v43 }
 0x479   :  { %2909 = vadd.xlane.f32.xlu0 %v2908_v42 }
 0x4cc   :  { %v2871_v53 = vpop.xlane.xlu0 %2870 }
 0x4cd   :  { %v2914_v58 = vmul.f32 0.03125, %v2871_v53 }
 0x4cf   :  { %v6434_v52 = vsub.f32 %v6369_v6, %v2914_v58  ;;  %v2868_v36 = vpop.xlane.xlu1 %2867 }
 0x4d0   :  { %v2865_v34 = vpop.xlane.xlu0 %2864  ;;  %v2913_v12 = vmul.f32 0.03125, %v2868_v36 }
 0x4d1   :  { %v2912_v47 = vmul.f32 0.03125, %v2865_v34  ;;  %v2946_v4 = vmul.f32 %v6434_v52, %v6434_v52 }
 0x4d2   :  { %v6445_v32 = vsub.f32 %v6375_v10, %v2913_v12 }
 0x4d3   :  { %v6439_v38 = vsub.f32 %v6371_v19, %v2912_v47  ;;  %v2966_v46 = vsel %vm2862_vm1, %v2946_v4, 0.0 }
 0x4d4   :  { %2967 = vadd.xlane.f32.xlu1 %v2966_v46  ;;  %v2874_v55 = vpop.xlane.xlu0 %2873  ;;  %v2945_v9 = vmul.f32 %v6445_v32, %v6445_v32 }
 0x4d5   :  { %v2915_v20 = vmul.f32 0.03125, %v2874_v55  ;;  %v2944_v63 = vmul.f32 %v6439_v38, %v6439_v38 }
 0x4d6   :  { %v2963_v18 = vsel %vm2862_vm1, %v2945_v9, 0.0 }
 0x4d7   :  { %v6448_v23 = vsub.f32 %v6379_v61, %v2915_v20  ;;  %v2960_v56 = vsel %vm2862_vm1, %v2944_v63, 0.0 }
 0x4d8   :  { %2961 = vadd.xlane.f32.xlu1 %v2960_v56 }
 0x4d9   :  { %v2947_v37 = vmul.f32 %v6448_v23, %v6448_v23 }
 0x4db   :  { %v2969_v6 = vsel %vm2862_vm1, %v2947_v37, 0.0 }
 0x4dc   :  { %2970 = vadd.xlane.f32.xlu0 %v2969_v6 }
 0x4e0   :  { %2964 = vadd.xlane.f32.xlu0 %v2963_v18 }
 0x4e4   :  { %v2883_v19 = vpop.xlane.xlu1 %2882 }
 0x4e5   :  { %v2918_v24 = vmul.f32 0.03125, %v2883_v19 }
 0x4e6   :  { %v2886_v48 = vpop.xlane.xlu0 %2885 }
 0x4e7   :  { %v6458_v10 = vsub.f32 %v6385_v2, %v2918_v24  ;;  %v2919_v16 = vmul.f32 0.03125, %v2886_v48 }
 0x4e8   :  { %v2877_v61 = vpop.xlane.xlu1 %2876 }
 0x4e9   :  { %v6461_v30 = vsub.f32 %v6389_v26, %v2919_v16  ;;  %v2916_v44 = vmul.f32 0.03125, %v2877_v61  ;;  %v2950_v29 = vmul.f32 %v6458_v10, %v6458_v10 }
 0x4ea   :  { %v2880_v28 = vpop.xlane.xlu0 %2879 }
 0x4eb   :  { %v6466_v14 = vsub.f32 %v6387_v11, %v2916_v44  ;;  %v2917_v8 = vmul.f32 0.03125, %v2880_v28  ;;  %v2978_v49 = vsel %vm2862_vm1, %v2950_v29, 0.0  ;;  %v2951_v2 = vmul.f32 %v6461_v30, %v6461_v30 }
 0x4ec   :  { %2979 = vadd.xlane.f32.xlu1 %v2978_v49  ;;  %v2895_v33 = vpop.xlane.xlu1 %2894 }
 0x4ed   :  { %v6472_v22 = vsub.f32 %v6393_v50, %v2917_v8  ;;  %v2981_v26 = vsel %vm2862_vm1, %v2951_v2, 0.0  ;;  %v2948_v15 = vmul.f32 %v6466_v14, %v6466_v14  ;;  %v2922_v57 = vmul.f32 0.03125, %v2895_v33 }
 0x4ee   :  { %2982 = vadd.xlane.f32.xlu0 %v2981_v26  ;;  %v2898_v11 = vpop.xlane.xlu0 %2897  ;;  %v6532_v26 = vld [vmem:[%s6801_s6 + $0x1] ss:$0 sm:$0xff] }
 0x4ef   :  { %v2972_v41 = vsel %vm2862_vm1, %v2948_v15, 0.0  ;;  %v2949_v21 = vmul.f32 %v6472_v22, %v6472_v22  ;;  %v6481_v35 = vsub.f32 %v6401_v1, %v2922_v57  ;;  %v2923_v59 = vmul.f32 0.03125, %v2898_v11  ;;  %v6538_v11 = vld [vmem:[%s6801_s6 + $0x2] ss:$0 sm:$0xff] }
 0x4f0   :  { %2973 = vadd.xlane.f32.xlu1 %v2972_v41  ;;  %v2889_v50 = vpop.xlane.xlu1 %2888 }
 0x4f1   :  { %v2975_v17 = vsel %vm2862_vm1, %v2949_v21, 0.0  ;;  %v6485_v51 = vsub.f32 %v6405_v3, %v2923_v59  ;;  %v2920_v25 = vmul.f32 0.03125, %v2889_v50  ;;  %v2954_v0 = vmul.f32 %v6481_v35, %v6481_v35 }
 0x4f2   :  { %2976 = vadd.xlane.f32.xlu0 %v2975_v17  ;;  %v2892_v5 = vpop.xlane.xlu0 %2891 }
 0x4f3   :  { %v6490_v62 = vsub.f32 %v6403_v13, %v2920_v25  ;;  %v2921_v40 = vmul.f32 0.03125, %v2892_v5  ;;  %v2990_v1 = vsel %vm2862_vm1, %v2954_v0, 0.0  ;;  %v2955_v54 = vmul.f32 %v6485_v51, %v6485_v51 }
 0x4f4   :  { %2991 = vadd.xlane.f32.xlu1 %v2990_v1 }
 0x4f5   :  { %v6496_v27 = vsub.f32 %v6409_v7, %v2921_v40  ;;  %v2993_v3 = vsel %vm2862_vm1, %v2955_v54, 0.0  ;;  %v2952_v43 = vmul.f32 %v6490_v62, %v6490_v62 }
 0x4f6   :  { %2994 = vadd.xlane.f32.xlu0 %v2993_v3 }
 0x4f7   :  { %v2984_v42 = vsel %vm2862_vm1, %v2952_v43, 0.0  ;;  %v2953_v13 = vmul.f32 %v6496_v27, %v6496_v27 }
 0x4f8   :  { %2985 = vadd.xlane.f32.xlu1 %v2984_v42 }
 0x4f9   :  { %v2987_v53 = vsel %vm2862_vm1, %v2953_v13, 0.0 }
 0x4fa   :  { %2988 = vadd.xlane.f32.xlu0 %v2987_v53 }
 0x500   :  { %v2901_v58 = vpop.xlane.xlu1 %2900 }
 0x501   :  { %v2924_v36 = vmul.f32 0.03125, %v2901_v58 }
 0x502   :  { %v2904_v34 = vpop.xlane.xlu0 %2903 }
 0x503   :  { %v6506_v7 = vsub.f32 %v6417_v60, %v2924_v36  ;;  %v2925_v47 = vmul.f32 0.03125, %v2904_v34 }
 0x504   :  { %v2907_v4 = vpop.xlane.xlu1 %2906 }
 0x505   :  { %v6509_v12 = vsub.f32 %v6421_v45, %v2925_v47  ;;  %v2926_v46 = vmul.f32 0.03125, %v2907_v4  ;;  %v2956_v55 = vmul.f32 %v6506_v7, %v6506_v7 }
 0x506   :  { %v2910_v20 = vpop.xlane.xlu0 %2909 }
 0x507   :  { %v6514_v63 = vsub.f32 %v6419_v39, %v2926_v46  ;;  %v2927_v56 = vmul.f32 0.03125, %v2910_v20  ;;  %v2996_v37 = vsel %vm2862_vm1, %v2956_v55, 0.0  ;;  %v2957_v60 = vmul.f32 %v6509_v12, %v6509_v12 }
 0x508   :  { %2997 = vadd.xlane.f32.xlu1 %v2996_v37 }
 0x509   :  { %v6520_v6 = vsub.f32 %v6425_v31, %v2927_v56  ;;  %v2999_v45 = vsel %vm2862_vm1, %v2957_v60, 0.0  ;;  %v2958_v9 = vmul.f32 %v6514_v63, %v6514_v63 }
 0x50a   :  { %3000 = vadd.xlane.f32.xlu0 %v2999_v45 }
 0x50b   :  { %v3002_v18 = vsel %vm2862_vm1, %v2958_v9, 0.0  ;;  %v2959_v39 = vmul.f32 %v6520_v6, %v6520_v6 }
 0x50c   :  { %3003 = vadd.xlane.f32.xlu1 %v3002_v18 }
 0x50d   :  { %v3005_v19 = vsel %vm2862_vm1, %v2959_v39, 0.0 }
 0x50e   :  { %3006 = vadd.xlane.f32.xlu0 %v3005_v19 }
 0x561   :  { %v2968_v24 = vpop.xlane.xlu1 %2967 }
 0x562   :  { %v3010_v48 = vmul.f32 0.03125, %v2968_v24 }
 0x564   :  { %v3026_v16 = vadd.f32 1e-05, %v3010_v48 }
 0x565   :  { %v2962_v31 = vpop.xlane.xlu1 %2961 }
 0x566   :  { %4346 = vrsqrt.f32 %v3026_v16  ;;  %v3008_v61 = vmul.f32 0.03125, %v2962_v31 }
 0x568   :  { %v3024_v44 = vadd.f32 1e-05, %v3008_v61 }
 0x569   :  { %v2971_v29 = vpop.xlane.xlu0 %2970 }
 0x56a   :  { %4348 = vrsqrt.f32 %v3024_v44  ;;  %v3011_v28 = vmul.f32 0.03125, %v2971_v29 }
 0x56c   :  { %v3027_v8 = vadd.f32 1e-05, %v3011_v28 }
 0x56d   :  { %v2965_v49 = vpop.xlane.xlu0 %2964 }
 0x56e   :  { %4350 = vrsqrt.f32 %v3027_v8  ;;  %v3009_v2 = vmul.f32 0.03125, %v2965_v49 }
 0x570   :  { %v4347_v33 = vpop.eup %4346  ;;  %v3025_v15 = vadd.f32 1e-05, %v3009_v2 }
 0x571   :  { %v3058_v57 = vmul.f32 %v4347_v33, %v6434_v52 }
 0x572   :  { %4352 = vrsqrt.f32 %v3025_v15 }
 0x573   :  { %v3079_v41 = vmul.f32 %v6532_v26, %v3058_v57 }
 0x574   :  { %v4349_v21 = vpop.eup %4348 }
 0x575   :  { %v3056_v59 = vmul.f32 %v4349_v21, %v6439_v38  ;;  %v6543_v50 = vadd.f32 %v6538_v11, %v3079_v41 }
 0x577   :  { %v3077_v17 = vmul.f32 %v6532_v26, %v3056_v59  ;;  %v3116_v25 = vmul.f32 %v6543_v50, %v6543_v50 }
 0x578   :  { %v4351_v52 = vpop.eup %4350 }
 0x579   :  { %v3059_v0 = vmul.f32 %v4351_v52, %v6448_v23  ;;  %v2980_v5 = vpop.xlane.xlu1 %2979  ;;  %v3132_v40 = vmul.f32 %v3116_v25, %v6543_v50  ;;  %v6551_v1 = vadd.f32 %v6538_v11, %v3077_v17 }
 0x57a   :  { %v3014_v54 = vmul.f32 0.03125, %v2980_v5 }
 0x57b   :  { %v3080_v38 = vmul.f32 %v6532_v26, %v3059_v0  ;;  %v2983_v3 = vpop.xlane.xlu0 %2982  ;;  %v3148_v43 = vmul.f32 0.044715, %v3132_v40  ;;  %v3114_v42 = vmul.f32 %v6551_v1, %v6551_v1 }
 0x57c   :  { %v4353_v13 = vpop.eup %4352  ;;  %v3030_v53 = vadd.f32 1e-05, %v3014_v54  ;;  %v3015_v58 = vmul.f32 0.03125, %v2983_v3 }
 0x57d   :  { %v3057_v36 = vmul.f32 %v4353_v13, %v6445_v32  ;;  %v2974_v23 = vpop.xlane.xlu1 %2973  ;;  %v3164_v34 = vadd.f32 %v3148_v43, %v6543_v50  ;;  %v3130_v47 = vmul.f32 %v3114_v42, %v6551_v1  ;;  %v6560_v4 = vadd.f32 %v6538_v11, %v3080_v38 }
 0x57e   :  { %4354 = vrsqrt.f32 %v3030_v53  ;;  %v3031_v46 = vadd.f32 1e-05, %v3015_v58  ;;  %v3012_v55 = vmul.f32 0.03125, %v2974_v23 }
 0x57f   :  { %v3078_v20 = vmul.f32 %v6532_v26, %v3057_v36  ;;  %v2977_v56 = vpop.xlane.xlu0 %2976  ;;  %v3180_v37 = vmul.f32 0.7978846, %v3164_v34  ;;  %v3146_v60 = vmul.f32 0.044715, %v3130_v47  ;;  %v3117_v45 = vmul.f32 %v6560_v4, %v6560_v4 }
 0x580   :  { %4356 = vrsqrt.f32 %v3031_v46  ;;  %v3028_v32 = vadd.f32 1e-05, %v3012_v55  ;;  %v3013_v9 = vmul.f32 0.03125, %v2977_v56 }
 0x581   :  { %v2992_v18 = vpop.xlane.xlu1 %2991  ;;  %4358 = vtanh.f32 %v3180_v37  ;;  %v3162_v39 = vadd.f32 %v3146_v60, %v6551_v1  ;;  %v3133_v19 = vmul.f32 %v3117_v45, %v6560_v4  ;;  %v6568_v24 = vadd.f32 %v6538_v11, %v3078_v20 }
 0x582   :  { %4360 = vrsqrt.f32 %v3028_v32  ;;  %v3029_v48 = vadd.f32 1e-05, %v3013_v9  ;;  %v3018_v16 = vmul.f32 0.03125, %v2992_v18 }
 0x583   :  { %v2995_v31 = vpop.xlane.xlu0 %2994  ;;  %v3178_v61 = vmul.f32 0.7978846, %v3162_v39  ;;  %v3149_v44 = vmul.f32 0.044715, %v3133_v19  ;;  %v3115_v29 = vmul.f32 %v6568_v24, %v6568_v24 }
 0x584   :  { %4362 = vrsqrt.f32 %v3029_v48  ;;  %v3034_v28 = vadd.f32 1e-05, %v3018_v16  ;;  %v3019_v8 = vmul.f32 0.03125, %v2995_v31 }
 0x585   :  { %v2986_v49 = vpop.xlane.xlu1 %2985  ;;  %4364 = vtanh.f32 %v3178_v61  ;;  %v3165_v2 = vadd.f32 %v3149_v44, %v6560_v4  ;;  %v3131_v33 = vmul.f32 %v3115_v29, %v6568_v24 }
 0x586   :  { %4366 = vrsqrt.f32 %v3034_v28  ;;  %v3035_v15 = vadd.f32 1e-05, %v3019_v8  ;;  %v3016_v57 = vmul.f32 0.03125, %v2986_v49 }
 0x587   :  { %v2989_v41 = vpop.xlane.xlu0 %2988  ;;  %v3181_v21 = vmul.f32 0.7978846, %v3165_v2  ;;  %v3147_v59 = vmul.f32 0.044715, %v3131_v33 }
 0x588   :  { %v4355_v17 = vpop.eup %4354  ;;  %4368 = vrsqrt.f32 %v3035_v15  ;;  %v3032_v25 = vadd.f32 1e-05, %v3016_v57  ;;  %v3017_v52 = vmul.f32 0.03125, %v2989_v41 }
 0x589   :  { %v3062_v0 = vmul.f32 %v4355_v17, %v6458_v10  ;;  %4370 = vtanh.f32 %v3181_v21  ;;  %v3163_v5 = vadd.f32 %v3147_v59, %v6568_v24 }
 0x58a   :  { %v4357_v40 = vpop.eup %4356  ;;  %4372 = vrsqrt.f32 %v3032_v25  ;;  %v3033_v54 = vadd.f32 1e-05, %v3017_v52 }
 0x58b   :  { %v4359_v38 = vpop.eup %4358  ;;  %v3083_v3 = vmul.f32 %v6532_v26, %v3062_v0  ;;  %v3063_v43 = vmul.f32 %v4357_v40, %v6461_v30  ;;  %v3179_v42 = vmul.f32 0.7978846, %v3163_v5  ;;  %v6588_v30 = vld [vmem:[%s6802_s7] ss:$0 sm:$0xff] }
 0x58c   :  { %v4361_v13 = vpop.eup %4360  ;;  %4374 = vrsqrt.f32 %v3033_v54  ;;  %v3212_v53 = vadd.f32 1.0, %v4359_v38 }
 0x58d   :  { %v3084_v58 = vmul.f32 %v6532_v26, %v3063_v43  ;;  %v3060_v36 = vmul.f32 %v4361_v13, %v6466_v14  ;;  %4376 = vtanh.f32 %v3179_v42  ;;  %v6581_v10 = vadd.f32 %v6538_v11, %v3083_v3 }
 0x58e   :  { %v4363_v23 = vpop.eup %4362  ;;  %v3228_v34 = vmul.f32 0.5, %v3212_v53 }
 0x58f   :  { %v4365_v47 = vpop.eup %4364  ;;  %v3081_v46 = vmul.f32 %v6532_v26, %v3060_v36  ;;  %v3061_v55 = vmul.f32 %v4363_v23, %v6472_v22  ;;  %v3120_v20 = vmul.f32 %v6581_v10, %v6581_v10  ;;  %v6593_v14 = vadd.f32 %v6538_v11, %v3084_v58  ;;  %v6600_v22 = vld [vmem:[%s6801_s6 + $0x3] ss:$0 sm:$0xff] }
 0x590   :  { %v4367_v56 = vpop.eup %4366  ;;  %v3244_v37 = vmul.f32 %v3228_v34, %v6543_v50  ;;  %v3210_v60 = vadd.f32 1.0, %v4365_v47 }
 0x591   :  { %v3066_v45 = vmul.f32 %v4367_v56, %v6481_v35  ;;  %v3136_v32 = vmul.f32 %v3120_v20, %v6581_v10  ;;  %v3121_v9 = vmul.f32 %v6593_v14, %v6593_v14  ;;  %v3082_v39 = vmul.f32 %v6532_v26, %v3061_v55 }
 0x592   :  { %v4369_v18 = vpop.eup %4368  ;;  %v3267_v19 = vmul.f32 %v6588_v30, %v3244_v37  ;;  %v3226_v48 = vmul.f32 0.5, %v3210_v60  ;;  %v6608_v50 = vadd.f32 %v6538_v11, %v3081_v46 }
 0x593   :  { %v4371_v35 = vpop.eup %4370  ;;  %v3087_v16 = vmul.f32 %v6532_v26, %v3066_v45  ;;  %v3067_v31 = vmul.f32 %v4369_v18, %v6485_v51  ;;  %v3152_v61 = vmul.f32 0.044715, %v3136_v32  ;;  %v3137_v44 = vmul.f32 %v3121_v9, %v6593_v14 }
 0x594   :  { %v4373_v29 = vpop.eup %4372  ;;  %v3288_v28 = vadd.f32 %v6600_v22, %v3267_v19  ;;  %v3242_v8 = vmul.f32 %v3226_v48, %v6551_v1  ;;  %v3213_v49 = vadd.f32 1.0, %v4371_v35  ;;  %v3118_v2 = vmul.f32 %v6608_v50, %v6608_v50 }
 0x595   :  { %v3088_v33 = vmul.f32 %v6532_v26, %v3067_v31  ;;  %v3064_v15 = vmul.f32 %v4373_v29, %v6490_v62  ;;  %v2998_v57 = vpop.xlane.xlu1 %2997  ;;  %v3168_v41 = vadd.f32 %v3152_v61, %v6581_v10  ;;  %v3153_v51 = vmul.f32 0.044715, %v3137_v44 }
 0x596   :  { %v4375_v21 = vpop.eup %4374  ;;  %v3020_v59 = vmul.f32 0.03125, %v2998_v57  ;;  %v3308_v17 = vsel %vm2862_vm1, %v3288_v28, 0.0  ;;  %v3265_v25 = vmul.f32 %v6588_v30, %v3242_v8  ;;  %v3229_v52 = vmul.f32 0.5, %v3213_v49 }
 0x597   :  { %v4377_v1 = vpop.eup %4376  ;;  %v3085_v0 = vmul.f32 %v6532_v26, %v3064_v15  ;;  %v3065_v5 = vmul.f32 %v4375_v21, %v6496_v27  ;;  %v3001_v40 = vpop.xlane.xlu0 %3000  ;;  %3309 = vadd.xlane.f32.xlu1 %v3308_v17  ;;  %v3184_v54 = vmul.f32 0.7978846, %v3168_v41  ;;  %v3169_v62 = vadd.f32 %v3153_v51, %v6593_v14 }
 0x598   :  { %v3036_v38 = vadd.f32 1e-05, %v3020_v59  ;;  %v3021_v3 = vmul.f32 0.03125, %v3001_v40  ;;  %v3286_v43 = vadd.f32 %v6600_v22, %v3265_v25  ;;  %v3245_v42 = vmul.f32 %v3229_v52, %v6560_v4 }
 0x599   :  { %v3086_v13 = vmul.f32 %v6532_v26, %v3065_v5  ;;  %v3004_v53 = vpop.xlane.xlu1 %3003  ;;  %v3211_v58 = vadd.f32 1.0, %v4377_v1  ;;  %4378 = vtanh.f32 %v3184_v54  ;;  %v3185_v36 = vmul.f32 0.7978846, %v3169_v62 }
 0x59a   :  { %4380 = vrsqrt.f32 %v3036_v38  ;;  %v3037_v23 = vadd.f32 1e-05, %v3021_v3  ;;  %v3022_v27 = vmul.f32 0.03125, %v3004_v53  ;;  %v3302_v34 = vsel %vm2862_vm1, %v3286_v43, 0.0 }
 0x59b   :  { %v3007_v47 = vpop.xlane.xlu0 %3006  ;;  %3303 = vadd.xlane.f32.xlu1 %v3302_v34  ;;  %v3268_v46 = vmul.f32 %v6588_v30, %v3245_v42  ;;  %v3227_v55 = vmul.f32 0.5, %v3211_v58  ;;  %4382 = vtanh.f32 %v3185_v36  ;;  %v3134_v20 = vmul.f32 %v3118_v2, %v6608_v50 }
 0x59c   :  { %4384 = vrsqrt.f32 %v3037_v23  ;;  %v3038_v4 = vadd.f32 1e-05, %v3022_v27  ;;  %v3023_v56 = vmul.f32 0.03125, %v3007_v47  ;;  %v6632_v37 = vadd.f32 %v6538_v11, %v3082_v39 }
 0x59d   :  { %v3289_v60 = vadd.f32 %v6600_v22, %v3268_v46  ;;  %v3243_v45 = vmul.f32 %v3227_v55, %v6568_v24  ;;  %v3150_v32 = vmul.f32 0.044715, %v3134_v20  ;;  %v6637_v9 = vadd.f32 %v6538_v11, %v3087_v16 }
 0x59e   :  { %4386 = vrsqrt.f32 %v3038_v4  ;;  %v3039_v18 = vadd.f32 1e-05, %v3023_v56  ;;  %v3119_v19 = vmul.f32 %v6632_v37, %v6632_v37  ;;  %v6642_v48 = vadd.f32 %v6538_v11, %v3088_v33 }
 0x59f   :  { %v3311_v35 = vsel %vm2862_vm1, %v3289_v60, 0.0  ;;  %v3266_v39 = vmul.f32 %v6588_v30, %v3243_v45  ;;  %v3166_v31 = vadd.f32 %v3150_v32, %v6608_v50  ;;  %v3124_v24 = vmul.f32 %v6637_v9, %v6637_v9 }
 0x5a0   :  { %4388 = vrsqrt.f32 %v3039_v18  ;;  %3312 = vadd.xlane.f32.xlu0 %v3311_v35  ;;  %v3135_v16 = vmul.f32 %v3119_v19, %v6632_v37  ;;  %v3125_v61 = vmul.f32 %v6642_v48, %v6642_v48  ;;  %v6653_v44 = vadd.f32 %v6538_v11, %v3085_v0 }
 0x5a1   :  { %v3287_v29 = vadd.f32 %v6600_v22, %v3266_v39  ;;  %v3182_v28 = vmul.f32 0.7978846, %v3166_v31  ;;  %v3140_v8 = vmul.f32 %v3124_v24, %v6637_v9  ;;  %v6658_v49 = vadd.f32 %v6538_v11, %v3086_v13 }
 0x5a2   :  { %v3151_v2 = vmul.f32 0.044715, %v3135_v16  ;;  %v3141_v33 = vmul.f32 %v3125_v61, %v6642_v48  ;;  %v3122_v15 = vmul.f32 %v6653_v44, %v6653_v44 }
 0x5a3   :  { %v4379_v57 = vpop.eup %4378  ;;  %v3305_v41 = vsel %vm2862_vm1, %v3287_v29, 0.0  ;;  %4390 = vtanh.f32 %v3182_v28  ;;  %v3156_v51 = vmul.f32 0.044715, %v3140_v8  ;;  %v3123_v21 = vmul.f32 %v6658_v49, %v6658_v49 }
 0x5a4   :  { %v4381_v59 = vpop.eup %4380  ;;  %3306 = vadd.xlane.f32.xlu0 %v3305_v41  ;;  %v3216_v17 = vadd.f32 1.0, %v4379_v57  ;;  %v3167_v25 = vadd.f32 %v3151_v2, %v6632_v37  ;;  %v3157_v52 = vmul.f32 0.044715, %v3141_v33  ;;  %v3138_v1 = vmul.f32 %v3122_v15, %v6653_v44 }
 0x5a5   :  { %v4383_v0 = vpop.eup %4382  ;;  %v3068_v5 = vmul.f32 %v4381_v59, %v6506_v7  ;;  %v3172_v40 = vadd.f32 %v3156_v51, %v6637_v9  ;;  %v3139_v54 = vmul.f32 %v3123_v21, %v6658_v49 }
 0x5a6   :  { %v4385_v62 = vpop.eup %4384  ;;  %v3232_v38 = vmul.f32 0.5, %v3216_v17  ;;  %v3217_v3 = vadd.f32 1.0, %v4383_v0  ;;  %v3183_v43 = vmul.f32 0.7978846, %v3167_v25  ;;  %v3173_v42 = vadd.f32 %v3157_v52, %v6642_v48 }
 0x5a7   :  { %v3089_v13 = vmul.f32 %v6532_v26, %v3068_v5  ;;  %v3069_v53 = vmul.f32 %v4385_v62, %v6509_v12  ;;  %v3188_v58 = vmul.f32 0.7978846, %v3172_v40  ;;  %v3154_v36 = vmul.f32 0.044715, %v3138_v1 }
 0x5a8   :  { %v4387_v23 = vpop.eup %4386  ;;  %v3248_v27 = vmul.f32 %v3232_v38, %v6581_v10  ;;  %v3233_v7 = vmul.f32 0.5, %v3217_v3  ;;  %4392 = vtanh.f32 %v3183_v43  ;;  %v3189_v34 = vmul.f32 0.7978846, %v3173_v42 }
 0x5a9   :  { %v3090_v47 = vmul.f32 %v6532_v26, %v3069_v53  ;;  %v3070_v46 = vmul.f32 %v4387_v23, %v6514_v63  ;;  %4394 = vtanh.f32 %v3188_v58  ;;  %v3170_v55 = vadd.f32 %v3154_v36, %v6653_v44 }
 0x5aa   :  { %v4389_v20 = vpop.eup %4388  ;;  %v3271_v4 = vmul.f32 %v6588_v30, %v3248_v27  ;;  %v3249_v12 = vmul.f32 %v3233_v7, %v6593_v14  ;;  %4396 = vtanh.f32 %v3189_v34  ;;  %v3155_v56 = vmul.f32 0.044715, %v3139_v54 }
 0x5ab   :  { %v3091_v60 = vmul.f32 %v6532_v26, %v3070_v46  ;;  %v3071_v10 = vmul.f32 %v4389_v20, %v6520_v6  ;;  %v3186_v45 = vmul.f32 0.7978846, %v3170_v55  ;;  %v6683_v32 = vadd.f32 %v6538_v11, %v3089_v13 }
 0x5ac   :  { %v3292_v63 = vadd.f32 %v6600_v22, %v3271_v4  ;;  %v3272_v18 = vmul.f32 %v6588_v30, %v3249_v12  ;;  %v3171_v19 = vadd.f32 %v3155_v56, %v6658_v49  ;;  %v6689_v35 = vadd.f32 %v6538_v11, %v3090_v47 }
 0x5ad   :  { %v4391_v14 = vpop.eup %4390  ;;  %v3092_v39 = vmul.f32 %v6532_v26, %v3071_v10  ;;  %4398 = vtanh.f32 %v3186_v45  ;;  %v3126_v6 = vmul.f32 %v6683_v32, %v6683_v32  ;;  %v6695_v31 = vadd.f32 %v6538_v11, %v3091_v60 }
 0x5ae   :  { %v3320_v24 = vsel %vm2862_vm1, %v3292_v63, 0.0  ;;  %v3293_v16 = vadd.f32 %v6600_v22, %v3272_v18  ;;  %v3214_v61 = vadd.f32 1.0, %v4391_v14  ;;  %v3187_v29 = vmul.f32 0.7978846, %v3171_v19 }
 0x5af   :  { %3321 = vadd.xlane.f32.xlu1 %v3320_v24  ;;  %v3142_v28 = vmul.f32 %v3126_v6, %v6683_v32  ;;  %v3127_v8 = vmul.f32 %v6689_v35, %v6689_v35  ;;  %v3128_v26 = vmul.f32 %v6695_v31, %v6695_v31  ;;  %v6705_v2 = vadd.f32 %v6538_v11, %v3092_v39 }
 0x5b0   :  { %v3323_v33 = vsel %vm2862_vm1, %v3293_v16, 0.0  ;;  %v3230_v15 = vmul.f32 0.5, %v3214_v61  ;;  %4400 = vtanh.f32 %v3187_v29 }
 0x5b1   :  { %3324 = vadd.xlane.f32.xlu0 %v3323_v33  ;;  %v3158_v57 = vmul.f32 0.044715, %v3142_v28  ;;  %v3143_v41 = vmul.f32 %v3127_v8, %v6689_v35  ;;  %v3144_v51 = vmul.f32 %v3128_v26, %v6695_v31  ;;  %v3129_v21 = vmul.f32 %v6705_v2, %v6705_v2 }
 0x5b2   :  { %v4393_v59 = vpop.eup %4392  ;;  %v3246_v17 = vmul.f32 %v3230_v15, %v6608_v50 }
 0x5b3   :  { %v4395_v25 = vpop.eup %4394  ;;  %v3215_v52 = vadd.f32 1.0, %v4393_v59  ;;  %v3174_v11 = vadd.f32 %v3158_v57, %v6683_v32  ;;  %v3159_v1 = vmul.f32 0.044715, %v3143_v41  ;;  %v3160_v0 = vmul.f32 0.044715, %v3144_v51 }
 0x5b4   :  { %v4397_v5 = vpop.eup %4396  ;;  %v3269_v40 = vmul.f32 %v6588_v30, %v3246_v17  ;;  %v3220_v54 = vadd.f32 1.0, %v4395_v25  ;;  %v3145_v62 = vmul.f32 %v3129_v21, %v6705_v2 }
 0x5b5   :  { %v3231_v38 = vmul.f32 0.5, %v3215_v52  ;;  %v3221_v3 = vadd.f32 1.0, %v4397_v5  ;;  %v3190_v43 = vmul.f32 0.7978846, %v3174_v11  ;;  %v3175_v42 = vadd.f32 %v3159_v1, %v6689_v35 }
 0x5b6   :  { %v3290_v13 = vadd.f32 %v6600_v22, %v3269_v40  ;;  %v3236_v50 = vmul.f32 0.5, %v3220_v54  ;;  %v3176_v53 = vadd.f32 %v3160_v0, %v6695_v31  ;;  %v3161_v58 = vmul.f32 0.044715, %v3145_v62 }
 0x5b7   :  { %v4399_v36 = vpop.eup %4398  ;;  %v3247_v23 = vmul.f32 %v3231_v38, %v6632_v37  ;;  %v3237_v27 = vmul.f32 0.5, %v3221_v3  ;;  %4402 = vtanh.f32 %v3190_v43  ;;  %v3191_v7 = vmul.f32 0.7978846, %v3175_v42 }
 0x5b8   :  { %v3314_v34 = vsel %vm2862_vm1, %v3290_v13, 0.0  ;;  %v3252_v47 = vmul.f32 %v3236_v50, %v6637_v9  ;;  %v3218_v46 = vadd.f32 1.0, %v4399_v36  ;;  %v3192_v55 = vmul.f32 0.7978846, %v3176_v53 }
 0x5b9   :  { %3315 = vadd.xlane.f32.xlu1 %v3314_v34  ;;  %v3270_v20 = vmul.f32 %v6588_v30, %v3247_v23  ;;  %v3253_v4 = vmul.f32 %v3237_v27, %v6642_v48  ;;  %4404 = vtanh.f32 %v3191_v7  ;;  %v3177_v12 = vadd.f32 %v3161_v58, %v6705_v2  ;;  %v6847_v34 = vld [vmem:[#allocation2_spill] sm:$0xff] }
 0x5ba   :  { %v4401_v56 = vpop.eup %4400  ;;  %v3275_v37 = vmul.f32 %v6588_v30, %v3252_v47  ;;  %v3234_v60 = vmul.f32 0.5, %v3218_v46  ;;  %4406 = vtanh.f32 %v3192_v55  ;;  %v6846_v58 = vlaneseq }
 0x5bb   :  { %v3291_v10 = vadd.f32 %v6600_v22, %v3270_v20  ;;  %v3276_v45 = vmul.f32 %v6588_v30, %v3253_v4  ;;  %v3219_v9 = vadd.f32 1.0, %v4401_v56  ;;  %v3193_v63 = vmul.f32 0.7978846, %v3177_v12 }
 0x5bc   :  { %v3296_v18 = vadd.f32 %v6600_v22, %v3275_v37  ;;  %v3250_v19 = vmul.f32 %v3234_v60, %v6653_v44  ;;  %v6758_v36 = vand.u32 127, %v6846_v58 }
 0x5bd   :  { %v3317_v48 = vsel %vm2862_vm1, %v3291_v10, 0.0  ;;  %v3297_v14 = vadd.f32 %v6600_v22, %v3276_v45  ;;  %v3235_v39 = vmul.f32 0.5, %v3219_v9  ;;  %4408 = vtanh.f32 %v3193_v63 }
 0x5be   :  { %3318 = vadd.xlane.f32.xlu0 %v3317_v48  ;;  %v3332_v6 = vsel %vm2862_vm1, %v3296_v18, 0.0  ;;  %v3273_v24 = vmul.f32 %v6588_v30, %v3250_v19  ;;  %v3372_v27 = vadd.s32 4294967288, %v6758_v36  ;;  %v3393_v55 = vadd.s32 4294967264, %v6758_v36 }
 0x5bf   :  { %3333 = vadd.xlane.f32.xlu1 %v3332_v6  ;;  %v3335_v16 = vsel %vm2862_vm1, %v3297_v14, 0.0  ;;  %v3251_v61 = vmul.f32 %v3235_v39, %v6658_v49  ;;  %v3386_v20 = vadd.s32 4294967272, %v6758_v36  ;;  %v3400_v9 = vadd.s32 4294967256, %v6758_v36 }
 0x5c0   :  { %v3294_v29 = vadd.f32 %v6600_v22, %v3273_v24  ;;  %v3375_v47 = vsub.s32 %v3372_v27, %v6847_v34  ;;  %v3396_v60 = vsub.s32 %v3393_v55, %v6847_v34  ;;  %v3407_v18 = vadd.s32 4294967248, %v6758_v36 }
 0x5c1   :  { %v4403_v28 = vpop.eup %4402  ;;  %v3274_v44 = vmul.f32 %v6588_v30, %v3251_v61  ;;  %v3389_v10 = vsub.s32 %v3386_v20, %v6847_v34  ;;  %v3414_v24 = vadd.s32 4294967240, %v6758_v36  ;;  %v3470_v58 = vadd.s32 4294967176, %v6758_v36 }
 0x5c2   :  { %3336 = vadd.xlane.f32.xlu0 %v3335_v16  ;;  %v3326_v8 = vsel %vm2862_vm1, %v3294_v29, 0.0  ;;  %v3222_v26 = vadd.f32 1.0, %v4403_v28  ;;  %v3403_v16 = vsub.s32 %v3400_v9, %v6847_v34  ;;  %v3410_v61 = vsub.s32 %v3407_v18, %v6847_v34 }
 0x5c3   :  { %v4405_v33 = vpop.eup %4404  ;;  %3327 = vadd.xlane.f32.xlu1 %v3326_v8  ;;  %v3295_v15 = vadd.f32 %v6600_v22, %v3274_v44  ;;  %v3421_v29 = vadd.s32 4294967232, %v6758_v36  ;;  %v3473_v55 = vsub.s32 %v3470_v58, %v6847_v34 }
 0x5c4   :  { %v4407_v57 = vpop.eup %4406  ;;  %v3238_v41 = vmul.f32 0.5, %v3222_v26  ;;  %v3223_v51 = vadd.f32 1.0, %v4405_v33  ;;  %v3417_v26 = vsub.s32 %v3414_v24, %v6847_v34 }
 0x5c5   :  { %v3329_v21 = vsel %vm2862_vm1, %v3295_v15, 0.0  ;;  %v3224_v59 = vadd.f32 1.0, %v4407_v57  ;;  %v3428_v57 = vadd.s32 4294967224, %v6758_v36 }
 0x5c6   :  { %3330 = vadd.xlane.f32.xlu0 %v3329_v21  ;;  %v3254_v49 = vmul.f32 %v3238_v41, %v6683_v32  ;;  %v3239_v17 = vmul.f32 0.5, %v3223_v51  ;;  %v3424_v51 = vsub.s32 %v3421_v29, %v6847_v34 }
 0x5c7   :  { %v4409_v25 = vpop.eup %4408  ;;  %v3240_v52 = vmul.f32 0.5, %v3224_v59 }
 0x5c8   :  { %v3277_v11 = vmul.f32 %v6588_v30, %v3254_v49  ;;  %v3255_v1 = vmul.f32 %v3239_v17, %v6689_v35  ;;  %v3225_v0 = vadd.f32 1.0, %v4409_v25  ;;  %v3435_v49 = vadd.s32 4294967216, %v6758_v36 }
 0x5c9   :  { %v3256_v5 = vmul.f32 %v3240_v52, %v6695_v31 }
 0x5ca   :  { %v3298_v40 = vadd.f32 %v6600_v22, %v3277_v11  ;;  %v3278_v54 = vmul.f32 %v6588_v30, %v3255_v1  ;;  %v3241_v62 = vmul.f32 0.5, %v3225_v0  ;;  %v3431_v11 = vsub.s32 %v3428_v57, %v6847_v34 }
 0x5cb   :  { %v3279_v38 = vmul.f32 %v6588_v30, %v3256_v5  ;;  %v3442_v0 = vadd.s32 4294967208, %v6758_v36 }
 0x5cc   :  { %v3338_v3 = vsel %vm2862_vm1, %v3298_v40, 0.0  ;;  %v3299_v32 = vadd.f32 %v6600_v22, %v3278_v54  ;;  %v3257_v43 = vmul.f32 %v3241_v62, %v6705_v2  ;;  %v3438_v40 = vsub.s32 %v3435_v49, %v6847_v34 }
 0x5cd   :  { %3339 = vadd.xlane.f32.xlu1 %v3338_v3  ;;  %v3300_v42 = vadd.f32 %v6600_v22, %v3279_v38  ;;  %v3449_v38 = vadd.s32 4294967200, %v6758_v36 }
 0x5ce   :  { %v3341_v35 = vsel %vm2862_vm1, %v3299_v32, 0.0  ;;  %v3280_v31 = vmul.f32 %v6588_v30, %v3257_v43  ;;  %v3379_v30 = vadd.s32 4294967280, %v6758_v36  ;;  %v3456_v32 = vadd.s32 4294967192, %v6758_v36 }
 0x5cf   :  { %3342 = vadd.xlane.f32.xlu0 %v3341_v35  ;;  %v3344_v13 = vsel %vm2862_vm1, %v3300_v42, 0.0  ;;  %v3445_v43 = vsub.s32 %v3442_v0, %v6847_v34 }
 0x5d0   :  { %v3301_v50 = vadd.f32 %v6600_v22, %v3280_v31  ;;  %v3370_v22 = vsub.s32 %v6758_v36, %v6847_v34  ;;  %v3382_v56 = vsub.s32 %v3379_v30, %v6847_v34  ;;  %v3452_v31 = vsub.s32 %v3449_v38, %v6847_v34 }
 0x5d1   :  { %3345 = vadd.xlane.f32.xlu1 %v3344_v13  ;;  %v3463_v13 = vadd.s32 4294967184, %v6758_v36 }
 0x5d2   :  { %v3347_v53 = vsel %vm2862_vm1, %v3301_v50, 0.0 }
 0x5d3   :  { %3348 = vadd.xlane.f32.xlu0 %v3347_v53  ;;  %v3459_v53 = vsub.s32 %v3456_v32, %v6847_v34 }
 0x624   :  { %v3310_v2 = vpop.xlane.xlu1 %3309 }
 0x625   :  { %v3383_v63 = vrot.slane %v3310_v2, %v3382_v56 }
 0x628   :  { %v3304_v7 = vpop.xlane.xlu1 %3303 }
 0x629   :  { %v3371_v37 = vrot.slane %v3304_v7, %v3370_v22  ;;  %v3466_v7 = vsub.s32 %v3463_v13, %v6847_v34 }
 0x62d   :  { %v3313_v23 = vpop.xlane.xlu0 %3312 }
 0x62e   :  { %v3390_v6 = vrot.slane %v3313_v23, %v3389_v10 }
 0x631   :  { %v3307_v46 = vpop.xlane.xlu0 %3306 }
 0x632   :  { %v3376_v4 = vrot.slane %v3307_v46, %v3375_v47 }
 0x634   :  { %v3378_v45 = vsel %vm3377_vm2, %v3376_v4, %v3371_v37 }
 0x635   :  { %v3385_v14 = vsel %vm3384_vm3, %v3383_v63, %v3378_v45 }
 0x636   :  { %v3392_v28 = vsel %vm3391_vm4, %v3390_v6, %v3385_v14 }
 0x63c   :  { %v3322_v12 = vpop.xlane.xlu1 %3321 }
 0x63d   :  { %v3411_v41 = vrot.slane %v3322_v12, %v3410_v61 }
 0x63e   :  { %v3325_v19 = vpop.xlane.xlu0 %3324 }
 0x63f   :  { %v3418_v25 = vrot.slane %v3325_v19, %v3417_v26 }
 0x646   :  { %v3316_v48 = vpop.xlane.xlu1 %3315 }
 0x647   :  { %v3397_v39 = vrot.slane %v3316_v48, %v3396_v60 }
 0x649   :  { %v3399_v44 = vsel %vm3398_vm5, %v3397_v39, %v3392_v28 }
 0x64b   :  { %v3319_v8 = vpop.xlane.xlu0 %3318 }
 0x64c   :  { %v3404_v33 = vrot.slane %v3319_v8, %v3403_v16  ;;  %v3334_v15 = vpop.xlane.xlu1 %3333 }
 0x64d   :  { %v3439_v35 = vrot.slane %v3334_v15, %v3438_v40 }
 0x64e   :  { %v3406_v21 = vsel %vm3405_vm6, %v3404_v33, %v3399_v44 }
 0x64f   :  { %v3413_v59 = vsel %vm3412_vm7, %v3411_v41, %v3406_v21  ;;  %v3337_v17 = vpop.xlane.xlu0 %3336 }
 0x650   :  { %v3328_v52 = vpop.xlane.xlu1 %3327  ;;  %v3420_v5 = vsel %vm3419_vm8, %v3418_v25, %v3413_v59  ;;  %v3446_v2 = vrot.slane %v3337_v17, %v3445_v43 }
 0x651   :  { %v3425_v1 = vrot.slane %v3328_v52, %v3424_v51 }
 0x653   :  { %v3427_v54 = vsel %vm3426_vm9, %v3425_v1, %v3420_v5  ;;  %v3331_v62 = vpop.xlane.xlu0 %3330 }
 0x654   :  { %v3432_v3 = vrot.slane %v3331_v62, %v3431_v11 }
 0x656   :  { %v3434_v42 = vsel %vm3433_vm10, %v3432_v3, %v3427_v54 }
 0x657   :  { %v3441_v50 = vsel %vm3440_vm11, %v3439_v35, %v3434_v42 }
 0x658   :  { %v3448_v47 = vsel %vm3447_vm12, %v3446_v2, %v3441_v50 }
 0x65a   :  { %v3340_v23 = vpop.xlane.xlu1 %3339 }
 0x65b   :  { %v3453_v27 = vrot.slane %v3340_v23, %v3452_v31 }
 0x65c   :  { %v3343_v30 = vpop.xlane.xlu0 %3342 }
 0x65d   :  { %v3455_v46 = vsel %vm3454_vm13, %v3453_v27, %v3448_v47  ;;  %v3460_v22 = vrot.slane %v3343_v30, %v3459_v53 }
 0x65e   :  { %v3346_v20 = vpop.xlane.xlu1 %3345 }
 0x65f   :  { %v3462_v4 = vsel %vm3461_vm14, %v3460_v22, %v3455_v46  ;;  %v3467_v12 = vrot.slane %v3346_v20, %v3466_v7 }
 0x660   :  { %v3349_v56 = vpop.xlane.xlu0 %3348 }
 0x661   :  { %v3469_v36 = vsel %vm3468_vm15, %v3467_v12, %v3462_v4  ;;  %v3474_v37 = vrot.slane %v3349_v56, %v3473_v55 }
 0x663   :  { %v3476_v60 = vsel %vm3475_vm0, %v3474_v37, %v3469_v36 }
 0x664   :  { %3478 = vst [vmem:[%s6803_s8] sm:$0x1] %v3476_v60 }

</bundles_post_ra>
